<compile_context>
chip_gen: v7x
topology: tpu7x:2x2x1
jax: 0.10.0
libtpu: 0.0.40
codegen_flags: <defaults>
</compile_context>

<pallas_src>
import functools

import jax
import jax.numpy as jnp
from jax.experimental import pallas as pl
from jax.experimental.pallas import tpu as pltpu


# ---------------------------------------------------------------------------
# Fused kernel: conv-as-matmul + ReLU + global-avg-pool + RNN(tanh) + Linear.
# Single grid step; everything stays resident in VMEM.
# ---------------------------------------------------------------------------
def _fused_cnn_rnn_kernel(patch_ref, wconv_ref, bconv_ref,
                          wih_ref, whh_ref, brnn_ref, wfc_ref, bfc_ref,
                          out_ref, *, T, B, HW):
    F = wconv_ref.shape[1]
    Hd = whh_ref.shape[0]
    inv_hw = 1.0 / float(HW)                      # precomputed reciprocal

    # ---- CNN phase: ONE matmul over all T*B frames (no per-frame grid) ----
    conv = jnp.dot(patch_ref[...], wconv_ref[...],
                   preferred_element_type=jnp.float32) + bconv_ref[...]
    act = jnp.maximum(conv, 0.0)                  # (T*B*HW, F)

    # Global average pool per frame (rows are (t, b)-major, HW contiguous).
    feats = jnp.sum(act.reshape(T * B, HW, F), axis=1) * inv_hw   # (T*B, F)

    # ---- Hoisted, time-parallel input projection for ALL timesteps ----
    pre = jnp.dot(feats, wih_ref[...],
                  preferred_element_type=jnp.float32) + brnn_ref[...]  # (T*B, Hd)

    # ---- Serial recurrence: only h @ W_hh + tanh on the critical path ----
    whh = whh_ref[...]
    h = jnp.zeros((B, Hd), jnp.float32)
    for t in range(T):                            # T is static; fully unrolled
        h = jnp.tanh(pre[t * B:(t + 1) * B, :]
                     + jnp.dot(h, whh, preferred_element_type=jnp.float32))

    # ---- Final Linear, single output store ----
    out_ref[...] = (jnp.dot(h, wfc_ref[...],
                            preferred_element_type=jnp.float32)
                    + bfc_ref[...])


# ---------------------------------------------------------------------------
# XLA glue: im2col for 3x3 / stride 1 / pad 1 conv, frames ordered (t, b).
# Columns ordered (tap, channel); the synthetic w_conv uses the same ordering.
# ---------------------------------------------------------------------------
def extract_patches(x):
    """x: (B, T, C, H, W) -> patches (T*B*H*W, 9*C)."""
    B, T, C, Hh, Ww = x.shape
    f = jnp.transpose(x, (1, 0, 3, 4, 2)).reshape(T * B, Hh, Ww, C)  # NHWC
    xp = jnp.pad(f, ((0, 0), (1, 1), (1, 1), (0, 0)))
    taps = [xp[:, di:di + Hh, dj:dj + Ww, :]
            for di in range(3) for dj in range(3)]
    p = jnp.stack(taps, axis=3)                   # (T*B, H, W, 9, C)
    return p.reshape(T * B * Hh * Ww, 9 * C)


# ---------------------------------------------------------------------------
# Full model forward (one pallas_call).
# ---------------------------------------------------------------------------
def cnn_rnn_forward(x, params):
    B, T, C, Hh, Ww = x.shape
    HW = Hh * Ww
    patches = extract_patches(x)                  # (T*B*HW, 9*C)

    CKK = patches.shape[1]
    F = params["w_conv"].shape[1]
    Hd = params["w_hh"].shape[0]
    O = params["w_fc"].shape[1]

    kernel = functools.partial(_fused_cnn_rnn_kernel, T=T, B=B, HW=HW)

    full = lambda i: (0, 0)                       # single grid step

    flops = 2 * (patches.shape[0] * CKK * F       # conv matmul
                 + T * B * F * Hd                 # input projection
                 + T * B * Hd * Hd                # recurrence
                 + B * Hd * O)                    # final linear
    bytes_accessed = 4 * (patches.size + params["w_conv"].size
                          + params["b_conv"].size + params["w_ih"].size
                          + params["w_hh"].size + params["b_rnn"].size
                          + params["w_fc"].size + params["b_fc"].size
                          + B * O)
    cost = pl.CostEstimate(flops=int(flops),
                           transcendentals=int(T * B * Hd),
                           bytes_accessed=int(bytes_accessed))

    return pl.pallas_call(
        kernel,
        out_shape=jax.ShapeDtypeStruct((B, O), jnp.float32),
        grid_spec=pltpu.PrefetchScalarGridSpec(
            num_scalar_prefetch=0,
            grid=(1,),
            in_specs=[
                pl.BlockSpec(patches.shape, full),
                pl.BlockSpec(params["w_conv"].shape, full),
                pl.BlockSpec(params["b_conv"].shape, full),
                pl.BlockSpec(params["w_ih"].shape, full),
                pl.BlockSpec(params["w_hh"].shape, full),
                pl.BlockSpec(params["b_rnn"].shape, full),
                pl.BlockSpec(params["w_fc"].shape, full),
                pl.BlockSpec(params["b_fc"].shape, full),
            ],
            out_specs=pl.BlockSpec((B, O), full),
        ),
        compiler_params=pltpu.CompilerParams(
            dimension_semantics=("arbitrary",)),
        cost_estimate=cost,
    )(patches, params["w_conv"], params["b_conv"], params["w_ih"],
      params["w_hh"], params["b_rnn"], params["w_fc"], params["b_fc"])


# ---------------------------------------------------------------------------
# Pure-JAX reference (same math / same patch layout) for correctness check.
# ---------------------------------------------------------------------------
def reference_forward(x, params):
    B, T, C, Hh, Ww = x.shape
    HW = Hh * Ww
    patches = extract_patches(x)                                  # (T*B*HW, 9C)
    conv = jnp.maximum(patches @ params["w_conv"] + params["b_conv"], 0.0)
    feats = conv.reshape(T * B, HW, -1).mean(axis=1)              # (T*B, F)
    h = jnp.zeros((B, params["w_hh"].shape[0]), jnp.float32)
    for t in range(T):
        x_t = feats[t * B:(t + 1) * B]
        h = jnp.tanh(x_t @ params["w_ih"] + h @ params["w_hh"]
                     + params["b_rnn"])
    return h @ params["w_fc"] + params["b_fc"]


if __name__ == "__main__":
    # Shapes consistent with the module's forward:
    # x: (batch=2, seq=8, channels=3, height=16, width=16)
    B, T, C, H, W = 2, 8, 3, 16, 16
    F_CONV = 16          # synthetic-CNN feature size (== conv_output_size)
    HIDDEN = 32          # hidden_size
    OUTPUT = 10          # output_size

    key = jax.random.PRNGKey(0)
    ks = jax.random.split(key, 8)

    params = {
        # synthetic Conv2d(C, F_CONV, 3, padding=1) weight, stored as
        # (9*C, F) with (tap, channel)-ordered rows matching extract_patches
        "w_conv": 0.1 * jax.random.normal(ks[0], (9 * C, F_CONV), jnp.float32),
        "b_conv": 0.1 * jax.random.normal(ks[1], (1, F_CONV), jnp.float32),
        # nn.RNN weights (pre-transposed: x @ W_ih, h @ W_hh); b_ih+b_hh merged
        "w_ih": 0.1 * jax.random.normal(ks[2], (F_CONV, HIDDEN), jnp.float32),
        "w_hh": 0.1 * jax.random.normal(ks[3], (HIDDEN, HIDDEN), jnp.float32),
        "b_rnn": 0.1 * jax.random.normal(ks[4], (1, HIDDEN), jnp.float32),
        # nn.Linear(hidden, output), pre-transposed
        "w_fc": 0.1 * jax.random.normal(ks[5], (HIDDEN, OUTPUT), jnp.float32),
        "b_fc": 0.1 * jax.random.normal(ks[6], (1, OUTPUT), jnp.float32),
    }

    x = jax.random.normal(ks[7], (B, T, C, H, W), jnp.float32)

    fwd = jax.jit(cnn_rnn_forward)
    out = jax.block_until_ready(fwd(x, params))
    ref = jax.block_until_ready(reference_forward(x, params))

    assert out.shape == (B, OUTPUT), out.shape
    assert jnp.allclose(out, ref, atol=1e-4, rtol=1e-4), \
        f"max abs err {jnp.max(jnp.abs(out - ref))}"

    print("KERNEL_OK")
</pallas_src>

<mosaic_0001>
module attributes {stable_mosaic.version = 11 : i64} {
  func.func @_fused_cnn_rnn_kernel(%arg0: i32, %arg1: memref<4096x27xf32, #tpu.memory_space<vmem>>, %arg2: memref<27x16xf32, #tpu.memory_space<vmem>>, %arg3: memref<1x16xf32, #tpu.memory_space<vmem>>, %arg4: memref<16x32xf32, #tpu.memory_space<vmem>>, %arg5: memref<32x32xf32, #tpu.memory_space<vmem>>, %arg6: memref<1x32xf32, #tpu.memory_space<vmem>>, %arg7: memref<32x10xf32, #tpu.memory_space<vmem>>, %arg8: memref<1x10xf32, #tpu.memory_space<vmem>>, %arg9: memref<2x10xf32, #tpu.memory_space<vmem>>) attributes {dimension_semantics = [#tpu.dimension_semantics<arbitrary>], iteration_bounds = array<i64: 1>, scalar_prefetch = 0 : i64, scratch_operands = 0 : i64, tpu.core_type = #tpu.core_type<tc>, window_params = [{pipeline_mode = #tpu.pipeline_mode<synchronous>, transform_indices = @transform_0, window_bounds = array<i64: 4096, 27>}, {pipeline_mode = #tpu.pipeline_mode<synchronous>, transform_indices = @transform_1, window_bounds = array<i64: 27, 16>}, {pipeline_mode = #tpu.pipeline_mode<synchronous>, transform_indices = @transform_2, window_bounds = array<i64: 1, 16>}, {pipeline_mode = #tpu.pipeline_mode<synchronous>, transform_indices = @transform_3, window_bounds = array<i64: 16, 32>}, {pipeline_mode = #tpu.pipeline_mode<synchronous>, transform_indices = @transform_4, window_bounds = array<i64: 32, 32>}, {pipeline_mode = #tpu.pipeline_mode<synchronous>, transform_indices = @transform_5, window_bounds = array<i64: 1, 32>}, {pipeline_mode = #tpu.pipeline_mode<synchronous>, transform_indices = @transform_6, window_bounds = array<i64: 32, 10>}, {pipeline_mode = #tpu.pipeline_mode<synchronous>, transform_indices = @transform_7, window_bounds = array<i64: 1, 10>}, {pipeline_mode = #tpu.pipeline_mode<synchronous>, transform_indices = @transform_8, window_bounds = array<i64: 2, 10>}]} {
    %c0 = arith.constant 0 : index
    %c0_0 = arith.constant 0 : index
    %0 = vector.load %arg1[%c0, %c0_0] : memref<4096x27xf32, #tpu.memory_space<vmem>>, vector<4096x27xf32>
    %c0_1 = arith.constant 0 : index
    %c0_2 = arith.constant 0 : index
    %1 = vector.load %arg2[%c0_1, %c0_2] : memref<27x16xf32, #tpu.memory_space<vmem>>, vector<27x16xf32>
    %cst = arith.constant dense<0.000000e+00> : vector<4096x16xf32>
    %2 = tpu.matmul %0, %1, %cst {dimension_numbers = #tpu.dot_dimension_numbers<[1], [0], [0], [1], [0, 0, 1, 1], [], []>} : vector<4096x27xf32>, vector<27x16xf32>, vector<4096x16xf32> -> vector<4096x16xf32>
    %c0_3 = arith.constant 0 : index
    %c0_4 = arith.constant 0 : index
    %3 = vector.load %arg3[%c0_3, %c0_4] : memref<1x16xf32, #tpu.memory_space<vmem>>, vector<1x16xf32>
    %4 = vector.broadcast %3 : vector<1x16xf32> to vector<4096x16xf32>
    %5 = arith.addf %2, %4 : vector<4096x16xf32>
    %cst_5 = arith.constant 0.000000e+00 : f32
    %6 = vector.broadcast %cst_5 : f32 to vector<4096x16xf32>
    %7 = arith.maximumf %5, %6 : vector<4096x16xf32>
    %8 = vector.shape_cast %7 : vector<4096x16xf32> to vector<16x256x16xf32>
    %cst_6 = arith.constant dense<0.000000e+00> : vector<16x16xf32>
    %9 = vector.multi_reduction <add>, %8, %cst_6 [1] : vector<16x256x16xf32> to vector<16x16xf32>
    %cst_7 = arith.constant 3.906250e-03 : f32
    %10 = vector.broadcast %cst_7 : f32 to vector<16x16xf32>
    %11 = arith.mulf %9, %10 : vector<16x16xf32>
    %c0_8 = arith.constant 0 : index
    %c0_9 = arith.constant 0 : index
    %12 = vector.load %arg4[%c0_8, %c0_9] : memref<16x32xf32, #tpu.memory_space<vmem>>, vector<16x32xf32>
    %cst_10 = arith.constant dense<0.000000e+00> : vector<16x32xf32>
    %13 = tpu.matmul %11, %12, %cst_10 {dimension_numbers = #tpu.dot_dimension_numbers<[1], [0], [0], [1], [0, 0, 1, 1], [], []>} : vector<16x16xf32>, vector<16x32xf32>, vector<16x32xf32> -> vector<16x32xf32>
    %c0_11 = arith.constant 0 : index
    %c0_12 = arith.constant 0 : index
    %14 = vector.load %arg6[%c0_11, %c0_12] : memref<1x32xf32, #tpu.memory_space<vmem>>, vector<1x32xf32>
    %15 = vector.broadcast %14 : vector<1x32xf32> to vector<16x32xf32>
    %16 = arith.addf %13, %15 : vector<16x32xf32>
    %c0_13 = arith.constant 0 : index
    %c0_14 = arith.constant 0 : index
    %17 = vector.load %arg5[%c0_13, %c0_14] : memref<32x32xf32, #tpu.memory_space<vmem>>, vector<32x32xf32>
    %cst_15 = arith.constant 0.000000e+00 : f32
    %18 = vector.broadcast %cst_15 : f32 to vector<2x32xf32>
    %19 = vector.extract_strided_slice %16 {offsets = [0, 0], sizes = [2, 32], strides = [1, 1]} : vector<16x32xf32> to vector<2x32xf32>
    %cst_16 = arith.constant dense<0.000000e+00> : vector<2x32xf32>
    %20 = tpu.matmul %18, %17, %cst_16 {dimension_numbers = #tpu.dot_dimension_numbers<[1], [0], [0], [1], [0, 0, 1, 1], [], []>} : vector<2x32xf32>, vector<32x32xf32>, vector<2x32xf32> -> vector<2x32xf32>
    %21 = arith.addf %19, %20 : vector<2x32xf32>
    %22 = math.tanh %21 : vector<2x32xf32>
    %23 = vector.extract_strided_slice %16 {offsets = [2, 0], sizes = [2, 32], strides = [1, 1]} : vector<16x32xf32> to vector<2x32xf32>
    %cst_17 = arith.constant dense<0.000000e+00> : vector<2x32xf32>
    %24 = tpu.matmul %22, %17, %cst_17 {dimension_numbers = #tpu.dot_dimension_numbers<[1], [0], [0], [1], [0, 0, 1, 1], [], []>} : vector<2x32xf32>, vector<32x32xf32>, vector<2x32xf32> -> vector<2x32xf32>
    %25 = arith.addf %23, %24 : vector<2x32xf32>
    %26 = math.tanh %25 : vector<2x32xf32>
    %27 = vector.extract_strided_slice %16 {offsets = [4, 0], sizes = [2, 32], strides = [1, 1]} : vector<16x32xf32> to vector<2x32xf32>
    %cst_18 = arith.constant dense<0.000000e+00> : vector<2x32xf32>
    %28 = tpu.matmul %26, %17, %cst_18 {dimension_numbers = #tpu.dot_dimension_numbers<[1], [0], [0], [1], [0, 0, 1, 1], [], []>} : vector<2x32xf32>, vector<32x32xf32>, vector<2x32xf32> -> vector<2x32xf32>
    %29 = arith.addf %27, %28 : vector<2x32xf32>
    %30 = math.tanh %29 : vector<2x32xf32>
    %31 = vector.extract_strided_slice %16 {offsets = [6, 0], sizes = [2, 32], strides = [1, 1]} : vector<16x32xf32> to vector<2x32xf32>
    %cst_19 = arith.constant dense<0.000000e+00> : vector<2x32xf32>
    %32 = tpu.matmul %30, %17, %cst_19 {dimension_numbers = #tpu.dot_dimension_numbers<[1], [0], [0], [1], [0, 0, 1, 1], [], []>} : vector<2x32xf32>, vector<32x32xf32>, vector<2x32xf32> -> vector<2x32xf32>
    %33 = arith.addf %31, %32 : vector<2x32xf32>
    %34 = math.tanh %33 : vector<2x32xf32>
    %35 = vector.extract_strided_slice %16 {offsets = [8, 0], sizes = [2, 32], strides = [1, 1]} : vector<16x32xf32> to vector<2x32xf32>
    %cst_20 = arith.constant dense<0.000000e+00> : vector<2x32xf32>
    %36 = tpu.matmul %34, %17, %cst_20 {dimension_numbers = #tpu.dot_dimension_numbers<[1], [0], [0], [1], [0, 0, 1, 1], [], []>} : vector<2x32xf32>, vector<32x32xf32>, vector<2x32xf32> -> vector<2x32xf32>
    %37 = arith.addf %35, %36 : vector<2x32xf32>
    %38 = math.tanh %37 : vector<2x32xf32>
    %39 = vector.extract_strided_slice %16 {offsets = [10, 0], sizes = [2, 32], strides = [1, 1]} : vector<16x32xf32> to vector<2x32xf32>
    %cst_21 = arith.constant dense<0.000000e+00> : vector<2x32xf32>
    %40 = tpu.matmul %38, %17, %cst_21 {dimension_numbers = #tpu.dot_dimension_numbers<[1], [0], [0], [1], [0, 0, 1, 1], [], []>} : vector<2x32xf32>, vector<32x32xf32>, vector<2x32xf32> -> vector<2x32xf32>
    %41 = arith.addf %39, %40 : vector<2x32xf32>
    %42 = math.tanh %41 : vector<2x32xf32>
    %43 = vector.extract_strided_slice %16 {offsets = [12, 0], sizes = [2, 32], strides = [1, 1]} : vector<16x32xf32> to vector<2x32xf32>
    %cst_22 = arith.constant dense<0.000000e+00> : vector<2x32xf32>
    %44 = tpu.matmul %42, %17, %cst_22 {dimension_numbers = #tpu.dot_dimension_numbers<[1], [0], [0], [1], [0, 0, 1, 1], [], []>} : vector<2x32xf32>, vector<32x32xf32>, vector<2x32xf32> -> vector<2x32xf32>
    %45 = arith.addf %43, %44 : vector<2x32xf32>
    %46 = math.tanh %45 : vector<2x32xf32>
    %47 = vector.extract_strided_slice %16 {offsets = [14, 0], sizes = [2, 32], strides = [1, 1]} : vector<16x32xf32> to vector<2x32xf32>
    %cst_23 = arith.constant dense<0.000000e+00> : vector<2x32xf32>
    %48 = tpu.matmul %46, %17, %cst_23 {dimension_numbers = #tpu.dot_dimension_numbers<[1], [0], [0], [1], [0, 0, 1, 1], [], []>} : vector<2x32xf32>, vector<32x32xf32>, vector<2x32xf32> -> vector<2x32xf32>
    %49 = arith.addf %47, %48 : vector<2x32xf32>
    %50 = math.tanh %49 : vector<2x32xf32>
    %c0_24 = arith.constant 0 : index
    %c0_25 = arith.constant 0 : index
    %51 = vector.load %arg7[%c0_24, %c0_25] : memref<32x10xf32, #tpu.memory_space<vmem>>, vector<32x10xf32>
    %cst_26 = arith.constant dense<0.000000e+00> : vector<2x10xf32>
    %52 = tpu.matmul %50, %51, %cst_26 {dimension_numbers = #tpu.dot_dimension_numbers<[1], [0], [0], [1], [0, 0, 1, 1], [], []>} : vector<2x32xf32>, vector<32x10xf32>, vector<2x10xf32> -> vector<2x10xf32>
    %c0_27 = arith.constant 0 : index
    %c0_28 = arith.constant 0 : index
    %53 = vector.load %arg8[%c0_27, %c0_28] : memref<1x10xf32, #tpu.memory_space<vmem>>, vector<1x10xf32>
    %54 = vector.broadcast %53 : vector<1x10xf32> to vector<2x10xf32>
    %55 = arith.addf %52, %54 : vector<2x10xf32>
    %c0_29 = arith.constant 0 : index
    %c0_30 = arith.constant 0 : index
    %56 = vector.load %arg9[%c0_29, %c0_30] : memref<2x10xf32, #tpu.memory_space<vmem>>, vector<2x10xf32>
    tpu.vector_store %arg9[%c0_29, %c0_30], %55 {strides = array<i32>} : memref<2x10xf32, #tpu.memory_space<vmem>>, vector<2x10xf32>,
    return
  }
  func.func @transform_0(%arg0: i32) -> (i32, i32) {
    %c0_i32 = arith.constant 0 : i32
    %c0_i32_0 = arith.constant 0 : i32
    %c0_i32_1 = arith.constant 0 : i32
    return %c0_i32, %c0_i32_0 : i32, i32
  }
  func.func @transform_1(%arg0: i32) -> (i32, i32) {
    %c0_i32 = arith.constant 0 : i32
    %c0_i32_0 = arith.constant 0 : i32
    %c0_i32_1 = arith.constant 0 : i32
    return %c0_i32, %c0_i32_0 : i32, i32
  }
  func.func @transform_2(%arg0: i32) -> (i32, i32) {
    %c0_i32 = arith.constant 0 : i32
    %c0_i32_0 = arith.constant 0 : i32
    %c0_i32_1 = arith.constant 0 : i32
    return %c0_i32, %c0_i32_0 : i32, i32
  }
  func.func @transform_3(%arg0: i32) -> (i32, i32) {
    %c0_i32 = arith.constant 0 : i32
    %c0_i32_0 = arith.constant 0 : i32
    %c0_i32_1 = arith.constant 0 : i32
    return %c0_i32, %c0_i32_0 : i32, i32
  }
  func.func @transform_4(%arg0: i32) -> (i32, i32) {
    %c0_i32 = arith.constant 0 : i32
    %c0_i32_0 = arith.constant 0 : i32
    %c0_i32_1 = arith.constant 0 : i32
    return %c0_i32, %c0_i32_0 : i32, i32
  }
  func.func @transform_5(%arg0: i32) -> (i32, i32) {
    %c0_i32 = arith.constant 0 : i32
    %c0_i32_0 = arith.constant 0 : i32
    %c0_i32_1 = arith.constant 0 : i32
    return %c0_i32, %c0_i32_0 : i32, i32
  }
  func.func @transform_6(%arg0: i32) -> (i32, i32) {
    %c0_i32 = arith.constant 0 : i32
    %c0_i32_0 = arith.constant 0 : i32
    %c0_i32_1 = arith.constant 0 : i32
    return %c0_i32, %c0_i32_0 : i32, i32
  }
  func.func @transform_7(%arg0: i32) -> (i32, i32) {
    %c0_i32 = arith.constant 0 : i32
    %c0_i32_0 = arith.constant 0 : i32
    %c0_i32_1 = arith.constant 0 : i32
    return %c0_i32, %c0_i32_0 : i32, i32
  }
  func.func @transform_8(%arg0: i32) -> (i32, i32) {
    %c0_i32 = arith.constant 0 : i32
    %c0_i32_0 = arith.constant 0 : i32
    %c0_i32_1 = arith.constant 0 : i32
    return %c0_i32, %c0_i32_0 : i32, i32
  }
}

</mosaic_0001>

<bundles_post_ra>
// kernel: cnn_rnn_forward.1
= control target key start
LH: loop header
LB: loop body
LE: loop exit
PB: predicated region body
PF: predicated region fallthrough
CT: control target
= control target key end

     0   :  { %vm2090_vm0 = vcmask 1042432   ;;  %vm553_vm1 = vcmask 220160   ;;  %vm9302_vm2 = vmmov 1   ;;  %s13270_s0 = inlined_call_operand.vmem [shape: f32[4096,27], index: 0, kind: input, shape index: {}]   ;;  %s13271_s1 = inlined_call_operand.vmem [shape: f32[27,16], index: 1, kind: input, shape index: {}]   ;;  %s13272_s2 = inlined_call_operand.vmem [shape: f32[1,16], index: 2, kind: input, shape index: {}]   ;;  %s13273_s3 = inlined_call_operand.vmem [shape: f32[16,32], index: 3, kind: input, shape index: {}]   ;;  %s13274_s4 = inlined_call_operand.vmem [shape: f32[32,32], index: 4, kind: input, shape index: {}]   ;;  %s13275_s5 = inlined_call_operand.vmem [shape: f32[1,32], index: 5, kind: input, shape index: {}]   ;;  %s13276_s6 = inlined_call_operand.vmem [shape: f32[32,10], index: 6, kind: input, shape index: {}]   ;;  %s13277_s7 = inlined_call_operand.vmem [shape: f32[1,10], index: 7, kind: input, shape index: {}]   ;;  %s13278_s8 = inlined_call_operand.hbm [shape: f32[2,10], index: 8, kind: output, shape index: {}]  }
   0x1   :  { %v542_v0 = vld [vmem:[%s13271_s1] sm:$0xff]  ;;  %v543_v1 = vld [vmem:[%s13271_s1 + $0x8] sm:$0xff]  ;;  %v544_v2 = vld [vmem:[%s13271_s1 + $0x10] sm:$0xff] }
   0x2   :  { %v9179_v3 = vpack.c.bf16 %v543_v1, %v542_v0  ;;  %v545_v4 = vld [vmem:[%s13271_s1 + $0x18] sm:$0x7]  ;;  %v30_v5 = vld [vmem:[%s13270_s0] sm:$0xff]  ;;  %vm9184_vm3 = vmpackc.low %vm2090_vm0, %vm9302_vm2 }
   0x3   :  { %v9183_v6 = vpack.c.bf16 %v545_v4, %v544_v2  ;;  %8305 = vmatprep.mubr.msk.f32.mxu0 %vm553_vm1, %v30_v5  ;;  %v31_v7 = vld [vmem:[%s13270_s0 + $0x8] sm:$0xff]  ;;  %v32_v8 = vld [vmem:[%s13270_s0 + $0x10] sm:$0xff]  ;;  %v33_v9 = vld [vmem:[%s13270_s0 + $0x18] sm:$0xff] }
   0x4   :  { %9180 = vmatprep.subr.bf16.mxu0 %v9179_v3  ;;  %9247 = vmatprep.subr.bf16.mxu1 %v9179_v3  ;;  %v34_v10 = vld [vmem:[%s13270_s0 + $0x20] sm:$0xff]  ;;  %v35_v11 = vld [vmem:[%s13270_s0 + $0x28] sm:$0xff]  ;;  %v36_v12 = vld [vmem:[%s13270_s0 + $0x30] sm:$0xff] }
   0x5   :  { %9182 = vmatpush3.bf16.msra.mxu0 %v9179_v3  ;;  %9249 = vmatpush3.bf16.msra.mxu1 %v9179_v3  ;;  %v306_v13 = vld [vmem:[%s13270_s0 + $0x8a0] sm:$0xff]  ;;  %v307_v14 = vld [vmem:[%s13270_s0 + $0x8a8] sm:$0xff]  ;;  %v37_v15 = vld [vmem:[%s13270_s0 + $0x38] sm:$0xff] }
   0x6   :  { %9185 = vmatprep.subr.msk.bf16.mxu0 %vm9184_vm3, %v9183_v6  ;;  %9248 = vmatprep.subr.msk.bf16.mxu1 %vm9184_vm3, %v9183_v6  ;;  %v308_v16 = vld [vmem:[%s13270_s0 + $0x8b0] sm:$0xff]  ;;  %v38_v17 = vld [vmem:[%s13270_s0 + $0x40] sm:$0xff]  ;;  %v309_v18 = vld [vmem:[%s13270_s0 + $0x8b8] sm:$0xff] }
   0x7   :  { %8719 = vmatprep.mubr.msk.f32.mxu1 %vm553_vm1, %v306_v13  ;;  %v310_v19 = vld [vmem:[%s13270_s0 + $0x8c0] sm:$0xff]  ;;  %v39_v20 = vld [vmem:[%s13270_s0 + $0x48] sm:$0xff]  ;;  %v40_v21 = vld [vmem:[%s13270_s0 + $0x50] sm:$0xff] }
   0x8   :  { %v311_v22 = vld [vmem:[%s13270_s0 + $0x8c8] sm:$0xff]  ;;  %v312_v23 = vld [vmem:[%s13270_s0 + $0x8d0] sm:$0xff]  ;;  %v41_v24 = vld [vmem:[%s13270_s0 + $0x58] sm:$0xff] }
   0x9   :  { %9188 = vmatpush3.bf16.msk.msra.mxu0 %vm9184_vm3, %v9183_v6  ;;  %9250 = vmatpush3.bf16.msk.msra.mxu1 %vm9184_vm3, %v9183_v6  ;;  %v42_v25 = vld [vmem:[%s13270_s0 + $0x60] sm:$0xff]  ;;  %v313_v26 = vld [vmem:[%s13270_s0 + $0x8d8] sm:$0xff]  ;;  %v43_v28 = vld [vmem:[%s13270_s0 + $0x68] sm:$0xff] }
   0xa   :  { %v314_v27 = vld [vmem:[%s13270_s0 + $0x8e0] sm:$0xff]  ;;  %v44_v29 = vld [vmem:[%s13270_s0 + $0x70] sm:$0xff]  ;;  %v315_v30 = vld [vmem:[%s13270_s0 + $0x8e8] sm:$0xff] }
   0xb   :  { %v316_v31 = vld [vmem:[%s13270_s0 + $0x8f0] sm:$0xff]  ;;  %v45_v32 = vld [vmem:[%s13270_s0 + $0x78] sm:$0xff]  ;;  %v46_v33 = vld [vmem:[%s13270_s0 + $0x80] sm:$0xff] }
   0xc   :  { %8306 = vmatmul.mubr.msk.f32.vlgmr.msra.gmra.mrb[0].mxu0 %vm553_vm1, %v31_v7  ;;  %8720 = vmatmul.mubr.msk.f32.vlgmr.msra.gmra.mrb[0].mxu1 %vm553_vm1, %v307_v14 }
   0xd   :  { %8308 = vmatprep.mubr.msk.f32.mxu0 %vm553_vm1, %v32_v8  ;;  %8722 = vmatprep.mubr.msk.f32.mxu1 %vm553_vm1, %v308_v16 }
  0x10   :  { %8309 = vmatmul.mubr.msk.f32.gmra.mrb[2].mxu0 %vm553_vm1, %v33_v9  ;;  %8723 = vmatmul.mubr.msk.f32.gmra.mrb[2].mxu1 %vm553_vm1, %v309_v18 }
  0x11   :  { %8311 = vmatprep.mubr.msk.f32.mxu0 %vm553_vm1, %v34_v10  ;;  %8725 = vmatprep.mubr.msk.f32.mxu1 %vm553_vm1, %v310_v19 }
  0x14   :  { %8312 = vmatmul.mubr.msk.f32.gmra.mrb[4].mxu0 %vm553_vm1, %v35_v11  ;;  %8726 = vmatmul.mubr.msk.f32.gmra.mrb[4].mxu1 %vm553_vm1, %v311_v22 }
  0x15   :  { %8314 = vmatprep.mubr.msk.f32.mxu0 %vm553_vm1, %v36_v12  ;;  %8728 = vmatprep.mubr.msk.f32.mxu1 %vm553_vm1, %v312_v23 }
  0x18   :  { %8315 = vmatmul.mubr.msk.f32.gmra.mrb[6].mxu0 %vm553_vm1, %v37_v15  ;;  %8729 = vmatmul.mubr.msk.f32.gmra.mrb[6].mxu1 %vm553_vm1, %v313_v26 }
  0x19   :  { %8317 = vmatprep.mubr.msk.f32.mxu0 %vm553_vm1, %v38_v17  ;;  %8731 = vmatprep.mubr.msk.f32.mxu1 %vm553_vm1, %v314_v27 }
  0x1c   :  { %8318 = vmatmul.mubr.msk.f32.gmra.mrb[8].mxu0 %vm553_vm1, %v39_v20  ;;  %8732 = vmatmul.mubr.msk.f32.gmra.mrb[8].mxu1 %vm553_vm1, %v315_v30 }
  0x1d   :  { %8320 = vmatprep.mubr.msk.f32.mxu0 %vm553_vm1, %v40_v21 }
  0x20   :  { %8321 = vmatmul.mubr.msk.f32.gmra.mrb[10].mxu0 %vm553_vm1, %v41_v24 }
  0x21   :  { %8323 = vmatprep.mubr.msk.f32.mxu0 %vm553_vm1, %v42_v25 }
  0x24   :  { %8324 = vmatmul.mubr.msk.f32.gmra.mrb[12].mxu0 %vm553_vm1, %v43_v28 }
  0x25   :  { %8326 = vmatprep.mubr.msk.f32.mxu0 %vm553_vm1, %v44_v29 }
  0x26   :  { %13 = vsyncpa [#allocation3], 0  ;;  %8734 = vmatprep.mubr.msk.f32.mxu1 %vm553_vm1, %v316_v31  ;;  %v317_v34 = vld [vmem:[%s13270_s0 + $0x8f8] sm:$0xff]  ;;  %v318_v35 = vld [vmem:[%s13270_s0 + $0x900] sm:$0xff]  ;;  %vm5231_vm4 = vcmask 130048   ;;  %vm6377_vm5 = vcmask 1041409  }
  0x27   :  { %v47_v36 = vld [vmem:[%s13270_s0 + $0x88] sm:$0xff]  ;;  %v48_v37 = vld [vmem:[%s13270_s0 + $0x90] sm:$0xff]  ;;  %8735 = vmatmul.mubr.msk.f32.gmra.mrb[10].mxu1 %vm553_vm1, %v317_v34  ;;  %v49_v40 = vld [vmem:[%s13270_s0 + $0x98] sm:$0xff]  ;;  %vm6379_vm6 = vcmask 1042434   ;;  %vm6381_vm7 = vcmask 1043459   ;;  %vm6383_vm8 = vcmask 1044484  }
  0x28   :  { %8327 = vmatmul.mubr.msk.f32.gmra.mrb[14].mxu0 %vm553_vm1, %v45_v32  ;;  %8737 = vmatprep.mubr.msk.f32.mxu1 %vm553_vm1, %v318_v35  ;;  %v319_v38 = vld [vmem:[%s13270_s0 + $0x908] sm:$0xff]  ;;  %v320_v39 = vld [vmem:[%s13270_s0 + $0x910] sm:$0xff]  ;;  %v50_v41 = vld [vmem:[%s13270_s0 + $0xa0] sm:$0xff]  ;;  %vm6385_vm9 = vcmask 1045509   ;;  %vm6387_vm10 = vcmask 1046534   ;;  %vm6389_vm11 = vcmask 1047559  }
  0x29   :  { %8329 = vmatprep.mubr.msk.f32.mxu0 %vm553_vm1, %v46_v33  ;;  %v321_v42 = vld [vmem:[%s13270_s0 + $0x918] sm:$0xff]  ;;  %v322_v43 = vld [vmem:[%s13270_s0 + $0x920] sm:$0xff]  ;;  %v51_v44 = vld [vmem:[%s13270_s0 + $0xa8] sm:$0xff]  ;;  %vm9304_vm12 = vmmov 0   ;;  %vm6481_vm13 = vcmask 261120   ;;  %vm7190_vm14 = vcmask 74752  }
  0x2a   :  { %v52_v45 = vld [vmem:[%s13270_s0 + $0xb0] sm:$0xff]  ;;  %v323_v46 = vld [vmem:[%s13270_s0 + $0x928] sm:$0xff]  ;;  %v53_v48 = vld [vmem:[%s13270_s0 + $0xb8] sm:$0xff] }
  0x2b   :  { %8738 = vmatmul.mubr.msk.f32.gmra.mrb[12].mxu1 %vm553_vm1, %v319_v38  ;;  %v324_v47 = vld [vmem:[%s13270_s0 + $0x930] sm:$0xff]  ;;  %v54_v49 = vld [vmem:[%s13270_s0 + $0xc0] sm:$0xff]  ;;  %v325_v50 = vld [vmem:[%s13270_s0 + $0x938] sm:$0xff] }
  0x2c   :  { %8330 = vmatmul.mubr.msk.f32.gmra.mrb[16].mxu0 %vm553_vm1, %v47_v36  ;;  %8740 = vmatprep.mubr.msk.f32.mxu1 %vm553_vm1, %v320_v39  ;;  %v326_v51 = vld [vmem:[%s13270_s0 + $0x940] sm:$0xff]  ;;  %v55_v52 = vld [vmem:[%s13270_s0 + $0xc8] sm:$0xff]  ;;  %v56_v53 = vld [vmem:[%s13270_s0 + $0xd0] sm:$0xff] }
  0x2d   :  { %8332 = vmatprep.mubr.msk.f32.mxu0 %vm553_vm1, %v48_v37  ;;  %v327_v54 = vld [vmem:[%s13270_s0 + $0x948] sm:$0xff]  ;;  %v328_v55 = vld [vmem:[%s13270_s0 + $0x950] sm:$0xff]  ;;  %v57_v56 = vld [vmem:[%s13270_s0 + $0xd8] sm:$0xff] }
  0x2e   :  { %v58_v57 = vld [vmem:[%s13270_s0 + $0xe0] sm:$0xff]  ;;  %v329_v58 = vld [vmem:[%s13270_s0 + $0x958] sm:$0xff]  ;;  %v59_v60 = vld [vmem:[%s13270_s0 + $0xe8] sm:$0xff] }
  0x2f   :  { %8741 = vmatmul.mubr.msk.f32.gmra.mrb[14].mxu1 %vm553_vm1, %v321_v42  ;;  %v330_v59 = vld [vmem:[%s13270_s0 + $0x960] sm:$0xff]  ;;  %v60_v61 = vld [vmem:[%s13270_s0 + $0xf0] sm:$0xff]  ;;  %v331_v62 = vld [vmem:[%s13270_s0 + $0x968] sm:$0xff] }
  0x30   :  { %8333 = vmatmul.mubr.msk.f32.gmra.mrb[18].mxu0 %vm553_vm1, %v49_v40  ;;  %8743 = vmatprep.mubr.msk.f32.mxu1 %vm553_vm1, %v322_v43  ;;  %v332_v63 = vld [vmem:[%s13270_s0 + $0x970] sm:$0xff]  ;;  %v61_v0 = vld [vmem:[%s13270_s0 + $0xf8] sm:$0xff]  ;;  %v62_v1 = vld [vmem:[%s13270_s0 + $0x100] sm:$0xff] }
  0x31   :  { %8335 = vmatprep.mubr.msk.f32.mxu0 %vm553_vm1, %v50_v41  ;;  %v333_v2 = vld [vmem:[%s13270_s0 + $0x978] sm:$0xff]  ;;  %v334_v3 = vld [vmem:[%s13270_s0 + $0x980] sm:$0xff]  ;;  %v63_v4 = vld [vmem:[%s13270_s0 + $0x108] sm:$0xff] }
  0x32   :  { %v64_v5 = vld [vmem:[%s13270_s0 + $0x110] sm:$0xff]  ;;  %v335_v6 = vld [vmem:[%s13270_s0 + $0x988] sm:$0xff]  ;;  %v65_v8 = vld [vmem:[%s13270_s0 + $0x118] sm:$0xff] }
  0x33   :  { %8744 = vmatmul.mubr.msk.f32.gmra.mrb[16].mxu1 %vm553_vm1, %v323_v46  ;;  %v336_v7 = vld [vmem:[%s13270_s0 + $0x990] sm:$0xff]  ;;  %v66_v9 = vld [vmem:[%s13270_s0 + $0x120] sm:$0xff]  ;;  %v337_v10 = vld [vmem:[%s13270_s0 + $0x998] sm:$0xff] }
  0x34   :  { %8336 = vmatmul.mubr.msk.f32.gmra.mrb[20].mxu0 %vm553_vm1, %v51_v44  ;;  %8746 = vmatprep.mubr.msk.f32.mxu1 %vm553_vm1, %v324_v47  ;;  %v338_v11 = vld [vmem:[%s13270_s0 + $0x9a0] sm:$0xff]  ;;  %v67_v12 = vld [vmem:[%s13270_s0 + $0x128] sm:$0xff]  ;;  %v68_v13 = vld [vmem:[%s13270_s0 + $0x130] sm:$0xff] }
  0x35   :  { %8338 = vmatprep.mubr.msk.f32.mxu0 %vm553_vm1, %v52_v45  ;;  %v339_v14 = vld [vmem:[%s13270_s0 + $0x9a8] sm:$0xff]  ;;  %v340_v15 = vld [vmem:[%s13270_s0 + $0x9b0] sm:$0xff]  ;;  %v69_v16 = vld [vmem:[%s13270_s0 + $0x138] sm:$0xff] }
  0x36   :  { %v70_v17 = vld [vmem:[%s13270_s0 + $0x140] sm:$0xff]  ;;  %v341_v18 = vld [vmem:[%s13270_s0 + $0x9b8] sm:$0xff]  ;;  %v71_v20 = vld [vmem:[%s13270_s0 + $0x148] sm:$0xff] }
  0x37   :  { %8747 = vmatmul.mubr.msk.f32.gmra.mrb[18].mxu1 %vm553_vm1, %v325_v50  ;;  %v342_v19 = vld [vmem:[%s13270_s0 + $0x9c0] sm:$0xff]  ;;  %v72_v21 = vld [vmem:[%s13270_s0 + $0x150] sm:$0xff]  ;;  %v343_v22 = vld [vmem:[%s13270_s0 + $0x9c8] sm:$0xff] }
  0x38   :  { %8339 = vmatmul.mubr.msk.f32.gmra.mrb[22].mxu0 %vm553_vm1, %v53_v48  ;;  %8749 = vmatprep.mubr.msk.f32.mxu1 %vm553_vm1, %v326_v51  ;;  %v344_v23 = vld [vmem:[%s13270_s0 + $0x9d0] sm:$0xff]  ;;  %v73_v24 = vld [vmem:[%s13270_s0 + $0x158] sm:$0xff]  ;;  %v74_v25 = vld [vmem:[%s13270_s0 + $0x160] sm:$0xff] }
  0x39   :  { %8341 = vmatprep.mubr.msk.f32.mxu0 %vm553_vm1, %v54_v49  ;;  %v345_v26 = vld [vmem:[%s13270_s0 + $0x9d8] sm:$0xff]  ;;  %v346_v27 = vld [vmem:[%s13270_s0 + $0x9e0] sm:$0xff]  ;;  %v75_v28 = vld [vmem:[%s13270_s0 + $0x168] sm:$0xff] }
  0x3a   :  { %v76_v29 = vld [vmem:[%s13270_s0 + $0x170] sm:$0xff]  ;;  %v347_v30 = vld [vmem:[%s13270_s0 + $0x9e8] sm:$0xff]  ;;  %v77_v32 = vld [vmem:[%s13270_s0 + $0x178] sm:$0xff] }
  0x3b   :  { %8750 = vmatmul.mubr.msk.f32.gmra.mrb[20].mxu1 %vm553_vm1, %v327_v54  ;;  %v348_v31 = vld [vmem:[%s13270_s0 + $0x9f0] sm:$0xff]  ;;  %v78_v33 = vld [vmem:[%s13270_s0 + $0x180] sm:$0xff]  ;;  %v349_v34 = vld [vmem:[%s13270_s0 + $0x9f8] sm:$0xff] }
  0x3c   :  { %8342 = vmatmul.mubr.msk.f32.gmra.mrb[24].mxu0 %vm553_vm1, %v55_v52  ;;  %8752 = vmatprep.mubr.msk.f32.mxu1 %vm553_vm1, %v328_v55  ;;  %v350_v35 = vld [vmem:[%s13270_s0 + $0xa00] sm:$0xff]  ;;  %v79_v36 = vld [vmem:[%s13270_s0 + $0x188] sm:$0xff]  ;;  %v80_v37 = vld [vmem:[%s13270_s0 + $0x190] sm:$0xff] }
  0x3d   :  { %8344 = vmatprep.mubr.msk.f32.mxu0 %vm553_vm1, %v56_v53  ;;  %v351_v38 = vld [vmem:[%s13270_s0 + $0xa08] sm:$0xff]  ;;  %v352_v39 = vld [vmem:[%s13270_s0 + $0xa10] sm:$0xff]  ;;  %v81_v40 = vld [vmem:[%s13270_s0 + $0x198] sm:$0xff] }
  0x3e   :  { %v82_v41 = vld [vmem:[%s13270_s0 + $0x1a0] sm:$0xff]  ;;  %v353_v42 = vld [vmem:[%s13270_s0 + $0xa18] sm:$0xff]  ;;  %v83_v44 = vld [vmem:[%s13270_s0 + $0x1a8] sm:$0xff] }
  0x3f   :  { %8753 = vmatmul.mubr.msk.f32.gmra.mrb[22].mxu1 %vm553_vm1, %v329_v58  ;;  %v354_v43 = vld [vmem:[%s13270_s0 + $0xa20] sm:$0xff]  ;;  %v84_v45 = vld [vmem:[%s13270_s0 + $0x1b0] sm:$0xff]  ;;  %v355_v46 = vld [vmem:[%s13270_s0 + $0xa28] sm:$0xff] }
  0x40   :  { %8345 = vmatmul.mubr.msk.f32.gmra.mrb[26].mxu0 %vm553_vm1, %v57_v56  ;;  %8755 = vmatprep.mubr.msk.f32.mxu1 %vm553_vm1, %v330_v59  ;;  %v356_v47 = vld [vmem:[%s13270_s0 + $0xa30] sm:$0xff]  ;;  %v85_v48 = vld [vmem:[%s13270_s0 + $0x1b8] sm:$0xff]  ;;  %v86_v49 = vld [vmem:[%s13270_s0 + $0x1c0] sm:$0xff] }
  0x41   :  { %8347 = vmatprep.mubr.msk.f32.mxu0 %vm553_vm1, %v58_v57  ;;  %v357_v50 = vld [vmem:[%s13270_s0 + $0xa38] sm:$0xff]  ;;  %v358_v51 = vld [vmem:[%s13270_s0 + $0xa40] sm:$0xff]  ;;  %v87_v52 = vld [vmem:[%s13270_s0 + $0x1c8] sm:$0xff] }
  0x42   :  { %v88_v53 = vld [vmem:[%s13270_s0 + $0x1d0] sm:$0xff]  ;;  %v359_v54 = vld [vmem:[%s13270_s0 + $0xa48] sm:$0xff]  ;;  %v89_v56 = vld [vmem:[%s13270_s0 + $0x1d8] sm:$0xff] }
  0x43   :  { %8756 = vmatmul.mubr.msk.f32.gmra.mrb[24].mxu1 %vm553_vm1, %v331_v62  ;;  %v360_v55 = vld [vmem:[%s13270_s0 + $0xa50] sm:$0xff]  ;;  %v90_v57 = vld [vmem:[%s13270_s0 + $0x1e0] sm:$0xff]  ;;  %v361_v58 = vld [vmem:[%s13270_s0 + $0xa58] sm:$0xff] }
  0x44   :  { %8348 = vmatmul.mubr.msk.f32.gmra.mrb[28].mxu0 %vm553_vm1, %v59_v60  ;;  %8758 = vmatprep.mubr.msk.f32.mxu1 %vm553_vm1, %v332_v63  ;;  %v362_v59 = vld [vmem:[%s13270_s0 + $0xa60] sm:$0xff]  ;;  %v91_v60 = vld [vmem:[%s13270_s0 + $0x1e8] sm:$0xff]  ;;  %v364_v63 = vld [vmem:[%s13270_s0 + $0xa70] sm:$0xff] }
  0x45   :  { %8350 = vmatprep.mubr.msk.f32.mxu0 %vm553_vm1, %v60_v61  ;;  %v92_v61 = vld [vmem:[%s13270_s0 + $0x1f0] sm:$0xff]  ;;  %v363_v62 = vld [vmem:[%s13270_s0 + $0xa68] sm:$0xff] }
  0x47   :  { %8759 = vmatmul.mubr.msk.f32.gmra.mrb[26].mxu1 %vm553_vm1, %v333_v2  ;;  %v365_v2 = vld [vmem:[%s13270_s0 + $0xa78] sm:$0xff] }
  0x48   :  { %8351 = vmatmul.mubr.msk.f32.gmra.mrb[30].mxu0 %vm553_vm1, %v61_v0  ;;  %8761 = vmatprep.mubr.msk.f32.mxu1 %vm553_vm1, %v334_v3  ;;  %v93_v0 = vld [vmem:[%s13270_s0 + $0x1f8] sm:$0xff]  ;;  %v366_v3 = vld [vmem:[%s13270_s0 + $0xa80] sm:$0xff] }
  0x49   :  { %8353 = vmatprep.mubr.msk.f32.mxu0 %vm553_vm1, %v62_v1  ;;  %v94_v1 = vld [vmem:[%s13270_s0 + $0x200] sm:$0xff] }
  0x4b   :  { %8762 = vmatmul.mubr.msk.f32.gmra.mrb[28].mxu1 %vm553_vm1, %v335_v6  ;;  %v367_v6 = vld [vmem:[%s13270_s0 + $0xa88] sm:$0xff] }
  0x4c   :  { %8354 = vmatmul.mubr.msk.f32.gmra.mrb[32].mxu0 %vm553_vm1, %v63_v4  ;;  %8764 = vmatprep.mubr.msk.f32.mxu1 %vm553_vm1, %v336_v7  ;;  %v95_v4 = vld [vmem:[%s13270_s0 + $0x208] sm:$0xff]  ;;  %v368_v7 = vld [vmem:[%s13270_s0 + $0xa90] sm:$0xff] }
  0x4d   :  { %8356 = vmatprep.mubr.msk.f32.mxu0 %vm553_vm1, %v64_v5  ;;  %v96_v5 = vld [vmem:[%s13270_s0 + $0x210] sm:$0xff] }
  0x4f   :  { %8765 = vmatmul.mubr.msk.f32.gmra.mrb[30].mxu1 %vm553_vm1, %v337_v10  ;;  %v369_v10 = vld [vmem:[%s13270_s0 + $0xa98] sm:$0xff] }
  0x50   :  { %8357 = vmatmul.mubr.msk.f32.gmra.mrb[34].mxu0 %vm553_vm1, %v65_v8  ;;  %8767 = vmatprep.mubr.msk.f32.mxu1 %vm553_vm1, %v338_v11  ;;  %v97_v8 = vld [vmem:[%s13270_s0 + $0x218] sm:$0xff]  ;;  %v370_v11 = vld [vmem:[%s13270_s0 + $0xaa0] sm:$0xff] }
  0x51   :  { %8359 = vmatprep.mubr.msk.f32.mxu0 %vm553_vm1, %v66_v9  ;;  %v98_v9 = vld [vmem:[%s13270_s0 + $0x220] sm:$0xff] }
  0x53   :  { %8768 = vmatmul.mubr.msk.f32.gmra.mrb[32].mxu1 %vm553_vm1, %v339_v14  ;;  %v371_v14 = vld [vmem:[%s13270_s0 + $0xaa8] sm:$0xff] }
  0x54   :  { %8360 = vmatmul.mubr.msk.f32.gmra.mrb[36].mxu0 %vm553_vm1, %v67_v12  ;;  %8770 = vmatprep.mubr.msk.f32.mxu1 %vm553_vm1, %v340_v15  ;;  %v99_v12 = vld [vmem:[%s13270_s0 + $0x228] sm:$0xff]  ;;  %v372_v15 = vld [vmem:[%s13270_s0 + $0xab0] sm:$0xff] }
  0x55   :  { %8362 = vmatprep.mubr.msk.f32.mxu0 %vm553_vm1, %v68_v13  ;;  %v100_v13 = vld [vmem:[%s13270_s0 + $0x230] sm:$0xff] }
  0x57   :  { %8771 = vmatmul.mubr.msk.f32.gmra.mrb[34].mxu1 %vm553_vm1, %v341_v18  ;;  %v373_v18 = vld [vmem:[%s13270_s0 + $0xab8] sm:$0xff] }
  0x58   :  { %8363 = vmatmul.mubr.msk.f32.gmra.mrb[38].mxu0 %vm553_vm1, %v69_v16  ;;  %8773 = vmatprep.mubr.msk.f32.mxu1 %vm553_vm1, %v342_v19  ;;  %v101_v16 = vld [vmem:[%s13270_s0 + $0x238] sm:$0xff]  ;;  %v374_v19 = vld [vmem:[%s13270_s0 + $0xac0] sm:$0xff] }
  0x59   :  { %8365 = vmatprep.mubr.msk.f32.mxu0 %vm553_vm1, %v70_v17  ;;  %v102_v17 = vld [vmem:[%s13270_s0 + $0x240] sm:$0xff] }
  0x5b   :  { %8774 = vmatmul.mubr.msk.f32.gmra.mrb[36].mxu1 %vm553_vm1, %v343_v22  ;;  %v375_v22 = vld [vmem:[%s13270_s0 + $0xac8] sm:$0xff] }
  0x5c   :  { %8366 = vmatmul.mubr.msk.f32.gmra.mrb[40].mxu0 %vm553_vm1, %v71_v20  ;;  %8776 = vmatprep.mubr.msk.f32.mxu1 %vm553_vm1, %v344_v23  ;;  %v103_v20 = vld [vmem:[%s13270_s0 + $0x248] sm:$0xff]  ;;  %v376_v23 = vld [vmem:[%s13270_s0 + $0xad0] sm:$0xff] }
  0x5d   :  { %8368 = vmatprep.mubr.msk.f32.mxu0 %vm553_vm1, %v72_v21  ;;  %v104_v21 = vld [vmem:[%s13270_s0 + $0x250] sm:$0xff] }
  0x5f   :  { %8777 = vmatmul.mubr.msk.f32.gmra.mrb[38].mxu1 %vm553_vm1, %v345_v26  ;;  %v377_v26 = vld [vmem:[%s13270_s0 + $0xad8] sm:$0xff] }
  0x60   :  { %8369 = vmatmul.mubr.msk.f32.gmra.mrb[42].mxu0 %vm553_vm1, %v73_v24  ;;  %8779 = vmatprep.mubr.msk.f32.mxu1 %vm553_vm1, %v346_v27  ;;  %v105_v24 = vld [vmem:[%s13270_s0 + $0x258] sm:$0xff]  ;;  %v378_v27 = vld [vmem:[%s13270_s0 + $0xae0] sm:$0xff] }
  0x61   :  { %8371 = vmatprep.mubr.msk.f32.mxu0 %vm553_vm1, %v74_v25  ;;  %v106_v25 = vld [vmem:[%s13270_s0 + $0x260] sm:$0xff] }
  0x63   :  { %8780 = vmatmul.mubr.msk.f32.gmra.mrb[40].mxu1 %vm553_vm1, %v347_v30  ;;  %v379_v30 = vld [vmem:[%s13270_s0 + $0xae8] sm:$0xff] }
  0x64   :  { %8372 = vmatmul.mubr.msk.f32.gmra.mrb[44].mxu0 %vm553_vm1, %v75_v28  ;;  %8782 = vmatprep.mubr.msk.f32.mxu1 %vm553_vm1, %v348_v31  ;;  %v107_v28 = vld [vmem:[%s13270_s0 + $0x268] sm:$0xff]  ;;  %v380_v31 = vld [vmem:[%s13270_s0 + $0xaf0] sm:$0xff] }
  0x65   :  { %8374 = vmatprep.mubr.msk.f32.mxu0 %vm553_vm1, %v76_v29  ;;  %v108_v29 = vld [vmem:[%s13270_s0 + $0x270] sm:$0xff] }
  0x67   :  { %8783 = vmatmul.mubr.msk.f32.gmra.mrb[42].mxu1 %vm553_vm1, %v349_v34  ;;  %v381_v34 = vld [vmem:[%s13270_s0 + $0xaf8] sm:$0xff] }
  0x68   :  { %8375 = vmatmul.mubr.msk.f32.gmra.mrb[46].mxu0 %vm553_vm1, %v77_v32  ;;  %8785 = vmatprep.mubr.msk.f32.mxu1 %vm553_vm1, %v350_v35  ;;  %v109_v32 = vld [vmem:[%s13270_s0 + $0x278] sm:$0xff]  ;;  %v382_v35 = vld [vmem:[%s13270_s0 + $0xb00] sm:$0xff] }
  0x69   :  { %8377 = vmatprep.mubr.msk.f32.mxu0 %vm553_vm1, %v78_v33  ;;  %v110_v33 = vld [vmem:[%s13270_s0 + $0x280] sm:$0xff] }
  0x6b   :  { %8786 = vmatmul.mubr.msk.f32.gmra.mrb[44].mxu1 %vm553_vm1, %v351_v38  ;;  %v383_v38 = vld [vmem:[%s13270_s0 + $0xb08] sm:$0xff] }
  0x6c   :  { %8378 = vmatmul.mubr.msk.f32.gmra.mrb[48].mxu0 %vm553_vm1, %v79_v36  ;;  %8788 = vmatprep.mubr.msk.f32.mxu1 %vm553_vm1, %v352_v39  ;;  %v111_v36 = vld [vmem:[%s13270_s0 + $0x288] sm:$0xff]  ;;  %v384_v39 = vld [vmem:[%s13270_s0 + $0xb10] sm:$0xff] }
  0x6d   :  { %8380 = vmatprep.mubr.msk.f32.mxu0 %vm553_vm1, %v80_v37  ;;  %v112_v37 = vld [vmem:[%s13270_s0 + $0x290] sm:$0xff] }
  0x6f   :  { %8789 = vmatmul.mubr.msk.f32.gmra.mrb[46].mxu1 %vm553_vm1, %v353_v42  ;;  %v385_v42 = vld [vmem:[%s13270_s0 + $0xb18] sm:$0xff] }
  0x70   :  { %8381 = vmatmul.mubr.msk.f32.gmra.mrb[50].mxu0 %vm553_vm1, %v81_v40  ;;  %8791 = vmatprep.mubr.msk.f32.mxu1 %vm553_vm1, %v354_v43  ;;  %v113_v40 = vld [vmem:[%s13270_s0 + $0x298] sm:$0xff]  ;;  %v386_v43 = vld [vmem:[%s13270_s0 + $0xb20] sm:$0xff] }
  0x71   :  { %8383 = vmatprep.mubr.msk.f32.mxu0 %vm553_vm1, %v82_v41  ;;  %v114_v41 = vld [vmem:[%s13270_s0 + $0x2a0] sm:$0xff] }
  0x73   :  { %8792 = vmatmul.mubr.msk.f32.gmra.mrb[48].mxu1 %vm553_vm1, %v355_v46  ;;  %v387_v46 = vld [vmem:[%s13270_s0 + $0xb28] sm:$0xff] }
  0x74   :  { %8384 = vmatmul.mubr.msk.f32.gmra.mrb[52].mxu0 %vm553_vm1, %v83_v44  ;;  %8794 = vmatprep.mubr.msk.f32.mxu1 %vm553_vm1, %v356_v47  ;;  %v115_v44 = vld [vmem:[%s13270_s0 + $0x2a8] sm:$0xff]  ;;  %v388_v47 = vld [vmem:[%s13270_s0 + $0xb30] sm:$0xff] }
  0x75   :  { %8386 = vmatprep.mubr.msk.f32.mxu0 %vm553_vm1, %v84_v45  ;;  %v116_v45 = vld [vmem:[%s13270_s0 + $0x2b0] sm:$0xff] }
  0x77   :  { %8795 = vmatmul.mubr.msk.f32.gmra.mrb[50].mxu1 %vm553_vm1, %v357_v50  ;;  %v389_v50 = vld [vmem:[%s13270_s0 + $0xb38] sm:$0xff] }
  0x78   :  { %8387 = vmatmul.mubr.msk.f32.gmra.mrb[54].mxu0 %vm553_vm1, %v85_v48  ;;  %8797 = vmatprep.mubr.msk.f32.mxu1 %vm553_vm1, %v358_v51  ;;  %v117_v48 = vld [vmem:[%s13270_s0 + $0x2b8] sm:$0xff]  ;;  %v390_v51 = vld [vmem:[%s13270_s0 + $0xb40] sm:$0xff] }
  0x79   :  { %8389 = vmatprep.mubr.msk.f32.mxu0 %vm553_vm1, %v86_v49  ;;  %v118_v49 = vld [vmem:[%s13270_s0 + $0x2c0] sm:$0xff] }
  0x7b   :  { %8798 = vmatmul.mubr.msk.f32.gmra.mrb[52].mxu1 %vm553_vm1, %v359_v54  ;;  %v391_v54 = vld [vmem:[%s13270_s0 + $0xb48] sm:$0xff] }
  0x7c   :  { %8390 = vmatmul.mubr.msk.f32.gmra.mrb[56].mxu0 %vm553_vm1, %v87_v52  ;;  %8800 = vmatprep.mubr.msk.f32.mxu1 %vm553_vm1, %v360_v55  ;;  %v119_v52 = vld [vmem:[%s13270_s0 + $0x2c8] sm:$0xff]  ;;  %v392_v55 = vld [vmem:[%s13270_s0 + $0xb50] sm:$0xff] }
  0x7d   :  { %8392 = vmatprep.mubr.msk.f32.mxu0 %vm553_vm1, %v88_v53  ;;  %v120_v53 = vld [vmem:[%s13270_s0 + $0x2d0] sm:$0xff] }
  0x7f   :  { %8801 = vmatmul.mubr.msk.f32.gmra.mrb[54].mxu1 %vm553_vm1, %v361_v58  ;;  %v393_v58 = vld [vmem:[%s13270_s0 + $0xb58] sm:$0xff] }
  0x80   :  { %8393 = vmatmul.mubr.msk.f32.gmra.mrb[58].mxu0 %vm553_vm1, %v89_v56  ;;  %8803 = vmatprep.mubr.msk.f32.mxu1 %vm553_vm1, %v362_v59  ;;  %v121_v56 = vld [vmem:[%s13270_s0 + $0x2d8] sm:$0xff]  ;;  %v394_v59 = vld [vmem:[%s13270_s0 + $0xb60] sm:$0xff] }
  0x81   :  { %8395 = vmatprep.mubr.msk.f32.mxu0 %vm553_vm1, %v90_v57  ;;  %v122_v57 = vld [vmem:[%s13270_s0 + $0x2e0] sm:$0xff] }
  0x83   :  { %8804 = vmatmul.mubr.msk.f32.gmra.mrb[56].mxu1 %vm553_vm1, %v363_v62  ;;  %v395_v62 = vld [vmem:[%s13270_s0 + $0xb68] sm:$0xff] }
  0x84   :  { %8396 = vmatmul.mubr.msk.f32.gmra.mrb[60].mxu0 %vm553_vm1, %v91_v60  ;;  %8806 = vmatprep.mubr.msk.f32.mxu1 %vm553_vm1, %v364_v63  ;;  %v123_v60 = vld [vmem:[%s13270_s0 + $0x2e8] sm:$0xff]  ;;  %v396_v63 = vld [vmem:[%s13270_s0 + $0xb70] sm:$0xff] }
  0x85   :  { %8398 = vmatprep.mubr.msk.f32.mxu0 %vm553_vm1, %v92_v61  ;;  %v124_v61 = vld [vmem:[%s13270_s0 + $0x2f0] sm:$0xff] }
  0x87   :  { %8807 = vmatmul.mubr.msk.f32.gmra.mrb[58].mxu1 %vm553_vm1, %v365_v2  ;;  %v397_v2 = vld [vmem:[%s13270_s0 + $0xb78] sm:$0xff] }
  0x88   :  { %8399 = vmatmul.mubr.msk.f32.gmra.mrb[62].mxu0 %vm553_vm1, %v93_v0  ;;  %8809 = vmatprep.mubr.msk.f32.mxu1 %vm553_vm1, %v366_v3  ;;  %v125_v0 = vld [vmem:[%s13270_s0 + $0x2f8] sm:$0xff]  ;;  %v398_v3 = vld [vmem:[%s13270_s0 + $0xb80] sm:$0xff] }
  0x89   :  { %8401 = vmatprep.mubr.msk.f32.mxu0 %vm553_vm1, %v94_v1  ;;  %v126_v1 = vld [vmem:[%s13270_s0 + $0x300] sm:$0xff] }
  0x8b   :  { %8810 = vmatmul.mubr.msk.f32.gmra.mrb[60].mxu1 %vm553_vm1, %v367_v6  ;;  %v399_v6 = vld [vmem:[%s13270_s0 + $0xb88] sm:$0xff] }
  0x8c   :  { %8402 = vmatmul.mubr.msk.f32.gmra.mrb[64].mxu0 %vm553_vm1, %v95_v4  ;;  %8812 = vmatprep.mubr.msk.f32.mxu1 %vm553_vm1, %v368_v7  ;;  %v127_v4 = vld [vmem:[%s13270_s0 + $0x308] sm:$0xff]  ;;  %v400_v7 = vld [vmem:[%s13270_s0 + $0xb90] sm:$0xff] }
  0x8d   :  { %8404 = vmatprep.mubr.msk.f32.mxu0 %vm553_vm1, %v96_v5  ;;  %v128_v5 = vld [vmem:[%s13270_s0 + $0x310] sm:$0xff] }
  0x8f   :  { %8813 = vmatmul.mubr.msk.f32.gmra.mrb[62].mxu1 %vm553_vm1, %v369_v10  ;;  %v401_v10 = vld [vmem:[%s13270_s0 + $0xb98] sm:$0xff] }
  0x90   :  { %8405 = vmatmul.mubr.msk.f32.gmra.mrb[66].mxu0 %vm553_vm1, %v97_v8  ;;  %8815 = vmatprep.mubr.msk.f32.mxu1 %vm553_vm1, %v370_v11  ;;  %v129_v8 = vld [vmem:[%s13270_s0 + $0x318] sm:$0xff]  ;;  %v402_v11 = vld [vmem:[%s13270_s0 + $0xba0] sm:$0xff] }
  0x91   :  { %8407 = vmatprep.mubr.msk.f32.mxu0 %vm553_vm1, %v98_v9  ;;  %v130_v9 = vld [vmem:[%s13270_s0 + $0x320] sm:$0xff] }
  0x93   :  { %8816 = vmatmul.mubr.msk.f32.gmra.mrb[64].mxu1 %vm553_vm1, %v371_v14  ;;  %v403_v14 = vld [vmem:[%s13270_s0 + $0xba8] sm:$0xff] }
  0x94   :  { %8408 = vmatmul.mubr.msk.f32.gmra.mrb[68].mxu0 %vm553_vm1, %v99_v12  ;;  %8818 = vmatprep.mubr.msk.f32.mxu1 %vm553_vm1, %v372_v15  ;;  %v131_v12 = vld [vmem:[%s13270_s0 + $0x328] sm:$0xff]  ;;  %v404_v15 = vld [vmem:[%s13270_s0 + $0xbb0] sm:$0xff] }
  0x95   :  { %8410 = vmatprep.mubr.msk.f32.mxu0 %vm553_vm1, %v100_v13  ;;  %v132_v13 = vld [vmem:[%s13270_s0 + $0x330] sm:$0xff] }
  0x97   :  { %8819 = vmatmul.mubr.msk.f32.gmra.mrb[66].mxu1 %vm553_vm1, %v373_v18  ;;  %v405_v18 = vld [vmem:[%s13270_s0 + $0xbb8] sm:$0xff] }
  0x98   :  { %8411 = vmatmul.mubr.msk.f32.gmra.mrb[70].mxu0 %vm553_vm1, %v101_v16  ;;  %8821 = vmatprep.mubr.msk.f32.mxu1 %vm553_vm1, %v374_v19  ;;  %v133_v16 = vld [vmem:[%s13270_s0 + $0x338] sm:$0xff]  ;;  %v406_v19 = vld [vmem:[%s13270_s0 + $0xbc0] sm:$0xff] }
  0x99   :  { %8413 = vmatprep.mubr.msk.f32.mxu0 %vm553_vm1, %v102_v17  ;;  %v134_v17 = vld [vmem:[%s13270_s0 + $0x340] sm:$0xff] }
  0x9b   :  { %8822 = vmatmul.mubr.msk.f32.gmra.mrb[68].mxu1 %vm553_vm1, %v375_v22  ;;  %v407_v22 = vld [vmem:[%s13270_s0 + $0xbc8] sm:$0xff] }
  0x9c   :  { %8414 = vmatmul.mubr.msk.f32.gmra.mrb[72].mxu0 %vm553_vm1, %v103_v20  ;;  %8824 = vmatprep.mubr.msk.f32.mxu1 %vm553_vm1, %v376_v23  ;;  %v135_v20 = vld [vmem:[%s13270_s0 + $0x348] sm:$0xff]  ;;  %v408_v23 = vld [vmem:[%s13270_s0 + $0xbd0] sm:$0xff] }
  0x9d   :  { %8416 = vmatprep.mubr.msk.f32.mxu0 %vm553_vm1, %v104_v21  ;;  %v136_v21 = vld [vmem:[%s13270_s0 + $0x350] sm:$0xff] }
  0x9f   :  { %8825 = vmatmul.mubr.msk.f32.gmra.mrb[70].mxu1 %vm553_vm1, %v377_v26  ;;  %v138_v26 = vld [vmem:[%s13270_s0 + $0x360] sm:$0xff] }
  0xa0   :  { %8417 = vmatmul.mubr.msk.f32.gmra.mrb[74].mxu0 %vm553_vm1, %v105_v24  ;;  %8827 = vmatprep.mubr.msk.f32.mxu1 %vm553_vm1, %v378_v27  ;;  %v10204_v24 = vld [vmem:[%s13272_s2] ss:$0 sm:$0xff] }
  0xa1   :  { %8419 = vmatprep.mubr.msk.f32.mxu0 %vm553_vm1, %v106_v25  ;;  %v137_v25 = vld [vmem:[%s13270_s0 + $0x358] sm:$0xff] }
  0xa3   :  { %8828 = vmatmul.mubr.msk.f32.gmra.mrb[72].mxu1 %vm553_vm1, %v379_v30 }
  0xa4   :  { %8420 = vmatmul.mubr.msk.f32.gmra.mrb[76].mxu0 %vm553_vm1, %v107_v28  ;;  %8830 = vmatprep.mubr.msk.f32.mxu1 %vm553_vm1, %v380_v31  ;;  %v409_v28 = vld [vmem:[%s13270_s0 + $0xbd8] sm:$0xff]  ;;  %v410_v31 = vld [vmem:[%s13270_s0 + $0xbe0] sm:$0xff] }
  0xa5   :  { %8422 = vmatprep.mubr.msk.f32.mxu0 %vm553_vm1, %v108_v29 }
  0xa7   :  { %8831 = vmatmul.mubr.msk.f32.gmra.mrb[74].mxu1 %vm553_vm1, %v381_v34 }
  0xa8   :  { %8423 = vmatmul.mubr.msk.f32.gmra.mrb[78].mxu0 %vm553_vm1, %v109_v32  ;;  %8833 = vmatprep.mubr.msk.f32.mxu1 %vm553_vm1, %v382_v35  ;;  %v140_v35 = vld [vmem:[%s13270_s0 + $0x370] sm:$0xff] }
  0xa9   :  { %8425 = vmatprep.mubr.msk.f32.mxu0 %vm553_vm1, %v110_v33  ;;  %v139_v33 = vld [vmem:[%s13270_s0 + $0x368] sm:$0xff] }
  0xab   :  { %8834 = vmatmul.mubr.msk.f32.gmra.mrb[76].mxu1 %vm553_vm1, %v383_v38  ;;  %v411_v38 = vld [vmem:[%s13270_s0 + $0xbe8] sm:$0xff] }
  0xac   :  { %8426 = vmatmul.mubr.msk.f32.gmra.mrb[80].mxu0 %vm553_vm1, %v111_v36  ;;  %8836 = vmatprep.mubr.msk.f32.mxu1 %vm553_vm1, %v384_v39 }
  0xad   :  { %8428 = vmatprep.mubr.msk.f32.mxu0 %vm553_vm1, %v112_v37 }
  0xaf   :  { %8837 = vmatmul.mubr.msk.f32.gmra.mrb[78].mxu1 %vm553_vm1, %v385_v42  ;;  %v412_v42 = vld [vmem:[%s13270_s0 + $0xbf0] sm:$0xff] }
  0xb0   :  { %8429 = vmatmul.mubr.msk.f32.gmra.mrb[82].mxu0 %vm553_vm1, %v113_v40  ;;  %8839 = vmatprep.mubr.msk.f32.mxu1 %vm553_vm1, %v386_v43 }
  0xb1   :  { %8431 = vmatprep.mubr.msk.f32.mxu0 %vm553_vm1, %v114_v41 }
  0xb3   :  { %8840 = vmatmul.mubr.msk.f32.gmra.mrb[80].mxu1 %vm553_vm1, %v387_v46 }
  0xb4   :  { %8432 = vmatmul.mubr.msk.f32.gmra.mrb[84].mxu0 %vm553_vm1, %v115_v44  ;;  %8842 = vmatprep.mubr.msk.f32.mxu1 %vm553_vm1, %v388_v47  ;;  %v142_v47 = vld [vmem:[%s13270_s0 + $0x380] sm:$0xff] }
  0xb5   :  { %8434 = vmatprep.mubr.msk.f32.mxu0 %vm553_vm1, %v116_v45  ;;  %v141_v45 = vld [vmem:[%s13270_s0 + $0x378] sm:$0xff] }
  0xb7   :  { %8843 = vmatmul.mubr.msk.f32.gmra.mrb[82].mxu1 %vm553_vm1, %v389_v50 }
  0xb8   :  { %8435 = vmatmul.mubr.msk.f32.gmra.mrb[86].mxu0 %vm553_vm1, %v117_v48  ;;  %8845 = vmatprep.mubr.msk.f32.mxu1 %vm553_vm1, %v390_v51  ;;  %v413_v51 = vld [vmem:[%s13270_s0 + $0xbf8] sm:$0xff] }
  0xb9   :  { %8437 = vmatprep.mubr.msk.f32.mxu0 %vm553_vm1, %v118_v49 }
  0xbb   :  { %8846 = vmatmul.mubr.msk.f32.gmra.mrb[84].mxu1 %vm553_vm1, %v391_v54  ;;  %v414_v54 = vld [vmem:[%s13270_s0 + $0xc00] sm:$0xff] }
  0xbc   :  { %8438 = vmatmul.mubr.msk.f32.gmra.mrb[88].mxu0 %vm553_vm1, %v119_v52  ;;  %8848 = vmatprep.mubr.msk.f32.mxu1 %vm553_vm1, %v392_v55 }
  0xbd   :  { %8440 = vmatprep.mubr.msk.f32.mxu0 %vm553_vm1, %v120_v53 }
  0xbf   :  { %8849 = vmatmul.mubr.msk.f32.gmra.mrb[86].mxu1 %vm553_vm1, %v393_v58 }
  0xc0   :  { %8441 = vmatmul.mubr.msk.f32.gmra.mrb[90].mxu0 %vm553_vm1, %v121_v56  ;;  %8851 = vmatprep.mubr.msk.f32.mxu1 %vm553_vm1, %v394_v59 }
  0xc1   :  { %8443 = vmatprep.mubr.msk.f32.mxu0 %vm553_vm1, %v122_v57  ;;  %v143_v57 = vld [vmem:[%s13270_s0 + $0x388] sm:$0xff] }
  0xc3   :  { %8852 = vmatmul.mubr.msk.f32.gmra.mrb[88].mxu1 %vm553_vm1, %v395_v62 }
  0xc4   :  { %8444 = vmatmul.mubr.msk.f32.gmra.mrb[92].mxu0 %vm553_vm1, %v123_v60  ;;  %8854 = vmatprep.mubr.msk.f32.mxu1 %vm553_vm1, %v396_v63  ;;  %v144_v60 = vld [vmem:[%s13270_s0 + $0x390] sm:$0xff] }
  0xc5   :  { %8446 = vmatprep.mubr.msk.f32.mxu0 %vm553_vm1, %v124_v61 }
  0xc7   :  { %8855 = vmatmul.mubr.msk.f32.gmra.mrb[90].mxu1 %vm553_vm1, %v397_v2  ;;  %v415_v2 = vld [vmem:[%s13270_s0 + $0xc08] sm:$0xff] }
  0xc8   :  { %8447 = vmatmul.mubr.msk.f32.gmra.mrb[94].mxu0 %vm553_vm1, %v125_v0  ;;  %8857 = vmatprep.mubr.msk.f32.mxu1 %vm553_vm1, %v398_v3 }
  0xc9   :  { %8449 = vmatprep.mubr.msk.f32.mxu0 %vm553_vm1, %v126_v1 }
  0xcb   :  { %8858 = vmatmul.mubr.msk.f32.gmra.mrb[92].mxu1 %vm553_vm1, %v399_v6  ;;  %v416_v6 = vld [vmem:[%s13270_s0 + $0xc10] sm:$0xff] }
  0xcc   :  { %8450 = vmatmul.mubr.msk.f32.gmra.mrb[96].mxu0 %vm553_vm1, %v127_v4  ;;  %8860 = vmatprep.mubr.msk.f32.mxu1 %vm553_vm1, %v400_v7 }
  0xcd   :  { %8452 = vmatprep.mubr.msk.f32.mxu0 %vm553_vm1, %v128_v5 }
  0xcf   :  { %8861 = vmatmul.mubr.msk.f32.gmra.mrb[94].mxu1 %vm553_vm1, %v401_v10 }
  0xd0   :  { %8453 = vmatmul.mubr.msk.f32.gmra.mrb[98].mxu0 %vm553_vm1, %v129_v8  ;;  %8863 = vmatprep.mubr.msk.f32.mxu1 %vm553_vm1, %v402_v11 }
  0xd1   :  { %8455 = vmatprep.mubr.msk.f32.mxu0 %vm553_vm1, %v130_v9  ;;  %v145_v9 = vld [vmem:[%s13270_s0 + $0x398] sm:$0xff] }
  0xd3   :  { %8864 = vmatmul.mubr.msk.f32.gmra.mrb[96].mxu1 %vm553_vm1, %v403_v14 }
  0xd4   :  { %8456 = vmatmul.mubr.msk.f32.gmra.mrb[100].mxu0 %vm553_vm1, %v131_v12  ;;  %8866 = vmatprep.mubr.msk.f32.mxu1 %vm553_vm1, %v404_v15  ;;  %v146_v12 = vld [vmem:[%s13270_s0 + $0x3a0] sm:$0xff] }
  0xd5   :  { %8458 = vmatprep.mubr.msk.f32.mxu0 %vm553_vm1, %v132_v13 }
  0xd7   :  { %8867 = vmatmul.mubr.msk.f32.gmra.mrb[98].mxu1 %vm553_vm1, %v405_v18  ;;  %v417_v18 = vld [vmem:[%s13270_s0 + $0xc18] sm:$0xff] }
  0xd8   :  { %8459 = vmatmul.mubr.msk.f32.gmra.mrb[102].mxu0 %vm553_vm1, %v133_v16  ;;  %8869 = vmatprep.mubr.msk.f32.mxu1 %vm553_vm1, %v406_v19 }
  0xd9   :  { %8461 = vmatprep.mubr.msk.f32.mxu0 %vm553_vm1, %v134_v17 }
  0xdb   :  { %8870 = vmatmul.mubr.msk.f32.gmra.mrb[100].mxu1 %vm553_vm1, %v407_v22  ;;  %v418_v22 = vld [vmem:[%s13270_s0 + $0xc20] sm:$0xff] }
  0xdc   :  { %8462 = vmatmul.mubr.msk.f32.gmra.mrb[104].mxu0 %vm553_vm1, %v135_v20  ;;  %8872 = vmatprep.mubr.msk.f32.mxu1 %vm553_vm1, %v408_v23 }
  0xdd   :  { %8464 = vmatprep.mubr.msk.f32.mxu0 %vm553_vm1, %v136_v21 }
  0xdf   :  { %v8307_v27 = vpop.f32.mrb[0].mxu0  ;;  %8873 = vmatmul.mubr.msk.f32.gmra.mrb[102].mxu1 %vm553_vm1, %v409_v28  ;;  %v10267_v58 = vpop.f32.mrb[0].mxu1 }
  0xe0   :  { %v2166_v29 = vadd.f32 %v8307_v27, %v10204_v24  ;;  %v2160_v30 = vpop.f32.mrb[1].mxu0  ;;  %8465 = vmatmul.mubr.msk.f32.gmra.mrb[106].mxu0 %vm553_vm1, %v137_v25  ;;  %8875 = vmatprep.mubr.msk.f32.mxu1 %vm553_vm1, %v410_v31  ;;  %v10273_v61 = vpop.f32.mrb[1].mxu1  ;;  %v6352_v31 = vld [vmem:[%s13273_s3] sm:$0xff] }
  0xe1   :  { %v2161_v32 = vadd.f32 %v10204_v24, %v2160_v30  ;;  %8467 = vmatprep.mubr.msk.f32.mxu0 %vm553_vm1, %v138_v26  ;;  %v147_v26 = vld [vmem:[%s13270_s0 + $0x3a8] sm:$0xff] }
  0xe2   :  { %v4720_v34 = vmax.f32 %v2166_v29, 0.0  ;;  %v148_v29 = vld [vmem:[%s13270_s0 + $0x3b0] sm:$0xff] }
  0xe3   :  { %v4719_v36 = vmax.f32 %v2161_v32, 0.0  ;;  %v8310_v37 = vpop.f32.mrb[2].mxu0  ;;  %8876 = vmatmul.mubr.msk.f32.gmra.mrb[104].mxu1 %vm553_vm1, %v411_v38  ;;  %v10291_v10 = vpop.f32.mrb[2].mxu1  ;;  %v6353_v32 = vld [vmem:[%s13273_s3 + $0x8] sm:$0xff] }
  0xe4   :  { %v5233_v39 = vsel %vm5231_vm4, %v4720_v34, 0.0  ;;  %v2176_v40 = vadd.f32 %v8310_v37, %v10204_v24  ;;  %v2170_v41 = vpop.f32.mrb[3].mxu0  ;;  %8468 = vmatmul.mubr.msk.f32.gmra.mrb[108].mxu0 %vm553_vm1, %v139_v33  ;;  %8878 = vmatprep.mubr.msk.f32.mxu1 %vm553_vm1, %v412_v42  ;;  %v10297_v13 = vpop.f32.mrb[3].mxu1  ;;  %v419_v37 = vld [vmem:[%s13270_s0 + $0xc28] sm:$0xff]  ;;  %v9189_v38 = vpack.c.bf16 %v6353_v32, %v6352_v31  ;;  %v420_v42 = vld [vmem:[%s13270_s0 + $0xc30] sm:$0xff] }
  0xe5   :  { %v5232_v43 = vsel %vm5231_vm4, %v4719_v36, 0.0  ;;  %v2171_v44 = vadd.f32 %v10204_v24, %v2170_v41  ;;  %8470 = vmatprep.mubr.msk.f32.mxu0 %vm553_vm1, %v140_v35 }
  0xe6   :  { %v5234_v46 = vadd.f32 %v5233_v39, %v5232_v43  ;;  %v4722_v48 = vmax.f32 %v2176_v40, 0.0  ;;  %9190 = vmatprep.subr.bf16.mxu1 %v9189_v38 }
  0xe7   :  { %v4721_v49 = vmax.f32 %v2171_v44, 0.0  ;;  %v8313_v50 = vpop.f32.mrb[4].mxu0  ;;  %8879 = vmatmul.mubr.msk.f32.gmra.mrb[106].mxu1 %vm553_vm1, %v413_v51  ;;  %v10315_v27 = vpop.f32.mrb[4].mxu1 }
  0xe8   :  { %v2186_v52 = vadd.f32 %v8313_v50, %v10204_v24  ;;  %v2180_v53 = vpop.f32.mrb[5].mxu0  ;;  %8471 = vmatmul.mubr.msk.f32.gmra.mrb[110].mxu0 %vm553_vm1, %v141_v45  ;;  %v5237_v62 = vsel %vm5231_vm4, %v4722_v48, 0.0  ;;  %8881 = vmatprep.mubr.msk.f32.mxu1 %vm553_vm1, %v414_v54  ;;  %v10321_v30 = vpop.f32.mrb[5].mxu1  ;;  %v149_v45 = vld [vmem:[%s13270_s0 + $0x3b8] sm:$0xff]  ;;  %v150_v48 = vld [vmem:[%s13270_s0 + $0x3c0] sm:$0xff] }
  0xe9   :  { %v5235_v55 = vsel %vm5231_vm4, %v4721_v49, 0.0  ;;  %v2181_v56 = vadd.f32 %v10204_v24, %v2180_v53  ;;  %8473 = vmatprep.mubr.msk.f32.mxu0 %vm553_vm1, %v142_v47  ;;  %v421_v54 = vld [vmem:[%s13270_s0 + $0xc38] sm:$0xff]  ;;  %9192 = vmatpush3.bf16.msra.mxu1 %v9189_v38 }
  0xea   :  { %v5236_v59 = vadd.f32 %v5235_v55, %v5234_v46  ;;  %v4724_v63 = vmax.f32 %v2186_v52, 0.0 }
  0xeb   :  { %v4723_v0 = vmax.f32 %v2181_v56, 0.0  ;;  %v8316_v1 = vpop.f32.mrb[6].mxu0  ;;  %8882 = vmatmul.mubr.msk.f32.gmra.mrb[108].mxu1 %vm553_vm1, %v415_v2  ;;  %v10345_v46 = vpop.f32.mrb[6].mxu1  ;;  %v152_v2 = vld [vmem:[%s13270_s0 + $0x3d0] sm:$0xff] }
  0xec   :  { %v5238_v3 = vadd.f32 %v5237_v62, %v5236_v59  ;;  %v2196_v4 = vadd.f32 %v8316_v1, %v10204_v24  ;;  %v2190_v5 = vpop.f32.mrb[7].mxu0  ;;  %8474 = vmatmul.mubr.msk.f32.gmra.mrb[112].mxu0 %vm553_vm1, %v143_v57  ;;  %v5241_v14 = vsel %vm5231_vm4, %v4724_v63, 0.0  ;;  %8884 = vmatprep.mubr.msk.f32.mxu1 %vm553_vm1, %v416_v6  ;;  %v10351_v49 = vpop.f32.mrb[7].mxu1  ;;  %v422_v59 = vld [vmem:[%s13270_s0 + $0xc40] sm:$0xff]  ;;  %v151_v63 = vld [vmem:[%s13270_s0 + $0x3c8] sm:$0xff] }
  0xed   :  { %v5239_v7 = vsel %vm5231_vm4, %v4723_v0, 0.0  ;;  %v2191_v8 = vadd.f32 %v10204_v24, %v2190_v5  ;;  %8476 = vmatprep.mubr.msk.f32.mxu0 %vm553_vm1, %v144_v60 }
  0xee   :  { %v5240_v11 = vadd.f32 %v5239_v7, %v5238_v3  ;;  %v4726_v15 = vmax.f32 %v2196_v4, 0.0 }
  0xef   :  { %v4725_v16 = vmax.f32 %v2191_v8, 0.0  ;;  %v8319_v17 = vpop.f32.mrb[8].mxu0  ;;  %8885 = vmatmul.mubr.msk.f32.gmra.mrb[110].mxu1 %vm553_vm1, %v417_v18  ;;  %v10369_v0 = vpop.f32.mrb[8].mxu1  ;;  %v423_v8 = vld [vmem:[%s13270_s0 + $0xc48] sm:$0xff] }
  0xf0   :  { %v5242_v19 = vadd.f32 %v5241_v14, %v5240_v11  ;;  %v2206_v20 = vadd.f32 %v8319_v17, %v10204_v24  ;;  %v2200_v21 = vpop.f32.mrb[9].mxu0  ;;  %8477 = vmatmul.mubr.msk.f32.gmra.mrb[114].mxu0 %vm553_vm1, %v145_v9  ;;  %v5245_v33 = vsel %vm5231_vm4, %v4726_v15, 0.0  ;;  %8887 = vmatprep.mubr.msk.f32.mxu1 %vm553_vm1, %v418_v22  ;;  %v10375_v3 = vpop.f32.mrb[9].mxu1  ;;  %v424_v14 = vld [vmem:[%s13270_s0 + $0xc50] sm:$0xff]  ;;  %v153_v17 = vld [vmem:[%s13270_s0 + $0x3d8] sm:$0xff] }
  0xf1   :  { %v5243_v23 = vsel %vm5231_vm4, %v4725_v16, 0.0  ;;  %v2201_v25 = vadd.f32 %v10204_v24, %v2200_v21  ;;  %8479 = vmatprep.mubr.msk.f32.mxu0 %vm553_vm1, %v146_v12 }
  0xf2   :  { %v5244_v28 = vadd.f32 %v5243_v23, %v5242_v19  ;;  %v4728_v34 = vmax.f32 %v2206_v20, 0.0  ;;  %v154_v20 = vld [vmem:[%s13270_s0 + $0x3e0] sm:$0xff] }
  0xf3   :  { %v4727_v35 = vmax.f32 %v2201_v25, 0.0  ;;  %v8322_v36 = vpop.f32.mrb[10].mxu0  ;;  %8888 = vmatmul.mubr.msk.f32.gmra.mrb[112].mxu1 %vm553_vm1, %v419_v37 }
  0xf4   :  { %v5246_v39 = vadd.f32 %v5245_v33, %v5244_v28  ;;  %v2216_v40 = vadd.f32 %v8322_v36, %v10204_v24  ;;  %v2210_v41 = vpop.f32.mrb[11].mxu0  ;;  %8480 = vmatmul.mubr.msk.f32.gmra.mrb[116].mxu0 %vm553_vm1, %v147_v26  ;;  %v5249_v50 = vsel %vm5231_vm4, %v4728_v34, 0.0  ;;  %8890 = vmatprep.mubr.msk.f32.mxu1 %vm553_vm1, %v420_v42  ;;  %v425_v28 = vld [vmem:[%s13270_s0 + $0xc58] sm:$0xff]  ;;  %v426_v33 = vld [vmem:[%s13270_s0 + $0xc60] sm:$0xff]  ;;  %v155_v36 = vld [vmem:[%s13270_s0 + $0x3e8] sm:$0xff] }
  0xf5   :  { %v5247_v43 = vsel %vm5231_vm4, %v4727_v35, 0.0  ;;  %v2211_v44 = vadd.f32 %v10204_v24, %v2210_v41  ;;  %8482 = vmatprep.mubr.msk.f32.mxu0 %vm553_vm1, %v148_v29 }
  0xf6   :  { %v5248_v47 = vadd.f32 %v5247_v43, %v5246_v39  ;;  %v4730_v51 = vmax.f32 %v2216_v40, 0.0  ;;  %v156_v39 = vld [vmem:[%s13270_s0 + $0x3f0] sm:$0xff] }
  0xf7   :  { %v4729_v52 = vmax.f32 %v2211_v44, 0.0  ;;  %v8325_v53 = vpop.f32.mrb[12].mxu0  ;;  %8891 = vmatmul.mubr.msk.f32.gmra.mrb[114].mxu1 %vm553_vm1, %v421_v54  ;;  %v428_v54 = vld [vmem:[%s13270_s0 + $0xc70] sm:$0xff] }
  0xf8   :  { %v5250_v55 = vadd.f32 %v5249_v50, %v5248_v47  ;;  %v2226_v56 = vadd.f32 %v8325_v53, %v10204_v24  ;;  %v2220_v57 = vpop.f32.mrb[13].mxu0  ;;  %8483 = vmatmul.mubr.msk.f32.gmra.mrb[118].mxu0 %vm553_vm1, %v149_v45  ;;  %v5253_v4 = vsel %vm5231_vm4, %v4730_v51, 0.0  ;;  %8893 = vmatprep.mubr.msk.f32.mxu1 %vm553_vm1, %v422_v59 }
  0xf9   :  { %v5251_v60 = vsel %vm5231_vm4, %v4729_v52, 0.0  ;;  %v2221_v62 = vadd.f32 %v10204_v24, %v2220_v57  ;;  %8485 = vmatprep.mubr.msk.f32.mxu0 %vm553_vm1, %v150_v48  ;;  %v427_v48 = vld [vmem:[%s13270_s0 + $0xc68] sm:$0xff]  ;;  %v157_v57 = vld [vmem:[%s13270_s0 + $0x3f8] sm:$0xff] }
  0xfa   :  { %v5252_v1 = vadd.f32 %v5251_v60, %v5250_v55  ;;  %v4732_v5 = vmax.f32 %v2226_v56, 0.0  ;;  %v10393_v18 = vpop.f32.mrb[10].mxu1 }
  0xfb   :  { %v4731_v6 = vmax.f32 %v2221_v62, 0.0  ;;  %v8328_v7 = vpop.f32.mrb[14].mxu0  ;;  %13284 = vst [vmem:[#allocation5_spill] sm:$0xff] %v10393_v18  ;;  %8894 = vmatmul.mubr.msk.f32.gmra.mrb[116].mxu1 %vm553_vm1, %v423_v8  ;;  %v10399_v21 = vpop.f32.mrb[11].mxu1 }
  0xfc   :  { %v5254_v9 = vadd.f32 %v5253_v4, %v5252_v1  ;;  %v2236_v11 = vadd.f32 %v8328_v7, %v10204_v24  ;;  %v2230_v12 = vpop.f32.mrb[15].mxu0  ;;  %8486 = vmatmul.mubr.msk.f32.gmra.mrb[120].mxu0 %vm553_vm1, %v151_v63  ;;  %v5257_v22 = vsel %vm5231_vm4, %v4732_v5, 0.0  ;;  %8896 = vmatprep.mubr.msk.f32.mxu1 %vm553_vm1, %v424_v14  ;;  %v158_v1 = vld [vmem:[%s13270_s0 + $0x400] sm:$0xff] }
  0xfd   :  { %v5255_v15 = vsel %vm5231_vm4, %v4731_v6, 0.0  ;;  %v2231_v16 = vadd.f32 %v10204_v24, %v2230_v12  ;;  %8488 = vmatprep.mubr.msk.f32.mxu0 %vm553_vm1, %v152_v2  ;;  %v429_v12 = vld [vmem:[%s13270_s0 + $0xc78] sm:$0xff] }
  0xfe   :  { %v5256_v19 = vadd.f32 %v5255_v15, %v5254_v9  ;;  %v4734_v23 = vmax.f32 %v2236_v11, 0.0  ;;  %v8739_v37 = vpop.f32.mrb[12].mxu1 }
  0xff   :  { %v4733_v25 = vmax.f32 %v2231_v16, 0.0  ;;  %v8331_v26 = vpop.f32.mrb[16].mxu0  ;;  %8897 = vmatmul.mubr.msk.f32.gmra.mrb[118].mxu1 %vm553_vm1, %v425_v28  ;;  %v3606_v40 = vadd.f32 %v8739_v37, %v10204_v24  ;;  %v3600_v41 = vpop.f32.mrb[13].mxu1 }
 0x100   :  { %v5258_v29 = vadd.f32 %v5257_v22, %v5256_v19  ;;  %v2246_v31 = vadd.f32 %v8331_v26, %v10204_v24  ;;  %v2240_v32 = vpop.f32.mrb[17].mxu0  ;;  %8489 = vmatmul.mubr.msk.f32.gmra.mrb[122].mxu0 %vm553_vm1, %v153_v17  ;;  %v5261_v42 = vsel %vm5231_vm4, %v4734_v23, 0.0  ;;  %v3601_v47 = vadd.f32 %v10204_v24, %v3600_v41  ;;  %8899 = vmatprep.mubr.msk.f32.mxu1 %vm553_vm1, %v426_v33  ;;  %v430_v19 = vld [vmem:[%s13270_s0 + $0xc80] sm:$0xff]  ;;  %v159_v23 = vld [vmem:[%s13270_s0 + $0x408] sm:$0xff]  ;;  %v160_v33 = vld [vmem:[%s13270_s0 + $0x410] sm:$0xff] }
 0x101   :  { %v5259_v34 = vsel %vm5231_vm4, %v4733_v25, 0.0  ;;  %v2241_v35 = vadd.f32 %v10204_v24, %v2240_v32  ;;  %8491 = vmatprep.mubr.msk.f32.mxu0 %vm553_vm1, %v154_v20  ;;  %v5008_v53 = vmax.f32 %v3606_v40, 0.0  ;;  %v431_v41 = vld [vmem:[%s13270_s0 + $0xc88] sm:$0xff] }
 0x102   :  { %v5260_v38 = vadd.f32 %v5259_v34, %v5258_v29  ;;  %v4736_v43 = vmax.f32 %v2246_v31, 0.0  ;;  %v5007_v59 = vmax.f32 %v3601_v47, 0.0  ;;  %v8742_v60 = vpop.f32.mrb[14].mxu1 }
 0x103   :  { %v4735_v44 = vmax.f32 %v2241_v35, 0.0  ;;  %v8334_v45 = vpop.f32.mrb[18].mxu0  ;;  %v5854_v2 = vsel %vm5231_vm4, %v5008_v53, 0.0  ;;  %v3616_v4 = vadd.f32 %v8742_v60, %v10204_v24  ;;  %v3610_v5 = vpop.f32.mrb[15].mxu1  ;;  %8900 = vmatmul.mubr.msk.f32.gmra.mrb[120].mxu1 %vm553_vm1, %v427_v48  ;;  %v432_v48 = vld [vmem:[%s13270_s0 + $0xc90] sm:$0xff] }
 0x104   :  { %v5262_v50 = vadd.f32 %v5261_v42, %v5260_v38  ;;  %v2256_v51 = vadd.f32 %v8334_v45, %v10204_v24  ;;  %v2250_v52 = vpop.f32.mrb[19].mxu0  ;;  %8492 = vmatmul.mubr.msk.f32.gmra.mrb[124].mxu0 %vm553_vm1, %v155_v36  ;;  %v5265_v6 = vsel %vm5231_vm4, %v4736_v43, 0.0  ;;  %v5853_v9 = vsel %vm5231_vm4, %v5007_v59, 0.0  ;;  %8902 = vmatprep.mubr.msk.f32.mxu1 %vm553_vm1, %v428_v54  ;;  %v162_v59 = vld [vmem:[%s13270_s0 + $0x420] sm:$0xff] }
 0x105   :  { %v5263_v55 = vsel %vm5231_vm4, %v4735_v44, 0.0  ;;  %v2251_v56 = vadd.f32 %v10204_v24, %v2250_v52  ;;  %8494 = vmatprep.mubr.msk.f32.mxu0 %vm553_vm1, %v156_v39  ;;  %v3611_v11 = vadd.f32 %v10204_v24, %v3610_v5  ;;  %v5855_v17 = vadd.f32 %v5854_v2, %v5853_v9  ;;  %v161_v52 = vld [vmem:[%s13270_s0 + $0x418] sm:$0xff] }
 0x106   :  { %v5264_v62 = vadd.f32 %v5263_v55, %v5262_v50  ;;  %v4738_v63 = vmax.f32 %v2256_v51, 0.0  ;;  %v5010_v25 = vmax.f32 %v3616_v4, 0.0  ;;  %v8745_v28 = vpop.f32.mrb[16].mxu1 }
 0x107   :  { %v4737_v7 = vmax.f32 %v2251_v56, 0.0  ;;  %v8337_v8 = vpop.f32.mrb[20].mxu0  ;;  %v5009_v26 = vmax.f32 %v3611_v11, 0.0  ;;  %v3626_v34 = vadd.f32 %v8745_v28, %v10204_v24  ;;  %v3620_v35 = vpop.f32.mrb[17].mxu1  ;;  %8903 = vmatmul.mubr.msk.f32.gmra.mrb[122].mxu1 %vm553_vm1, %v429_v12  ;;  %v164_v28 = vld [vmem:[%s13270_s0 + $0x430] sm:$0xff] }
 0x108   :  { %v5266_v14 = vadd.f32 %v5265_v6, %v5264_v62  ;;  %v2266_v15 = vadd.f32 %v8337_v8, %v10204_v24  ;;  %v2260_v16 = vpop.f32.mrb[21].mxu0  ;;  %8495 = vmatmul.mubr.msk.f32.gmra.mrb[126].mxu0 %vm553_vm1, %v157_v57  ;;  %v5269_v29 = vsel %vm5231_vm4, %v4738_v63, 0.0  ;;  %v5858_v38 = vsel %vm5231_vm4, %v5010_v25, 0.0  ;;  %8905 = vmatprep.mubr.msk.f32.mxu1 %vm553_vm1, %v430_v19  ;;  %v163_v19 = vld [vmem:[%s13270_s0 + $0x428] sm:$0xff] }
 0x109   :  { %v5267_v20 = vsel %vm5231_vm4, %v4737_v7, 0.0  ;;  %v2261_v22 = vadd.f32 %v10204_v24, %v2260_v16  ;;  %8497 = vmatprep.mubr.msk.f32.mxu0 %vm553_vm1, %v158_v1  ;;  %v5856_v39 = vsel %vm5231_vm4, %v5009_v26, 0.0  ;;  %v3621_v40 = vadd.f32 %v10204_v24, %v3620_v35  ;;  %v433_v7 = vld [vmem:[%s13270_s0 + $0xc98] sm:$0xff] }
 0x10a   :  { %v5268_v31 = vadd.f32 %v5267_v20, %v5266_v14  ;;  %v4740_v32 = vmax.f32 %v2266_v15, 0.0  ;;  %v5857_v47 = vadd.f32 %v5856_v39, %v5855_v17  ;;  %v5012_v53 = vmax.f32 %v3626_v34, 0.0  ;;  %v8748_v55 = vpop.f32.mrb[18].mxu1  ;;  %v434_v15 = vld [vmem:[%s13270_s0 + $0xca0] sm:$0xff] }
 0x10b   :  { %v4739_v36 = vmax.f32 %v2261_v22, 0.0  ;;  %v8340_v37 = vpop.f32.mrb[22].mxu0  ;;  %v5011_v54 = vmax.f32 %v3621_v40, 0.0  ;;  %v3636_v62 = vadd.f32 %v8748_v55, %v10204_v24  ;;  %v3630_v63 = vpop.f32.mrb[19].mxu1  ;;  %8906 = vmatmul.mubr.msk.f32.gmra.mrb[124].mxu1 %vm553_vm1, %v431_v41  ;;  %v166_v55 = vld [vmem:[%s13270_s0 + $0x440] sm:$0xff] }
 0x10c   :  { %v5273_v42 = vsel %vm5231_vm4, %v4740_v32, 0.0  ;;  %v5270_v43 = vadd.f32 %v5269_v29, %v5268_v31  ;;  %v2276_v44 = vadd.f32 %v8340_v37, %v10204_v24  ;;  %v2270_v45 = vpop.f32.mrb[23].mxu0  ;;  %8498 = vmatmul.mubr.msk.f32.gmra.mrb[128].mxu0 %vm553_vm1, %v159_v23  ;;  %v5859_v60 = vadd.f32 %v5858_v38, %v5857_v47  ;;  %8908 = vmatprep.mubr.msk.f32.mxu1 %vm553_vm1, %v432_v48  ;;  %v435_v38 = vld [vmem:[%s13270_s0 + $0xca8] sm:$0xff]  ;;  %v165_v48 = vld [vmem:[%s13270_s0 + $0x438] sm:$0xff] }
 0x10d   :  { %v5271_v50 = vsel %vm5231_vm4, %v4739_v36, 0.0  ;;  %v2271_v51 = vadd.f32 %v10204_v24, %v2270_v45  ;;  %8500 = vmatprep.mubr.msk.f32.mxu0 %vm553_vm1, %v160_v33  ;;  %v5862_v4 = vsel %vm5231_vm4, %v5012_v53, 0.0  ;;  %v5860_v5 = vsel %vm5231_vm4, %v5011_v54, 0.0 }
 0x10e   :  { %v5272_v56 = vadd.f32 %v5271_v50, %v5270_v43  ;;  %v4742_v57 = vmax.f32 %v2276_v44, 0.0  ;;  %v3631_v6 = vadd.f32 %v10204_v24, %v3630_v63  ;;  %v5861_v14 = vadd.f32 %v5860_v5, %v5859_v60  ;;  %v8751_v23 = vpop.f32.mrb[20].mxu1  ;;  %v436_v44 = vld [vmem:[%s13270_s0 + $0xcb0] sm:$0xff] }
 0x10f   :  { %v4741_v1 = vmax.f32 %v2271_v51, 0.0  ;;  %v8343_v2 = vpop.f32.mrb[24].mxu0  ;;  %v5014_v20 = vmax.f32 %v3636_v62, 0.0  ;;  %v3646_v31 = vadd.f32 %v8751_v23, %v10204_v24  ;;  %v3640_v32 = vpop.f32.mrb[21].mxu1  ;;  %8909 = vmatmul.mubr.msk.f32.gmra.mrb[126].mxu1 %vm553_vm1, %v433_v7  ;;  %v168_v23 = vld [vmem:[%s13270_s0 + $0x450] sm:$0xff] }
 0x110   :  { %v5277_v8 = vsel %vm5231_vm4, %v4742_v57, 0.0  ;;  %v5274_v9 = vadd.f32 %v5273_v42, %v5272_v56  ;;  %v2286_v11 = vadd.f32 %v8343_v2, %v10204_v24  ;;  %v2280_v12 = vpop.f32.mrb[25].mxu0  ;;  %8501 = vmatmul.mubr.msk.f32.gmra.mrb[130].mxu0 %vm553_vm1, %v161_v52  ;;  %v5013_v22 = vmax.f32 %v3631_v6, 0.0  ;;  %8911 = vmatprep.mubr.msk.f32.mxu1 %vm553_vm1, %v434_v15  ;;  %v167_v15 = vld [vmem:[%s13270_s0 + $0x448] sm:$0xff] }
 0x111   :  { %v5275_v16 = vsel %vm5231_vm4, %v4741_v1, 0.0  ;;  %v2281_v17 = vadd.f32 %v10204_v24, %v2280_v12  ;;  %8503 = vmatprep.mubr.msk.f32.mxu0 %vm553_vm1, %v162_v59  ;;  %v5863_v29 = vadd.f32 %v5862_v4, %v5861_v14  ;;  %v5866_v35 = vsel %vm5231_vm4, %v5014_v20, 0.0  ;;  %v437_v4 = vld [vmem:[%s13270_s0 + $0xcb8] sm:$0xff] }
 0x112   :  { %v5276_v25 = vadd.f32 %v5275_v16, %v5274_v9  ;;  %v4744_v26 = vmax.f32 %v2286_v11, 0.0  ;;  %v5864_v36 = vsel %vm5231_vm4, %v5013_v22, 0.0  ;;  %v3641_v37 = vadd.f32 %v10204_v24, %v3640_v32  ;;  %v8754_v52 = vpop.f32.mrb[22].mxu1  ;;  %v438_v11 = vld [vmem:[%s13270_s0 + $0xcc0] sm:$0xff] }
 0x113   :  { %v4743_v33 = vmax.f32 %v2281_v17, 0.0  ;;  %v8346_v34 = vpop.f32.mrb[26].mxu0  ;;  %v5865_v43 = vadd.f32 %v5864_v36, %v5863_v29  ;;  %v5016_v50 = vmax.f32 %v3646_v31, 0.0  ;;  %v3656_v57 = vadd.f32 %v8754_v52, %v10204_v24  ;;  %v3650_v59 = vpop.f32.mrb[23].mxu1  ;;  %8912 = vmatmul.mubr.msk.f32.gmra.mrb[128].mxu1 %vm553_vm1, %v435_v38  ;;  %v170_v52 = vld [vmem:[%s13270_s0 + $0x460] sm:$0xff] }
 0x114   :  { %v5281_v39 = vsel %vm5231_vm4, %v4744_v26, 0.0  ;;  %v5278_v40 = vadd.f32 %v5277_v8, %v5276_v25  ;;  %v2296_v41 = vadd.f32 %v8346_v34, %v10204_v24  ;;  %v2290_v42 = vpop.f32.mrb[27].mxu0  ;;  %8504 = vmatmul.mubr.msk.f32.gmra.mrb[132].mxu0 %vm553_vm1, %v163_v19  ;;  %v5015_v51 = vmax.f32 %v3641_v37, 0.0  ;;  %8914 = vmatprep.mubr.msk.f32.mxu1 %vm553_vm1, %v436_v44  ;;  %v169_v44 = vld [vmem:[%s13270_s0 + $0x458] sm:$0xff] }
 0x115   :  { %v5279_v45 = vsel %vm5231_vm4, %v4743_v33, 0.0  ;;  %v2291_v47 = vadd.f32 %v10204_v24, %v2290_v42  ;;  %8506 = vmatprep.mubr.msk.f32.mxu0 %vm553_vm1, %v164_v28  ;;  %v5867_v56 = vadd.f32 %v5866_v35, %v5865_v43  ;;  %v5870_v63 = vsel %vm5231_vm4, %v5016_v50, 0.0  ;;  %v439_v35 = vld [vmem:[%s13270_s0 + $0xcc8] sm:$0xff] }
 0x116   :  { %v5280_v53 = vadd.f32 %v5279_v45, %v5278_v40  ;;  %v4746_v54 = vmax.f32 %v2296_v41, 0.0  ;;  %v5868_v1 = vsel %vm5231_vm4, %v5015_v51, 0.0  ;;  %v3651_v2 = vadd.f32 %v10204_v24, %v3650_v59  ;;  %v8757_v19 = vpop.f32.mrb[24].mxu1  ;;  %v440_v41 = vld [vmem:[%s13270_s0 + $0xcd0] sm:$0xff] }
 0x117   :  { %v4745_v60 = vmax.f32 %v2291_v47, 0.0  ;;  %v8349_v62 = vpop.f32.mrb[28].mxu0  ;;  %v5869_v9 = vadd.f32 %v5868_v1, %v5867_v56  ;;  %v5018_v16 = vmax.f32 %v3656_v57, 0.0  ;;  %v3666_v26 = vadd.f32 %v8757_v19, %v10204_v24  ;;  %v3660_v28 = vpop.f32.mrb[25].mxu1  ;;  %8915 = vmatmul.mubr.msk.f32.gmra.mrb[130].mxu1 %vm553_vm1, %v437_v4  ;;  %v172_v19 = vld [vmem:[%s13270_s0 + $0x470] sm:$0xff] }
 0x118   :  { %v5285_v5 = vsel %vm5231_vm4, %v4746_v54, 0.0  ;;  %v5282_v6 = vadd.f32 %v5281_v39, %v5280_v53  ;;  %v2306_v7 = vadd.f32 %v8349_v62, %v10204_v24  ;;  %v2300_v8 = vpop.f32.mrb[29].mxu0  ;;  %8507 = vmatmul.mubr.msk.f32.gmra.mrb[134].mxu0 %vm553_vm1, %v165_v48  ;;  %v5017_v17 = vmax.f32 %v3651_v2, 0.0  ;;  %8917 = vmatprep.mubr.msk.f32.mxu1 %vm553_vm1, %v438_v11  ;;  %v171_v11 = vld [vmem:[%s13270_s0 + $0x468] sm:$0xff] }
 0x119   :  { %v5283_v12 = vsel %vm5231_vm4, %v4745_v60, 0.0  ;;  %v2301_v14 = vadd.f32 %v10204_v24, %v2300_v8  ;;  %8509 = vmatprep.mubr.msk.f32.mxu0 %vm553_vm1, %v166_v55  ;;  %v5871_v25 = vadd.f32 %v5870_v63, %v5869_v9  ;;  %v5874_v32 = vsel %vm5231_vm4, %v5018_v16, 0.0  ;;  %v441_v63 = vld [vmem:[%s13270_s0 + $0xcd8] sm:$0xff] }
 0x11a   :  { %v5284_v20 = vadd.f32 %v5283_v12, %v5282_v6  ;;  %v4748_v22 = vmax.f32 %v2306_v7, 0.0  ;;  %v5872_v33 = vsel %vm5231_vm4, %v5017_v17, 0.0  ;;  %v3661_v34 = vadd.f32 %v10204_v24, %v3660_v28  ;;  %v8760_v48 = vpop.f32.mrb[26].mxu1  ;;  %v442_v7 = vld [vmem:[%s13270_s0 + $0xce0] sm:$0xff] }
 0x11b   :  { %v4747_v29 = vmax.f32 %v2301_v14, 0.0  ;;  %v8352_v31 = vpop.f32.mrb[30].mxu0  ;;  %v5873_v40 = vadd.f32 %v5872_v33, %v5871_v25  ;;  %v5020_v45 = vmax.f32 %v3666_v26, 0.0  ;;  %v3676_v54 = vadd.f32 %v8760_v48, %v10204_v24  ;;  %v3670_v55 = vpop.f32.mrb[27].mxu1  ;;  %8918 = vmatmul.mubr.msk.f32.gmra.mrb[132].mxu1 %vm553_vm1, %v439_v35  ;;  %v174_v48 = vld [vmem:[%s13270_s0 + $0x480] sm:$0xff] }
 0x11c   :  { %v5289_v36 = vsel %vm5231_vm4, %v4748_v22, 0.0  ;;  %v5286_v37 = vadd.f32 %v5285_v5, %v5284_v20  ;;  %v2316_v38 = vadd.f32 %v8352_v31, %v10204_v24  ;;  %v2310_v39 = vpop.f32.mrb[31].mxu0  ;;  %8510 = vmatmul.mubr.msk.f32.gmra.mrb[136].mxu0 %vm553_vm1, %v167_v15  ;;  %v5019_v47 = vmax.f32 %v3661_v34, 0.0  ;;  %8920 = vmatprep.mubr.msk.f32.mxu1 %vm553_vm1, %v440_v41  ;;  %v173_v41 = vld [vmem:[%s13270_s0 + $0x478] sm:$0xff] }
 0x11d   :  { %v5287_v42 = vsel %vm5231_vm4, %v4747_v29, 0.0  ;;  %v2311_v43 = vadd.f32 %v10204_v24, %v2310_v39  ;;  %8512 = vmatprep.mubr.msk.f32.mxu0 %vm553_vm1, %v168_v23  ;;  %v5875_v53 = vadd.f32 %v5874_v32, %v5873_v40  ;;  %v5878_v59 = vsel %vm5231_vm4, %v5020_v45, 0.0  ;;  %v443_v32 = vld [vmem:[%s13270_s0 + $0xce8] sm:$0xff] }
 0x11e   :  { %v5288_v50 = vadd.f32 %v5287_v42, %v5286_v37  ;;  %v4750_v51 = vmax.f32 %v2316_v38, 0.0  ;;  %v5876_v60 = vsel %vm5231_vm4, %v5019_v47, 0.0  ;;  %v3671_v62 = vadd.f32 %v10204_v24, %v3670_v55  ;;  %v8763_v15 = vpop.f32.mrb[28].mxu1  ;;  %v444_v38 = vld [vmem:[%s13270_s0 + $0xcf0] sm:$0xff] }
 0x11f   :  { %v4749_v56 = vmax.f32 %v2311_v43, 0.0  ;;  %v8355_v57 = vpop.f32.mrb[32].mxu0  ;;  %v5877_v6 = vadd.f32 %v5876_v60, %v5875_v53  ;;  %v5022_v12 = vmax.f32 %v3676_v54, 0.0  ;;  %v3686_v22 = vadd.f32 %v8763_v15, %v10204_v24  ;;  %v3680_v23 = vpop.f32.mrb[29].mxu1  ;;  %8921 = vmatmul.mubr.msk.f32.gmra.mrb[134].mxu1 %vm553_vm1, %v441_v63  ;;  %v446_v63 = vld [vmem:[%s13270_s0 + $0xd00] sm:$0xff] }
 0x120   :  { %v5293_v1 = vsel %vm5231_vm4, %v4750_v51, 0.0  ;;  %v5290_v2 = vadd.f32 %v5289_v36, %v5288_v50  ;;  %v2326_v4 = vadd.f32 %v8355_v57, %v10204_v24  ;;  %v2320_v5 = vpop.f32.mrb[33].mxu0  ;;  %8513 = vmatmul.mubr.msk.f32.gmra.mrb[138].mxu0 %vm553_vm1, %v169_v44  ;;  %v5021_v14 = vmax.f32 %v3671_v62, 0.0  ;;  %8923 = vmatprep.mubr.msk.f32.mxu1 %vm553_vm1, %v442_v7  ;;  %v445_v57 = vld [vmem:[%s13270_s0 + $0xcf8] sm:$0xff] }
 0x121   :  { %v5291_v8 = vsel %vm5231_vm4, %v4749_v56, 0.0  ;;  %v2321_v9 = vadd.f32 %v10204_v24, %v2320_v5  ;;  %8515 = vmatprep.mubr.msk.f32.mxu0 %vm553_vm1, %v170_v52  ;;  %v5879_v20 = vadd.f32 %v5878_v59, %v5877_v6  ;;  %v5882_v28 = vsel %vm5231_vm4, %v5022_v12, 0.0 }
 0x122   :  { %v5292_v16 = vadd.f32 %v5291_v8, %v5290_v2  ;;  %v4752_v17 = vmax.f32 %v2326_v4, 0.0  ;;  %v5880_v29 = vsel %vm5231_vm4, %v5021_v14, 0.0  ;;  %v3681_v31 = vadd.f32 %v10204_v24, %v3680_v23  ;;  %v8766_v44 = vpop.f32.mrb[30].mxu1  ;;  %v175_v4 = vld [vmem:[%s13270_s0 + $0x488] sm:$0xff] }
 0x123   :  { %v4751_v25 = vmax.f32 %v2321_v9, 0.0  ;;  %v8358_v26 = vpop.f32.mrb[34].mxu0  ;;  %v5881_v37 = vadd.f32 %v5880_v29, %v5879_v20  ;;  %v5024_v42 = vmax.f32 %v3686_v22, 0.0  ;;  %v3690_v51 = vpop.f32.mrb[31].mxu1  ;;  %8924 = vmatmul.mubr.msk.f32.gmra.mrb[136].mxu1 %vm553_vm1, %v443_v32  ;;  %v3696_v56 = vadd.f32 %v8766_v44, %v10204_v24  ;;  %v176_v9 = vld [vmem:[%s13270_s0 + $0x490] sm:$0xff]  ;;  %v447_v22 = vld [vmem:[%s13270_s0 + $0xd08] sm:$0xff] }
 0x124   :  { %v10620_v33 = vadd.f32 %v5293_v1, %v5292_v16  ;;  %v5302_v34 = vsel %vm5231_vm4, %v4752_v17, 0.0  ;;  %v2336_v35 = vadd.f32 %v8358_v26, %v10204_v24  ;;  %v2330_v36 = vpop.f32.mrb[35].mxu0  ;;  %8516 = vmatmul.mubr.msk.f32.gmra.mrb[140].mxu0 %vm553_vm1, %v171_v11  ;;  %v5023_v43 = vmax.f32 %v3681_v31, 0.0  ;;  %8926 = vmatprep.mubr.msk.f32.mxu1 %vm553_vm1, %v444_v38  ;;  %v177_v32 = vld [vmem:[%s13270_s0 + $0x498] sm:$0xff] }
 0x125   :  { %v5301_v39 = vsel %vm5231_vm4, %v4751_v25, 0.0  ;;  %v2331_v40 = vadd.f32 %v10204_v24, %v2330_v36  ;;  %8518 = vmatprep.mubr.msk.f32.mxu0 %vm553_vm1, %v172_v19  ;;  %v5883_v50 = vadd.f32 %v5882_v28, %v5881_v37  ;;  %v5886_v54 = vsel %vm5231_vm4, %v5024_v42, 0.0  ;;  %v448_v28 = vld [vmem:[%s13270_s0 + $0xd10] sm:$0xff] }
 0x126   :  { %v5303_v45 = vadd.f32 %v5302_v34, %v5301_v39  ;;  %v4754_v47 = vmax.f32 %v2336_v35, 0.0  ;;  %v5884_v55 = vsel %vm5231_vm4, %v5023_v43, 0.0  ;;  %v3691_v5 = vadd.f32 %v10204_v24, %v3690_v51  ;;  %v8769_v6 = vpop.f32.mrb[32].mxu1  ;;  %v178_v39 = vld [vmem:[%s13270_s0 + $0x4a0] sm:$0xff] }
 0x127   :  { %v4753_v52 = vmax.f32 %v2331_v40, 0.0  ;;  %v8361_v53 = vpop.f32.mrb[36].mxu0  ;;  %v5885_v62 = vadd.f32 %v5884_v55, %v5883_v50  ;;  %v5026_v11 = vmax.f32 %v3696_v56, 0.0  ;;  %v3700_v14 = vpop.f32.mrb[33].mxu1  ;;  %8927 = vmatmul.mubr.msk.f32.gmra.mrb[138].mxu1 %vm553_vm1, %v445_v57  ;;  %v3706_v20 = vadd.f32 %v8769_v6, %v10204_v24  ;;  %v449_v50 = vld [vmem:[%s13270_s0 + $0xd18] sm:$0xff]  ;;  %v450_v55 = vld [vmem:[%s13270_s0 + $0xd20] sm:$0xff] }
 0x128   :  { %v2346_v59 = vadd.f32 %v8361_v53, %v10204_v24  ;;  %v2340_v60 = vpop.f32.mrb[37].mxu0  ;;  %8519 = vmatmul.mubr.msk.f32.gmra.mrb[142].mxu0 %vm553_vm1, %v173_v41  ;;  %v5306_v7 = vsel %vm5231_vm4, %v4754_v47, 0.0  ;;  %v5025_v19 = vmax.f32 %v3691_v5, 0.0  ;;  %8929 = vmatprep.mubr.msk.f32.mxu1 %vm553_vm1, %v446_v63  ;;  %v3701_v47 = vadd.f32 %v10204_v24, %v3700_v14  ;;  %v180_v5 = vld [vmem:[%s13270_s0 + $0x4b0] sm:$0xff] }
 0x129   :  { %v5304_v1 = vsel %vm5231_vm4, %v4753_v52, 0.0  ;;  %v2341_v2 = vadd.f32 %v10204_v24, %v2340_v60  ;;  %8521 = vmatprep.mubr.msk.f32.mxu0 %vm553_vm1, %v174_v48  ;;  %v5887_v12 = vadd.f32 %v5886_v54, %v5885_v62  ;;  %v5028_v35 = vmax.f32 %v3706_v20, 0.0 }
 0x12a   :  { %v5305_v8 = vadd.f32 %v5304_v1, %v5303_v45  ;;  %v4756_v15 = vmax.f32 %v2346_v59, 0.0  ;;  %v5888_v34 = vsel %vm5231_vm4, %v5025_v19, 0.0  ;;  %v8772_v36 = vpop.f32.mrb[34].mxu1  ;;  %v5890_v40 = vsel %vm5231_vm4, %v5026_v11, 0.0  ;;  %v179_v59 = vld [vmem:[%s13270_s0 + $0x4a8] sm:$0xff] }
 0x12b   :  { %v4755_v16 = vmax.f32 %v2341_v2, 0.0  ;;  %v8364_v17 = vpop.f32.mrb[38].mxu0  ;;  %v5889_v41 = vadd.f32 %v5888_v34, %v5887_v12  ;;  %v3710_v42 = vpop.f32.mrb[35].mxu1  ;;  %8930 = vmatmul.mubr.msk.f32.gmra.mrb[140].mxu1 %vm553_vm1, %v447_v22  ;;  %v3716_v48 = vadd.f32 %v8772_v36, %v10204_v24  ;;  %v5894_v54 = vsel %vm5231_vm4, %v5028_v35, 0.0  ;;  %v10719_v19 = vld [vmem:[%s13272_s2] ss:$0 sm:$0xff] }
 0x12c   :  { %v5307_v23 = vadd.f32 %v5306_v7, %v5305_v8  ;;  %v2356_v25 = vadd.f32 %v8364_v17, %v10204_v24  ;;  %v2350_v26 = vpop.f32.mrb[39].mxu0  ;;  %8522 = vmatmul.mubr.msk.f32.gmra.mrb[144].mxu0 %vm553_vm1, %v175_v4  ;;  %v5310_v43 = vsel %vm5231_vm4, %v4756_v15, 0.0  ;;  %8932 = vmatprep.mubr.msk.f32.mxu1 %vm553_vm1, %v448_v28  ;;  %v5027_v60 = vmax.f32 %v3701_v47, 0.0  ;;  %v451_v15 = vld [vmem:[%s13270_s0 + $0xd28] sm:$0xff]  ;;  %v181_v28 = vld [vmem:[%s13270_s0 + $0x4b8] sm:$0xff]  ;;  %v182_v36 = vld [vmem:[%s13270_s0 + $0x4c0] sm:$0xff] }
 0x12d   :  { %v5308_v29 = vsel %vm5231_vm4, %v4755_v16, 0.0  ;;  %v2351_v31 = vadd.f32 %v10204_v24, %v2350_v26  ;;  %8524 = vmatprep.mubr.msk.f32.mxu0 %vm553_vm1, %v176_v9  ;;  %v5891_v62 = vadd.f32 %v5890_v40, %v5889_v41  ;;  %v5030_v6 = vmax.f32 %v3716_v48, 0.0 }
 0x12e   :  { %v5309_v37 = vadd.f32 %v5308_v29, %v5307_v23  ;;  %v4758_v38 = vmax.f32 %v2356_v25, 0.0  ;;  %v8775_v63 = vpop.f32.mrb[36].mxu1  ;;  %v5892_v11 = vsel %vm5231_vm4, %v5027_v60, 0.0  ;;  %v3711_v12 = vadd.f32 %v10204_v24, %v3710_v42  ;;  %v452_v23 = vld [vmem:[%s13270_s0 + $0xd30] sm:$0xff] }
 0x12f   :  { %v4757_v44 = vmax.f32 %v2351_v31, 0.0  ;;  %v8367_v45 = vpop.f32.mrb[40].mxu0  ;;  %v3720_v7 = vpop.f32.mrb[37].mxu1  ;;  %8933 = vmatmul.mubr.msk.f32.gmra.mrb[142].mxu1 %vm553_vm1, %v449_v50  ;;  %v3726_v14 = vadd.f32 %v8775_v63, %v10204_v24  ;;  %v5898_v29 = vsel %vm5231_vm4, %v5030_v6, 0.0 }
 0x130   :  { %v5311_v51 = vadd.f32 %v5310_v43, %v5309_v37  ;;  %v2366_v52 = vadd.f32 %v8367_v45, %v10204_v24  ;;  %v2360_v53 = vpop.f32.mrb[41].mxu0  ;;  %8525 = vmatmul.mubr.msk.f32.gmra.mrb[146].mxu0 %vm553_vm1, %v177_v32  ;;  %v5314_v1 = vsel %vm5231_vm4, %v4758_v38, 0.0  ;;  %8935 = vmatprep.mubr.msk.f32.mxu1 %vm553_vm1, %v450_v55  ;;  %v5029_v31 = vmax.f32 %v3711_v12, 0.0  ;;  %v453_v45 = vld [vmem:[%s13270_s0 + $0xd38] sm:$0xff]  ;;  %v455_v12 = vld [vmem:[%s13270_s0 + $0xd48] sm:$0xff] }
 0x131   :  { %v5312_v56 = vsel %vm5231_vm4, %v4757_v44, 0.0  ;;  %v2361_v57 = vadd.f32 %v10204_v24, %v2360_v53  ;;  %8527 = vmatprep.mubr.msk.f32.mxu0 %vm553_vm1, %v178_v39  ;;  %v5893_v24 = vadd.f32 %v5892_v11, %v5891_v62  ;;  %v5032_v38 = vmax.f32 %v3726_v14, 0.0  ;;  %v454_v53 = vld [vmem:[%s13270_s0 + $0xd40] sm:$0xff] }
 0x132   :  { %v5313_v2 = vadd.f32 %v5312_v56, %v5311_v51  ;;  %v4760_v4 = vmax.f32 %v2366_v52, 0.0  ;;  %v8778_v32 = vpop.f32.mrb[38].mxu1  ;;  %v5896_v42 = vsel %vm5231_vm4, %v5029_v31, 0.0  ;;  %v3721_v43 = vadd.f32 %v10719_v19, %v3720_v7  ;;  %v183_v56 = vld [vmem:[%s13270_s0 + $0x4c8] sm:$0xff] }
 0x133   :  { %v4759_v8 = vmax.f32 %v2361_v57, 0.0  ;;  %v8370_v9 = vpop.f32.mrb[42].mxu0  ;;  %v5895_v37 = vadd.f32 %v5894_v54, %v5893_v24  ;;  %v3730_v39 = vpop.f32.mrb[39].mxu1  ;;  %8936 = vmatmul.mubr.msk.f32.gmra.mrb[144].mxu1 %vm553_vm1, %v451_v15  ;;  %v3736_v44 = vadd.f32 %v10719_v19, %v8778_v32  ;;  %v5902_v57 = vsel %vm5231_vm4, %v5032_v38, 0.0 }
 0x134   :  { %v5318_v16 = vsel %vm5231_vm4, %v4760_v4, 0.0  ;;  %v5315_v17 = vadd.f32 %v5314_v1, %v5313_v2  ;;  %v2376_v20 = vadd.f32 %v10719_v19, %v8370_v9  ;;  %v2370_v22 = vpop.f32.mrb[43].mxu0  ;;  %8528 = vmatmul.mubr.msk.f32.gmra.mrb[148].mxu0 %vm553_vm1, %v179_v59  ;;  %8938 = vmatprep.mubr.msk.f32.mxu1 %vm553_vm1, %v452_v23  ;;  %v5031_v59 = vmax.f32 %v3721_v43, 0.0  ;;  %v184_v1 = vld [vmem:[%s13270_s0 + $0x4d0] sm:$0xff]  ;;  %v457_v43 = vld [vmem:[%s13270_s0 + $0xd58] sm:$0xff] }
 0x135   :  { %v5316_v25 = vsel %vm5231_vm4, %v4759_v8, 0.0  ;;  %v2371_v26 = vadd.f32 %v10719_v19, %v2370_v22  ;;  %8530 = vmatprep.mubr.msk.f32.mxu0 %vm553_vm1, %v180_v5  ;;  %v5897_v52 = vadd.f32 %v5896_v42, %v5895_v37  ;;  %v5034_v4 = vmax.f32 %v3736_v44, 0.0  ;;  %v456_v22 = vld [vmem:[%s13270_s0 + $0xd50] sm:$0xff] }
 0x136   :  { %v5317_v34 = vadd.f32 %v5316_v25, %v5315_v17  ;;  %v4762_v35 = vmax.f32 %v2376_v20, 0.0  ;;  %v8781_v60 = vpop.f32.mrb[40].mxu1  ;;  %v5900_v8 = vsel %vm5231_vm4, %v5031_v59, 0.0  ;;  %v3731_v9 = vadd.f32 %v10719_v19, %v3730_v39  ;;  %v185_v25 = vld [vmem:[%s13270_s0 + $0x4d8] sm:$0xff] }
 0x137   :  { %v4761_v40 = vmax.f32 %v2371_v26, 0.0  ;;  %v8373_v41 = vpop.f32.mrb[44].mxu0  ;;  %v5899_v2 = vadd.f32 %v5898_v29, %v5897_v52  ;;  %v3740_v5 = vpop.f32.mrb[41].mxu1  ;;  %8939 = vmatmul.mubr.msk.f32.gmra.mrb[146].mxu1 %vm553_vm1, %v453_v45  ;;  %v3746_v11 = vadd.f32 %v10719_v19, %v8781_v60  ;;  %v5906_v26 = vsel %vm5231_vm4, %v5034_v4, 0.0 }
 0x138   :  { %v5322_v47 = vsel %vm5231_vm4, %v4762_v35, 0.0  ;;  %v5319_v48 = vadd.f32 %v5318_v16, %v5317_v34  ;;  %v2386_v50 = vadd.f32 %v10719_v19, %v8373_v41  ;;  %v2380_v51 = vpop.f32.mrb[45].mxu0  ;;  %8531 = vmatmul.mubr.msk.f32.gmra.mrb[150].mxu0 %vm553_vm1, %v181_v28  ;;  %8941 = vmatprep.mubr.msk.f32.mxu1 %vm553_vm1, %v454_v53  ;;  %v5033_v28 = vmax.f32 %v3731_v9, 0.0  ;;  %v186_v34 = vld [vmem:[%s13270_s0 + $0x4e0] sm:$0xff]  ;;  %v459_v9 = vld [vmem:[%s13270_s0 + $0xd68] sm:$0xff] }
 0x139   :  { %v5320_v54 = vsel %vm5231_vm4, %v4761_v40, 0.0  ;;  %v2381_v55 = vadd.f32 %v10719_v19, %v2380_v51  ;;  %8533 = vmatprep.mubr.msk.f32.mxu0 %vm553_vm1, %v182_v36  ;;  %v5901_v20 = vadd.f32 %v5900_v8, %v5899_v2  ;;  %v5036_v36 = vmax.f32 %v3746_v11, 0.0  ;;  %v458_v51 = vld [vmem:[%s13270_s0 + $0xd60] sm:$0xff] }
 0x13a   :  { %v5321_v62 = vadd.f32 %v5320_v54, %v5319_v48  ;;  %v4764_v63 = vmax.f32 %v2386_v50, 0.0  ;;  %v8784_v29 = vpop.f32.mrb[42].mxu1  ;;  %v5904_v40 = vsel %vm5231_vm4, %v5033_v28, 0.0  ;;  %v3741_v41 = vadd.f32 %v10719_v19, %v3740_v5  ;;  %v187_v54 = vld [vmem:[%s13270_s0 + $0x4e8] sm:$0xff] }
 0x13b   :  { %v4763_v6 = vmax.f32 %v2381_v55, 0.0  ;;  %v8376_v7 = vpop.f32.mrb[46].mxu0  ;;  %v5903_v35 = vadd.f32 %v5902_v57, %v5901_v20  ;;  %v3750_v37 = vpop.f32.mrb[43].mxu1  ;;  %8942 = vmatmul.mubr.msk.f32.gmra.mrb[148].mxu1 %vm553_vm1, %v455_v12  ;;  %v3756_v42 = vadd.f32 %v10719_v19, %v8784_v29  ;;  %v5910_v55 = vsel %vm5231_vm4, %v5036_v36, 0.0  ;;  %v190_v29 = vld [vmem:[%s13270_s0 + $0x500] sm:$0xff] }
 0x13c   :  { %v5326_v14 = vsel %vm5231_vm4, %v4764_v63, 0.0  ;;  %v5323_v15 = vadd.f32 %v5322_v47, %v5321_v62  ;;  %v2396_v16 = vadd.f32 %v10719_v19, %v8376_v7  ;;  %v2390_v17 = vpop.f32.mrb[47].mxu0  ;;  %8534 = vmatmul.mubr.msk.f32.gmra.mrb[152].mxu0 %vm553_vm1, %v183_v56  ;;  %8944 = vmatprep.mubr.msk.f32.mxu1 %vm553_vm1, %v456_v22  ;;  %v5035_v56 = vmax.f32 %v3741_v41, 0.0  ;;  %v188_v62 = vld [vmem:[%s13270_s0 + $0x4f0] sm:$0xff] }
 0x13d   :  { %v5324_v24 = vsel %vm5231_vm4, %v4763_v6, 0.0  ;;  %v2391_v23 = vadd.f32 %v10719_v19, %v2390_v17  ;;  %8536 = vmatprep.mubr.msk.f32.mxu0 %vm553_vm1, %v184_v1  ;;  %v5905_v50 = vadd.f32 %v5904_v40, %v5903_v35  ;;  %v5038_v1 = vmax.f32 %v3756_v42, 0.0  ;;  %v461_v40 = vld [vmem:[%s13270_s0 + $0xd78] sm:$0xff] }
 0x13e   :  { %v5325_v31 = vadd.f32 %v5324_v24, %v5323_v15  ;;  %v4766_v32 = vmax.f32 %v2396_v16, 0.0  ;;  %v8787_v57 = vpop.f32.mrb[44].mxu1  ;;  %v5908_v6 = vsel %vm5231_vm4, %v5035_v56, 0.0  ;;  %v3751_v7 = vadd.f32 %v10719_v19, %v3750_v37  ;;  %v460_v16 = vld [vmem:[%s13270_s0 + $0xd70] sm:$0xff]  ;;  %v189_v24 = vld [vmem:[%s13270_s0 + $0x4f8] sm:$0xff] }
 0x13f   :  { %v4765_v38 = vmax.f32 %v2391_v23, 0.0  ;;  %v8379_v39 = vpop.f32.mrb[48].mxu0  ;;  %v5907_v63 = vadd.f32 %v5906_v26, %v5905_v50  ;;  %8945 = vmatmul.mubr.msk.f32.gmra.mrb[150].mxu1 %vm553_vm1, %v457_v43  ;;  %v3760_v2 = vpop.f32.mrb[45].mxu1  ;;  %v3766_v8 = vadd.f32 %v10719_v19, %v8787_v57  ;;  %v5914_v37 = vsel %vm5231_vm4, %v5038_v1, 0.0  ;;  %v191_v50 = vld [vmem:[%s13270_s0 + $0x508] sm:$0xff]  ;;  %v192_v56 = vld [vmem:[%s13270_s0 + $0x510] sm:$0xff] }
 0x140   :  { %v5330_v44 = vsel %vm5231_vm4, %v4766_v32, 0.0  ;;  %v5327_v45 = vadd.f32 %v5326_v14, %v5325_v31  ;;  %v2406_v47 = vadd.f32 %v10719_v19, %v8379_v39  ;;  %v2400_v48 = vpop.f32.mrb[49].mxu0  ;;  %8537 = vmatmul.mubr.msk.f32.gmra.mrb[154].mxu0 %vm553_vm1, %v185_v25  ;;  %8947 = vmatprep.mubr.msk.f32.mxu1 %vm553_vm1, %v458_v51  ;;  %v5037_v23 = vmax.f32 %v3751_v7, 0.0 }
 0x141   :  { %v5328_v52 = vsel %vm5231_vm4, %v4765_v38, 0.0  ;;  %v2401_v53 = vadd.f32 %v10719_v19, %v2400_v48  ;;  %8539 = vmatprep.mubr.msk.f32.mxu0 %vm553_vm1, %v186_v34  ;;  %v5909_v15 = vadd.f32 %v5908_v6, %v5907_v63  ;;  %v5040_v32 = vmax.f32 %v3766_v8, 0.0 }
 0x142   :  { %v5329_v59 = vadd.f32 %v5328_v52, %v5327_v45  ;;  %v4768_v60 = vmax.f32 %v2406_v47, 0.0  ;;  %v8790_v25 = vpop.f32.mrb[46].mxu1  ;;  %v5912_v38 = vsel %vm5231_vm4, %v5037_v23, 0.0  ;;  %v3761_v39 = vadd.f32 %v10719_v19, %v3760_v2  ;;  %v462_v45 = vld [vmem:[%s13270_s0 + $0xd80] sm:$0xff] }
 0x143   :  { %v4767_v4 = vmax.f32 %v2401_v53, 0.0  ;;  %v8382_v5 = vpop.f32.mrb[50].mxu0  ;;  %v5911_v31 = vadd.f32 %v5910_v55, %v5909_v15  ;;  %v3770_v34 = vpop.f32.mrb[47].mxu1  ;;  %8948 = vmatmul.mubr.msk.f32.gmra.mrb[152].mxu1 %vm553_vm1, %v459_v9  ;;  %v3776_v52 = vadd.f32 %v10719_v19, %v8790_v25  ;;  %v464_v9 = vld [vmem:[%s13270_s0 + $0xd90] sm:$0xff] }
 0x144   :  { %v5331_v11 = vadd.f32 %v5330_v44, %v5329_v59  ;;  %v2416_v12 = vadd.f32 %v10719_v19, %v8382_v5  ;;  %v2410_v14 = vpop.f32.mrb[51].mxu0  ;;  %8540 = vmatmul.mubr.msk.f32.gmra.mrb[156].mxu0 %vm553_vm1, %v187_v54  ;;  %v5334_v17 = vsel %vm5231_vm4, %v4768_v60, 0.0  ;;  %8950 = vmatprep.mubr.msk.f32.mxu1 %vm553_vm1, %v460_v16  ;;  %v5039_v51 = vmax.f32 %v3761_v39, 0.0  ;;  %v463_v5 = vld [vmem:[%s13270_s0 + $0xd88] sm:$0xff]  ;;  %v466_v39 = vld [vmem:[%s13270_s0 + $0xda0] sm:$0xff] }
 0x145   :  { %v5332_v20 = vsel %vm5231_vm4, %v4767_v4, 0.0  ;;  %v2411_v22 = vadd.f32 %v10719_v19, %v2410_v14  ;;  %8542 = vmatprep.mubr.msk.f32.mxu0 %vm553_vm1, %v188_v62  ;;  %v5913_v44 = vadd.f32 %v5912_v38, %v5911_v31  ;;  %v5923_v59 = vsel %vm5231_vm4, %v5040_v32, 0.0  ;;  %v193_v14 = vld [vmem:[%s13270_s0 + $0x518] sm:$0xff] }
 0x146   :  { %v5333_v26 = vadd.f32 %v5332_v20, %v5331_v11  ;;  %v4770_v28 = vmax.f32 %v2416_v12, 0.0  ;;  %v8793_v53 = vpop.f32.mrb[48].mxu1  ;;  %v5922_v2 = vsel %vm5231_vm4, %v5039_v51, 0.0  ;;  %v3771_v4 = vadd.f32 %v10719_v19, %v3770_v34  ;;  %v465_v34 = vld [vmem:[%s13270_s0 + $0xd98] sm:$0xff] }
 0x147   :  { %v4769_v35 = vmax.f32 %v2411_v22, 0.0  ;;  %v8385_v36 = vpop.f32.mrb[52].mxu0  ;;  %v10855_v57 = vadd.f32 %v5914_v37, %v5913_v44  ;;  %v3780_v60 = vpop.f32.mrb[49].mxu1  ;;  %8951 = vmatmul.mubr.msk.f32.gmra.mrb[154].mxu1 %vm553_vm1, %v461_v40  ;;  %v5924_v15 = vadd.f32 %v5923_v59, %v5922_v2  ;;  %v5042_v16 = vmax.f32 %v3776_v52, 0.0  ;;  %v194_v22 = vld [vmem:[%s13270_s0 + $0x520] sm:$0xff] }
 0x148   :  { %v5335_v41 = vadd.f32 %v5334_v17, %v5333_v26  ;;  %v2426_v42 = vadd.f32 %v10719_v19, %v8385_v36  ;;  %v2420_v43 = vpop.f32.mrb[53].mxu0  ;;  %8543 = vmatmul.mubr.msk.f32.gmra.mrb[158].mxu0 %vm553_vm1, %v189_v24  ;;  %v5338_v54 = vsel %vm5231_vm4, %v4770_v28, 0.0  ;;  %8953 = vmatprep.mubr.msk.f32.mxu1 %vm553_vm1, %v462_v45  ;;  %v5041_v24 = vmax.f32 %v3771_v4, 0.0 }
 0x149   :  { %v5336_v47 = vsel %vm5231_vm4, %v4769_v35, 0.0  ;;  %v2421_v48 = vadd.f32 %v10719_v19, %v2420_v43  ;;  %8545 = vmatprep.mubr.msk.f32.mxu0 %vm553_vm1, %v190_v29  ;;  %v3786_v23 = vadd.f32 %v10719_v19, %v8793_v53  ;;  %v3781_v32 = vadd.f32 %v10719_v19, %v3780_v60 }
 0x14a   :  { %v5337_v55 = vadd.f32 %v5336_v47, %v5335_v41  ;;  %v4772_v62 = vmax.f32 %v2426_v42, 0.0  ;;  %v8796_v17 = vpop.f32.mrb[50].mxu1  ;;  %v195_v42 = vld [vmem:[%s13270_s0 + $0x528] sm:$0xff]  ;;  %v5927_v43 = vsel %vm5231_vm4, %v5042_v16, 0.0  ;;  %v5925_v44 = vsel %vm5231_vm4, %v5041_v24, 0.0 }
 0x14b   :  { %v4771_v63 = vmax.f32 %v2421_v48, 0.0  ;;  %v8388_v1 = vpop.f32.mrb[54].mxu0  ;;  %v3790_v25 = vpop.f32.mrb[51].mxu1  ;;  %8954 = vmatmul.mubr.msk.f32.gmra.mrb[156].mxu1 %vm553_vm1, %v463_v5  ;;  %v3796_v38 = vadd.f32 %v10719_v19, %v8796_v17  ;;  %v5926_v51 = vadd.f32 %v5925_v44, %v5924_v15  ;;  %v5044_v52 = vmax.f32 %v3786_v23, 0.0  ;;  %v468_v5 = vld [vmem:[%s13270_s0 + $0xdb0] sm:$0xff]  ;;  %v198_v17 = vld [vmem:[%s13270_s0 + $0x540] sm:$0xff] }
 0x14c   :  { %v5339_v6 = vadd.f32 %v5338_v54, %v5337_v55  ;;  %v2436_v7 = vadd.f32 %v10719_v19, %v8388_v1  ;;  %v2430_v8 = vpop.f32.mrb[55].mxu0  ;;  %8546 = vmatmul.mubr.msk.f32.gmra.mrb[160].mxu0 %vm553_vm1, %v191_v50  ;;  %v5342_v26 = vsel %vm5231_vm4, %v4772_v62, 0.0  ;;  %8956 = vmatprep.mubr.msk.f32.mxu1 %vm553_vm1, %v464_v9  ;;  %v196_v50 = vld [vmem:[%s13270_s0 + $0x530] sm:$0xff]  ;;  %v5043_v59 = vmax.f32 %v3781_v32, 0.0  ;;  %v467_v62 = vld [vmem:[%s13270_s0 + $0xda8] sm:$0xff] }
 0x14d   :  { %v5340_v11 = vsel %vm5231_vm4, %v4771_v63, 0.0  ;;  %v2431_v12 = vadd.f32 %v10719_v19, %v2430_v8  ;;  %8548 = vmatprep.mubr.msk.f32.mxu0 %vm553_vm1, %v192_v56  ;;  %v3791_v60 = vadd.f32 %v10719_v19, %v3790_v25  ;;  %v5046_v4 = vmax.f32 %v3796_v38, 0.0  ;;  %v197_v8 = vld [vmem:[%s13270_s0 + $0x538] sm:$0xff] }
 0x14e   :  { %v5341_v20 = vadd.f32 %v5340_v11, %v5339_v6  ;;  %v4774_v28 = vmax.f32 %v2436_v7, 0.0  ;;  %v8799_v45 = vpop.f32.mrb[52].mxu1  ;;  %v5928_v9 = vadd.f32 %v5927_v43, %v5926_v51  ;;  %v5929_v11 = vsel %vm5231_vm4, %v5043_v59, 0.0 }
 0x14f   :  { %v4773_v29 = vmax.f32 %v2431_v12, 0.0  ;;  %v8391_v31 = vpop.f32.mrb[56].mxu0  ;;  %v3800_v53 = vpop.f32.mrb[53].mxu1  ;;  %8957 = vmatmul.mubr.msk.f32.gmra.mrb[158].mxu1 %vm553_vm1, %v465_v34 }
 0x150   :  { %v5343_v35 = vadd.f32 %v5342_v26, %v5341_v20  ;;  %v2446_v36 = vadd.f32 %v10719_v19, %v8391_v31  ;;  %v2440_v37 = vpop.f32.mrb[57].mxu0  ;;  %8549 = vmatmul.mubr.msk.f32.gmra.mrb[162].mxu0 %vm553_vm1, %v193_v14  ;;  %v5346_v54 = vsel %vm5231_vm4, %v4774_v28, 0.0  ;;  %8959 = vmatprep.mubr.msk.f32.mxu1 %vm553_vm1, %v466_v39  ;;  %v5931_v20 = vsel %vm5231_vm4, %v5044_v52, 0.0 }
 0x151   :  { %v5344_v40 = vsel %vm5231_vm4, %v4773_v29, 0.0  ;;  %v2441_v41 = vadd.f32 %v10719_v19, %v2440_v37  ;;  %8551 = vmatprep.mubr.msk.f32.mxu0 %vm553_vm1, %v194_v22  ;;  %v5930_v25 = vadd.f32 %v5929_v11, %v5928_v9  ;;  %v5045_v26 = vmax.f32 %v3791_v60, 0.0  ;;  %v469_v29 = vld [vmem:[%s13270_s0 + $0xdb8] sm:$0xff]  ;;  %v470_v37 = vld [vmem:[%s13270_s0 + $0xdc0] sm:$0xff]  ;;  %v471_v60 = vld [vmem:[%s13270_s0 + $0xdc8] sm:$0xff] }
 0x152   :  { %v5345_v47 = vadd.f32 %v5344_v40, %v5343_v35  ;;  %v4776_v48 = vmax.f32 %v2446_v36, 0.0  ;;  %v8802_v12 = vpop.f32.mrb[54].mxu1  ;;  %v3806_v28 = vadd.f32 %v10719_v19, %v8799_v45  ;;  %v5935_v36 = vsel %vm5231_vm4, %v5046_v4, 0.0  ;;  %v199_v40 = vld [vmem:[%s13270_s0 + $0x548] sm:$0xff]  ;;  %v472_v4 = vld [vmem:[%s13270_s0 + $0xdd0] sm:$0xff] }
 0x153   :  { %v4775_v55 = vmax.f32 %v2441_v41, 0.0  ;;  %v8394_v56 = vpop.f32.mrb[58].mxu0  ;;  %v3810_v22 = vpop.f32.mrb[55].mxu1  ;;  %8960 = vmatmul.mubr.msk.f32.gmra.mrb[160].mxu1 %vm553_vm1, %v467_v62  ;;  %v5932_v41 = vadd.f32 %v5931_v20, %v5930_v25 }
 0x154   :  { %v5347_v63 = vadd.f32 %v5346_v54, %v5345_v47  ;;  %v2456_v1 = vadd.f32 %v10719_v19, %v8394_v56  ;;  %v2450_v2 = vpop.f32.mrb[59].mxu0  ;;  %8552 = vmatmul.mubr.msk.f32.gmra.mrb[164].mxu0 %vm553_vm1, %v195_v42  ;;  %v5350_v14 = vsel %vm5231_vm4, %v4776_v48, 0.0  ;;  %8962 = vmatprep.mubr.msk.f32.mxu1 %vm553_vm1, %v468_v5  ;;  %v5933_v42 = vsel %vm5231_vm4, %v5045_v26, 0.0  ;;  %v200_v47 = vld [vmem:[%s13270_s0 + $0x550] sm:$0xff] }
 0x155   :  { %v5348_v6 = vsel %vm5231_vm4, %v4775_v55, 0.0  ;;  %v2451_v7 = vadd.f32 %v10719_v19, %v2450_v2  ;;  %8554 = vmatprep.mubr.msk.f32.mxu0 %vm553_vm1, %v196_v50  ;;  %v5048_v48 = vmax.f32 %v3806_v28, 0.0  ;;  %v3801_v50 = vadd.f32 %v10719_v19, %v3800_v53  ;;  %v473_v28 = vld [vmem:[%s13270_s0 + $0xdd8] sm:$0xff] }
 0x156   :  { %v5349_v15 = vadd.f32 %v5348_v6, %v5347_v63  ;;  %v4778_v16 = vmax.f32 %v2456_v1, 0.0  ;;  %v8805_v43 = vpop.f32.mrb[56].mxu1  ;;  %v5934_v55 = vadd.f32 %v5933_v42, %v5932_v41  ;;  %v3816_v56 = vadd.f32 %v10719_v19, %v8802_v12 }
 0x157   :  { %v4777_v24 = vmax.f32 %v2451_v7, 0.0  ;;  %v8397_v23 = vpop.f32.mrb[60].mxu0  ;;  %v3820_v51 = vpop.f32.mrb[57].mxu1  ;;  %8963 = vmatmul.mubr.msk.f32.gmra.mrb[162].mxu1 %vm553_vm1, %v469_v29  ;;  %v3811_v59 = vadd.f32 %v10719_v19, %v3810_v22  ;;  %v5939_v2 = vsel %vm5231_vm4, %v5048_v48, 0.0  ;;  %v201_v7 = vld [vmem:[%s13270_s0 + $0x558] sm:$0xff]  ;;  %v3826_v25 = vadd.f32 %v10719_v19, %v8805_v43 }
 0x158   :  { %v5354_v31 = vsel %vm5231_vm4, %v4778_v16, 0.0  ;;  %v5351_v32 = vadd.f32 %v5350_v14, %v5349_v15  ;;  %v2466_v34 = vadd.f32 %v10719_v19, %v8397_v23  ;;  %v2460_v35 = vpop.f32.mrb[61].mxu0  ;;  %8555 = vmatmul.mubr.msk.f32.gmra.mrb[166].mxu0 %vm553_vm1, %v197_v8  ;;  %8965 = vmatprep.mubr.msk.f32.mxu1 %vm553_vm1, %v470_v37  ;;  %v5047_v8 = vmax.f32 %v3801_v50, 0.0  ;;  %v202_v15 = vld [vmem:[%s13270_s0 + $0x560] sm:$0xff] }
 0x159   :  { %v5352_v38 = vsel %vm5231_vm4, %v4777_v24, 0.0  ;;  %v2461_v39 = vadd.f32 %v10719_v19, %v2460_v35  ;;  %8557 = vmatprep.mubr.msk.f32.mxu0 %vm553_vm1, %v198_v17  ;;  %v5936_v9 = vadd.f32 %v5935_v36, %v5934_v55  ;;  %v5050_v16 = vmax.f32 %v3816_v56, 0.0  ;;  %v474_v36 = vld [vmem:[%s13270_s0 + $0xde0] sm:$0xff] }
 0x15a   :  { %v5353_v44 = vadd.f32 %v5352_v38, %v5351_v32  ;;  %v4780_v45 = vmax.f32 %v2466_v34, 0.0  ;;  %v8808_v11 = vpop.f32.mrb[58].mxu1  ;;  %v5049_v17 = vmax.f32 %v3811_v59, 0.0  ;;  %v5937_v23 = vsel %vm5231_vm4, %v5047_v8, 0.0  ;;  %v475_v59 = vld [vmem:[%s13270_s0 + $0xde8] sm:$0xff] }
 0x15b   :  { %v4779_v52 = vmax.f32 %v2461_v39, 0.0  ;;  %v8400_v54 = vpop.f32.mrb[62].mxu0  ;;  %v3830_v20 = vpop.f32.mrb[59].mxu1  ;;  %8966 = vmatmul.mubr.msk.f32.gmra.mrb[164].mxu1 %vm553_vm1, %v471_v60  ;;  %v3821_v26 = vadd.f32 %v10719_v19, %v3820_v51  ;;  %v5938_v35 = vadd.f32 %v5937_v23, %v5936_v9  ;;  %v203_v39 = vld [vmem:[%s13270_s0 + $0x568] sm:$0xff]  ;;  %v5052_v48 = vmax.f32 %v3826_v25, 0.0 }
 0x15c   :  { %v5358_v62 = vsel %vm5231_vm4, %v4780_v45, 0.0  ;;  %v5355_v63 = vadd.f32 %v5354_v31, %v5353_v44  ;;  %v2476_v53 = vadd.f32 %v10719_v19, %v8400_v54  ;;  %v2470_v1 = vpop.f32.mrb[63].mxu0  ;;  %8558 = vmatmul.mubr.msk.f32.gmra.mrb[168].mxu0 %vm553_vm1, %v199_v40  ;;  %8968 = vmatprep.mubr.msk.f32.mxu1 %vm553_vm1, %v472_v4  ;;  %v5943_v40 = vsel %vm5231_vm4, %v5050_v16, 0.0  ;;  %v204_v45 = vld [vmem:[%s13270_s0 + $0x570] sm:$0xff] }
 0x15d   :  { %v5356_v5 = vsel %vm5231_vm4, %v4779_v52, 0.0  ;;  %v2471_v6 = vadd.f32 %v10719_v19, %v2470_v1  ;;  %8560 = vmatprep.mubr.msk.f32.mxu0 %vm553_vm1, %v200_v47  ;;  %v5941_v41 = vsel %vm5231_vm4, %v5049_v17, 0.0  ;;  %v5940_v47 = vadd.f32 %v5939_v2, %v5938_v35  ;;  %v476_v2 = vld [vmem:[%s13270_s0 + $0xdf0] sm:$0xff]  ;;  %v207_v35 = vld [vmem:[%s13270_s0 + $0x588] sm:$0xff] }
 0x15e   :  { %v5357_v12 = vadd.f32 %v5356_v5, %v5355_v63  ;;  %v4782_v14 = vmax.f32 %v2476_v53, 0.0  ;;  %v8811_v42 = vpop.f32.mrb[60].mxu1  ;;  %v5051_v54 = vmax.f32 %v3821_v26, 0.0  ;;  %v3836_v55 = vadd.f32 %v10719_v19, %v8808_v11  ;;  %v206_v11 = vld [vmem:[%s13270_s0 + $0x580] sm:$0xff] }
 0x15f   :  { %v4781_v22 = vmax.f32 %v2471_v6, 0.0  ;;  %v8403_v24 = vpop.f32.mrb[64].mxu0  ;;  %v3840_v50 = vpop.f32.mrb[61].mxu1  ;;  %8969 = vmatmul.mubr.msk.f32.gmra.mrb[166].mxu1 %vm553_vm1, %v473_v28  ;;  %v3831_v56 = vadd.f32 %v10719_v19, %v3830_v20  ;;  %v5942_v1 = vadd.f32 %v5941_v41, %v5940_v47  ;;  %v205_v6 = vld [vmem:[%s13270_s0 + $0x578] sm:$0xff]  ;;  %v5947_v20 = vsel %vm5231_vm4, %v5052_v48, 0.0 }
 0x160   :  { %v5362_v29 = vsel %vm5231_vm4, %v4782_v14, 0.0  ;;  %v5359_v31 = vadd.f32 %v5358_v62, %v5357_v12  ;;  %v2486_v32 = vadd.f32 %v10719_v19, %v8403_v24  ;;  %v2480_v34 = vpop.f32.mrb[65].mxu0  ;;  %8561 = vmatmul.mubr.msk.f32.gmra.mrb[170].mxu0 %vm553_vm1, %v201_v7  ;;  %8971 = vmatprep.mubr.msk.f32.mxu1 %vm553_vm1, %v474_v36  ;;  %v5945_v7 = vsel %vm5231_vm4, %v5051_v54, 0.0  ;;  %v477_v24 = vld [vmem:[%s13270_s0 + $0xdf8] sm:$0xff] }
 0x161   :  { %v5360_v37 = vsel %vm5231_vm4, %v4781_v22, 0.0  ;;  %v2481_v38 = vadd.f32 %v10719_v19, %v2480_v34  ;;  %8563 = vmatprep.mubr.msk.f32.mxu0 %vm553_vm1, %v202_v15  ;;  %v5944_v12 = vadd.f32 %v5943_v40, %v5942_v1  ;;  %v5053_v22 = vmax.f32 %v3831_v56, 0.0 }
 0x162   :  { %v5361_v43 = vadd.f32 %v5360_v37, %v5359_v31  ;;  %v4784_v44 = vmax.f32 %v2486_v32, 0.0  ;;  %v8814_v8 = vpop.f32.mrb[62].mxu1  ;;  %v5054_v28 = vmax.f32 %v3836_v55, 0.0  ;;  %v478_v31 = vld [vmem:[%s13270_s0 + $0xe00] sm:$0xff]  ;;  %v3841_v47 = vadd.f32 %v10719_v19, %v3840_v50  ;;  %v480_v50 = vld [vmem:[%s13270_s0 + $0xe10] sm:$0xff] }
 0x163   :  { %v4783_v51 = vmax.f32 %v2481_v38, 0.0  ;;  %v8406_v52 = vpop.f32.mrb[66].mxu0  ;;  %v3850_v14 = vpop.f32.mrb[63].mxu1  ;;  %8972 = vmatmul.mubr.msk.f32.gmra.mrb[168].mxu1 %vm553_vm1, %v475_v59  ;;  %v5946_v26 = vadd.f32 %v5945_v7, %v5944_v12  ;;  %v5949_v41 = vsel %vm5231_vm4, %v5053_v22, 0.0  ;;  %v3856_v48 = vadd.f32 %v10719_v19, %v8814_v8  ;;  %v210_v7 = vld [vmem:[%s13270_s0 + $0x5a0] sm:$0xff] }
 0x164   :  { %v11007_v60 = vadd.f32 %v5362_v29, %v5361_v43  ;;  %v5371_v62 = vsel %vm5231_vm4, %v4784_v44, 0.0  ;;  %v2496_v63 = vadd.f32 %v10719_v19, %v8406_v52  ;;  %v2490_v53 = vpop.f32.mrb[67].mxu0  ;;  %8564 = vmatmul.mubr.msk.f32.gmra.mrb[172].mxu0 %vm553_vm1, %v203_v39  ;;  %8974 = vmatprep.mubr.msk.f32.mxu1 %vm553_vm1, %v476_v2  ;;  %v3846_v29 = vadd.f32 %v10719_v19, %v8811_v42  ;;  %v208_v39 = vld [vmem:[%s13270_s0 + $0x590] sm:$0xff] }
 0x165   :  { %v5370_v4 = vsel %vm5231_vm4, %v4783_v51, 0.0  ;;  %v2491_v5 = vadd.f32 %v10719_v19, %v2490_v53  ;;  %8566 = vmatprep.mubr.msk.f32.mxu0 %vm553_vm1, %v204_v45  ;;  %v5948_v40 = vadd.f32 %v5947_v20, %v5946_v26  ;;  %v479_v51 = vld [vmem:[%s13270_s0 + $0xe08] sm:$0xff]  ;;  %v5951_v56 = vsel %vm5231_vm4, %v5054_v28, 0.0  ;;  %v209_v53 = vld [vmem:[%s13270_s0 + $0x598] sm:$0xff]  ;;  %v482_v26 = vld [vmem:[%s13270_s0 + $0xe20] sm:$0xff] }
 0x166   :  { %v5372_v9 = vadd.f32 %v5371_v62, %v5370_v4  ;;  %v4786_v15 = vmax.f32 %v2496_v63, 0.0  ;;  %v11043_v36 = vpop.f32.mrb[64].mxu1  ;;  %v5056_v59 = vmax.f32 %v3846_v29, 0.0  ;;  %v5055_v8 = vmax.f32 %v3841_v47, 0.0  ;;  %v481_v20 = vld [vmem:[%s13270_s0 + $0xe18] sm:$0xff] }
 0x167   :  { %v4785_v16 = vmax.f32 %v2491_v5, 0.0  ;;  %v8409_v17 = vpop.f32.mrb[68].mxu0  ;;  %v3860_v42 = vpop.f32.mrb[65].mxu1  ;;  %8975 = vmatmul.mubr.msk.f32.gmra.mrb[170].mxu1 %vm553_vm1, %v477_v24  ;;  %v5950_v1 = vadd.f32 %v5949_v41, %v5948_v40  ;;  %v3866_v47 = vadd.f32 %v10719_v19, %v11043_v36  ;;  %v484_v36 = vld [vmem:[%s13270_s0 + $0xe30] sm:$0xff] }
 0x168   :  { %v2506_v23 = vadd.f32 %v10719_v19, %v8409_v17  ;;  %v2500_v25 = vpop.f32.mrb[69].mxu0  ;;  %8567 = vmatmul.mubr.msk.f32.gmra.mrb[174].mxu0 %vm553_vm1, %v205_v6  ;;  %v5375_v43 = vsel %vm5231_vm4, %v4786_v15, 0.0  ;;  %8977 = vmatprep.mubr.msk.f32.mxu1 %vm553_vm1, %v478_v31  ;;  %v3851_v17 = vadd.f32 %v10719_v19, %v3850_v14  ;;  %v211_v31 = vld [vmem:[%s13270_s0 + $0x5a8] sm:$0xff] }
 0x169   :  { %v5373_v32 = vsel %vm5231_vm4, %v4785_v16, 0.0  ;;  %v2501_v34 = vadd.f32 %v10719_v19, %v2500_v25  ;;  %8569 = vmatprep.mubr.msk.f32.mxu0 %vm553_vm1, %v206_v11  ;;  %v5952_v15 = vadd.f32 %v5951_v56, %v5950_v1  ;;  %v5058_v16 = vmax.f32 %v3856_v48, 0.0 }
 0x16a   :  { %v5374_v37 = vadd.f32 %v5373_v32, %v5372_v9  ;;  %v4788_v38 = vmax.f32 %v2506_v23, 0.0  ;;  %v11069_v2 = vpop.f32.mrb[66].mxu1  ;;  %v5955_v25 = vsel %vm5231_vm4, %v5056_v59, 0.0  ;;  %v5953_v32 = vsel %vm5231_vm4, %v5055_v8, 0.0 }
 0x16b   :  { %v4787_v44 = vmax.f32 %v2501_v34, 0.0  ;;  %v8412_v45 = vpop.f32.mrb[70].mxu0  ;;  %v3870_v9 = vpop.f32.mrb[67].mxu1  ;;  %8978 = vmatmul.mubr.msk.f32.gmra.mrb[172].mxu1 %vm553_vm1, %v479_v51  ;;  %v5959_v40 = vsel %vm5231_vm4, %v5058_v16, 0.0  ;;  %v3861_v48 = vadd.f32 %v10719_v19, %v3860_v42  ;;  %v483_v51 = vld [vmem:[%s13270_s0 + $0xe28] sm:$0xff] }
 0x16c   :  { %v5376_v52 = vadd.f32 %v5375_v43, %v5374_v37  ;;  %v2516_v54 = vadd.f32 %v10719_v19, %v8412_v45  ;;  %v2510_v55 = vpop.f32.mrb[71].mxu0  ;;  %8570 = vmatmul.mubr.msk.f32.gmra.mrb[176].mxu0 %vm553_vm1, %v207_v35  ;;  %v5379_v4 = vsel %vm5231_vm4, %v4788_v38, 0.0  ;;  %8980 = vmatprep.mubr.msk.f32.mxu1 %vm553_vm1, %v480_v50  ;;  %v212_v38 = vld [vmem:[%s13270_s0 + $0x5b0] sm:$0xff]  ;;  %v5057_v45 = vmax.f32 %v3851_v17, 0.0 }
 0x16d   :  { %v5377_v62 = vsel %vm5231_vm4, %v4787_v44, 0.0  ;;  %v2511_v63 = vadd.f32 %v10719_v19, %v2510_v55  ;;  %8572 = vmatprep.mubr.msk.f32.mxu0 %vm553_vm1, %v208_v39  ;;  %v5954_v39 = vadd.f32 %v5953_v32, %v5952_v15  ;;  %v5059_v8 = vmax.f32 %v3861_v48, 0.0 }
 0x16e   :  { %v5378_v5 = vadd.f32 %v5377_v62, %v5376_v52  ;;  %v4790_v6 = vmax.f32 %v2516_v54, 0.0  ;;  %v11095_v34 = vpop.f32.mrb[68].mxu1  ;;  %v213_v62 = vld [vmem:[%s13270_s0 + $0x5b8] sm:$0xff]  ;;  %v3876_v17 = vadd.f32 %v10719_v19, %v11069_v2  ;;  %v486_v2 = vld [vmem:[%s13270_s0 + $0xe40] sm:$0xff] }
 0x16f   :  { %v4789_v11 = vmax.f32 %v2511_v63, 0.0  ;;  %v8415_v12 = vpop.f32.mrb[72].mxu0  ;;  %v3880_v41 = vpop.f32.mrb[69].mxu1  ;;  %8981 = vmatmul.mubr.msk.f32.gmra.mrb[174].mxu1 %vm553_vm1, %v481_v20  ;;  %v5956_v59 = vadd.f32 %v5955_v25, %v5954_v39  ;;  %v5957_v63 = vsel %vm5231_vm4, %v5057_v45, 0.0  ;;  %v3871_v20 = vadd.f32 %v10719_v19, %v3870_v9  ;;  %v216_v39 = vld [vmem:[%s13270_s0 + $0x5d0] sm:$0xff] }
 0x170   :  { %v5380_v22 = vadd.f32 %v5379_v4, %v5378_v5  ;;  %v2526_v24 = vadd.f32 %v10719_v19, %v8415_v12  ;;  %v2520_v23 = vpop.f32.mrb[73].mxu0  ;;  %8573 = vmatmul.mubr.msk.f32.gmra.mrb[178].mxu0 %vm553_vm1, %v209_v53  ;;  %v5383_v14 = vsel %vm5231_vm4, %v4790_v6, 0.0  ;;  %8983 = vmatprep.mubr.msk.f32.mxu1 %vm553_vm1, %v482_v26  ;;  %v5060_v53 = vmax.f32 %v3866_v47, 0.0  ;;  %v214_v6 = vld [vmem:[%s13270_s0 + $0x5c0] sm:$0xff] }
 0x171   :  { %v5381_v28 = vsel %vm5231_vm4, %v4789_v11, 0.0  ;;  %v2521_v29 = vadd.f32 %v10719_v19, %v2520_v23  ;;  %8575 = vmatprep.mubr.msk.f32.mxu0 %vm553_vm1, %v210_v7  ;;  %v5958_v7 = vadd.f32 %v5957_v63, %v5956_v59  ;;  %v5062_v32 = vmax.f32 %v3876_v17, 0.0 }
 0x172   :  { %v5382_v35 = vadd.f32 %v5381_v28, %v5380_v22  ;;  %v4792_v37 = vmax.f32 %v2526_v24, 0.0  ;;  %v11122_v1 = vpop.f32.mrb[70].mxu1  ;;  %v5963_v16 = vsel %vm5231_vm4, %v5060_v53, 0.0  ;;  %v485_v22 = vld [vmem:[%s13270_s0 + $0xe38] sm:$0xff] }
 0x173   :  { %v4791_v43 = vmax.f32 %v2521_v29, 0.0  ;;  %v8418_v44 = vpop.f32.mrb[74].mxu0  ;;  %v11127_v11 = vpop.f32.mrb[71].mxu1  ;;  %8984 = vmatmul.mubr.msk.f32.gmra.mrb[176].mxu1 %vm553_vm1, %v483_v51  ;;  %v215_v29 = vld [vmem:[%s13270_s0 + $0x5c8] sm:$0xff]  ;;  %v5967_v48 = vsel %vm5231_vm4, %v5062_v32, 0.0  ;;  %v3886_v51 = vadd.f32 %v10719_v19, %v11095_v34  ;;  %v488_v34 = vld [vmem:[%s13270_s0 + $0xe50] sm:$0xff] }
 0x174   :  { %v5387_v52 = vsel %vm5231_vm4, %v4792_v37, 0.0  ;;  %v5384_v54 = vadd.f32 %v5383_v14, %v5382_v35  ;;  %v2536_v55 = vadd.f32 %v10719_v19, %v8418_v44  ;;  %v2530_v56 = vpop.f32.mrb[75].mxu0  ;;  %8576 = vmatmul.mubr.msk.f32.gmra.mrb[180].mxu0 %vm553_vm1, %v211_v31  ;;  %8986 = vmatprep.mubr.msk.f32.mxu1 %vm553_vm1, %v484_v36  ;;  %v5960_v14 = vadd.f32 %v5959_v40, %v5958_v7  ;;  %v218_v7 = vld [vmem:[%s13270_s0 + $0x5e0] sm:$0xff] }
 0x175   :  { %v5385_v42 = vsel %vm5231_vm4, %v4791_v43, 0.0  ;;  %v2531_v50 = vadd.f32 %v10719_v19, %v2530_v56  ;;  %8578 = vmatprep.mubr.msk.f32.mxu0 %vm553_vm1, %v212_v38  ;;  %v5961_v31 = vsel %vm5231_vm4, %v5059_v8, 0.0  ;;  %v5061_v43 = vmax.f32 %v3871_v20, 0.0  ;;  %v11192_v20 = vld [vmem:[%s13272_s2] ss:$0 sm:$0xff] }
 0x176   :  { %v5386_v4 = vadd.f32 %v5385_v42, %v5384_v54  ;;  %v4794_v5 = vmax.f32 %v2536_v55, 0.0  ;;  %v11151_v35 = vpop.f32.mrb[72].mxu1  ;;  %v5962_v40 = vadd.f32 %v5961_v31, %v5960_v14  ;;  %v487_v54 = vld [vmem:[%s13270_s0 + $0xe48] sm:$0xff]  ;;  %v5064_v53 = vmax.f32 %v3886_v51, 0.0 }
 0x177   :  { %v4793_v12 = vmax.f32 %v2531_v50, 0.0  ;;  %v8421_v15 = vpop.f32.mrb[76].mxu0  ;;  %v11156_v44 = vpop.f32.mrb[73].mxu1  ;;  %8987 = vmatmul.mubr.msk.f32.gmra.mrb[178].mxu1 %vm553_vm1, %v485_v22  ;;  %v5965_v63 = vsel %vm5231_vm4, %v5061_v43, 0.0  ;;  %v3896_v22 = vadd.f32 %v11192_v20, %v11122_v1  ;;  %v490_v1 = vld [vmem:[%s13270_s0 + $0xe60] sm:$0xff] }
 0x178   :  { %v5391_v24 = vsel %vm5231_vm4, %v4794_v5, 0.0  ;;  %v5388_v23 = vadd.f32 %v5387_v52, %v5386_v4  ;;  %v2546_v25 = vadd.f32 %v10719_v19, %v8421_v15  ;;  %v2540_v26 = vpop.f32.mrb[77].mxu0  ;;  %8579 = vmatmul.mubr.msk.f32.gmra.mrb[182].mxu0 %vm553_vm1, %v213_v62  ;;  %v3881_v52 = vadd.f32 %v10719_v19, %v3880_v41  ;;  %8989 = vmatprep.mubr.msk.f32.mxu1 %vm553_vm1, %v486_v2  ;;  %v217_v62 = vld [vmem:[%s13270_s0 + $0x5d8] sm:$0xff] }
 0x179   :  { %v5389_v9 = vsel %vm5231_vm4, %v4793_v12, 0.0  ;;  %v2541_v28 = vadd.f32 %v10719_v19, %v2540_v26  ;;  %8581 = vmatprep.mubr.msk.f32.mxu0 %vm553_vm1, %v214_v6  ;;  %v5964_v42 = vadd.f32 %v5963_v16, %v5962_v40  ;;  %v5971_v17 = vsel %vm5231_vm4, %v5064_v53, 0.0  ;;  %v220_v40 = vld [vmem:[%s13270_s0 + $0x5f0] sm:$0xff] }
 0x17a   :  { %v5390_v37 = vadd.f32 %v5389_v9, %v5388_v23  ;;  %v4796_v38 = vmax.f32 %v2546_v25, 0.0  ;;  %v11180_v4 = vpop.f32.mrb[74].mxu1  ;;  %v5063_v12 = vmax.f32 %v3881_v52, 0.0  ;;  %v489_v23 = vld [vmem:[%s13270_s0 + $0xe58] sm:$0xff]  ;;  %v5066_v32 = vmax.f32 %v3896_v22, 0.0 }
 0x17b   :  { %v4795_v45 = vmax.f32 %v2541_v28, 0.0  ;;  %v8424_v47 = vpop.f32.mrb[78].mxu0  ;;  %v5966_v8 = vadd.f32 %v5965_v63, %v5964_v42  ;;  %8990 = vmatmul.mubr.msk.f32.gmra.mrb[180].mxu1 %vm553_vm1, %v487_v54  ;;  %v3906_v54 = vadd.f32 %v11192_v20, %v11151_v35  ;;  %v492_v35 = vld [vmem:[%s13270_s0 + $0xe70] sm:$0xff] }
 0x17c   :  { %v5395_v55 = vsel %vm5231_vm4, %v4796_v38, 0.0  ;;  %v5392_v56 = vadd.f32 %v5391_v24, %v5390_v37  ;;  %v2556_v59 = vadd.f32 %v10719_v19, %v8424_v47  ;;  %v2550_v36 = vpop.f32.mrb[79].mxu0  ;;  %8582 = vmatmul.mubr.msk.f32.gmra.mrb[184].mxu0 %vm553_vm1, %v215_v29  ;;  %v3891_v24 = vadd.f32 %v11192_v20, %v11127_v11  ;;  %8992 = vmatprep.mubr.msk.f32.mxu1 %vm553_vm1, %v488_v34  ;;  %v219_v29 = vld [vmem:[%s13270_s0 + $0x5e8] sm:$0xff] }
 0x17d   :  { %v5393_v41 = vsel %vm5231_vm4, %v4795_v45, 0.0  ;;  %v2551_v50 = vadd.f32 %v10719_v19, %v2550_v36  ;;  %8584 = vmatprep.mubr.msk.f32.mxu0 %vm553_vm1, %v216_v39  ;;  %v11185_v19 = vpop.f32.mrb[75].mxu1  ;;  %v5968_v9 = vadd.f32 %v5967_v48, %v5966_v8  ;;  %v5969_v31 = vsel %vm5231_vm4, %v5063_v12, 0.0  ;;  %v222_v8 = vld [vmem:[%s13270_s0 + $0x600] sm:$0xff] }
 0x17e   :  { %v5394_v5 = vadd.f32 %v5393_v41, %v5392_v56  ;;  %v4798_v6 = vmax.f32 %v2556_v59, 0.0  ;;  %v11215_v37 = vpop.f32.mrb[76].mxu1  ;;  %v5065_v45 = vmax.f32 %v3891_v24, 0.0  ;;  %v5975_v52 = vsel %vm5231_vm4, %v5066_v32, 0.0  ;;  %v491_v56 = vld [vmem:[%s13270_s0 + $0xe68] sm:$0xff] }
 0x17f   :  { %v4797_v15 = vmax.f32 %v2551_v50, 0.0  ;;  %v8427_v16 = vpop.f32.mrb[80].mxu0  ;;  %v5970_v43 = vadd.f32 %v5969_v31, %v5968_v9  ;;  %8993 = vmatmul.mubr.msk.f32.gmra.mrb[182].mxu1 %vm553_vm1, %v489_v23  ;;  %v3920_v47 = vpop.f32.mrb[77].mxu1  ;;  %v5068_v53 = vmax.f32 %v3906_v54, 0.0  ;;  %v3916_v23 = vadd.f32 %v11192_v20, %v11180_v4  ;;  %v494_v4 = vld [vmem:[%s13270_s0 + $0xe80] sm:$0xff] }
 0x180   :  { %v5399_v25 = vsel %vm5231_vm4, %v4798_v6, 0.0  ;;  %v5396_v26 = vadd.f32 %v5395_v55, %v5394_v5  ;;  %v2566_v14 = vadd.f32 %v11192_v20, %v8427_v16  ;;  %v2560_v2 = vpop.f32.mrb[81].mxu0  ;;  %8585 = vmatmul.mubr.msk.f32.gmra.mrb[186].mxu0 %vm553_vm1, %v217_v62  ;;  %v3901_v55 = vadd.f32 %v11192_v20, %v11156_v44  ;;  %8995 = vmatprep.mubr.msk.f32.mxu1 %vm553_vm1, %v490_v1  ;;  %v221_v62 = vld [vmem:[%s13270_s0 + $0x5f8] sm:$0xff] }
 0x181   :  { %v5397_v11 = vsel %vm5231_vm4, %v4797_v15, 0.0  ;;  %v2561_v28 = vadd.f32 %v11192_v20, %v2560_v2  ;;  %8587 = vmatprep.mubr.msk.f32.mxu0 %vm553_vm1, %v218_v7  ;;  %v5972_v41 = vadd.f32 %v5971_v17, %v5970_v43  ;;  %v5973_v63 = vsel %vm5231_vm4, %v5065_v45, 0.0  ;;  %v224_v43 = vld [vmem:[%s13270_s0 + $0x610] sm:$0xff] }
 0x182   :  { %v5398_v38 = vadd.f32 %v5397_v11, %v5396_v26  ;;  %v4800_v39 = vmax.f32 %v2566_v14, 0.0  ;;  %v11243_v5 = vpop.f32.mrb[78].mxu1  ;;  %v5067_v15 = vmax.f32 %v3901_v55, 0.0  ;;  %v5979_v24 = vsel %vm5231_vm4, %v5068_v53, 0.0  ;;  %v493_v26 = vld [vmem:[%s13270_s0 + $0xe78] sm:$0xff] }
 0x183   :  { %v4799_v48 = vmax.f32 %v2561_v28, 0.0  ;;  %v8430_v51 = vpop.f32.mrb[82].mxu0  ;;  %v5974_v12 = vadd.f32 %v5973_v63, %v5972_v41  ;;  %v3930_v16 = vpop.f32.mrb[79].mxu1  ;;  %8996 = vmatmul.mubr.msk.f32.gmra.mrb[184].mxu1 %vm553_vm1, %v491_v56  ;;  %v5070_v32 = vmax.f32 %v3916_v23, 0.0  ;;  %v3926_v56 = vadd.f32 %v11192_v20, %v11215_v37  ;;  %v496_v37 = vld [vmem:[%s13270_s0 + $0xe90] sm:$0xff] }
 0x184   :  { %v5403_v59 = vsel %vm5231_vm4, %v4800_v39, 0.0  ;;  %v5400_v36 = vadd.f32 %v5399_v25, %v5398_v38  ;;  %v2576_v42 = vadd.f32 %v11192_v20, %v8430_v51  ;;  %v2570_v34 = vpop.f32.mrb[83].mxu0  ;;  %8588 = vmatmul.mubr.msk.f32.gmra.mrb[188].mxu0 %vm553_vm1, %v219_v29  ;;  %v3911_v25 = vadd.f32 %v11192_v20, %v11185_v19  ;;  %8998 = vmatprep.mubr.msk.f32.mxu1 %vm553_vm1, %v492_v35  ;;  %v223_v29 = vld [vmem:[%s13270_s0 + $0x608] sm:$0xff] }
 0x185   :  { %v5401_v44 = vsel %vm5231_vm4, %v4799_v48, 0.0  ;;  %v2571_v50 = vadd.f32 %v11192_v20, %v2570_v34  ;;  %8590 = vmatprep.mubr.msk.f32.mxu0 %vm553_vm1, %v220_v40  ;;  %v5976_v11 = vadd.f32 %v5975_v52, %v5974_v12  ;;  %v5977_v31 = vsel %vm5231_vm4, %v5067_v15, 0.0  ;;  %v226_v12 = vld [vmem:[%s13270_s0 + $0x620] sm:$0xff] }
 0x186   :  { %v5402_v6 = vadd.f32 %v5401_v44, %v5400_v36  ;;  %v4802_v7 = vmax.f32 %v2576_v42, 0.0  ;;  %v11271_v38 = vpop.f32.mrb[80].mxu1  ;;  %v5069_v48 = vmax.f32 %v3911_v25, 0.0  ;;  %v5983_v55 = vsel %vm5231_vm4, %v5070_v32, 0.0  ;;  %v495_v36 = vld [vmem:[%s13270_s0 + $0xe88] sm:$0xff] }
 0x187   :  { %v4801_v17 = vmax.f32 %v2571_v50, 0.0  ;;  %v8433_v22 = vpop.f32.mrb[84].mxu0  ;;  %v5978_v45 = vadd.f32 %v5977_v31, %v5976_v11  ;;  %v11276_v51 = vpop.f32.mrb[81].mxu1  ;;  %8999 = vmatmul.mubr.msk.f32.gmra.mrb[186].mxu1 %vm553_vm1, %v493_v26  ;;  %v5072_v53 = vmax.f32 %v3926_v56, 0.0  ;;  %v3936_v26 = vadd.f32 %v11192_v20, %v11243_v5  ;;  %v498_v5 = vld [vmem:[%s13270_s0 + $0xea0] sm:$0xff] }
 0x188   :  { %v5407_v14 = vsel %vm5231_vm4, %v4802_v7, 0.0  ;;  %v5404_v2 = vadd.f32 %v5403_v59, %v5402_v6  ;;  %v2586_v9 = vadd.f32 %v11192_v20, %v8433_v22  ;;  %v2580_v1 = vpop.f32.mrb[85].mxu0  ;;  %8591 = vmatmul.mubr.msk.f32.gmra.mrb[190].mxu0 %vm553_vm1, %v221_v62  ;;  %v3921_v59 = vadd.f32 %v11192_v20, %v3920_v47  ;;  %9001 = vmatprep.mubr.msk.f32.mxu1 %vm553_vm1, %v494_v4  ;;  %v225_v62 = vld [vmem:[%s13270_s0 + $0x618] sm:$0xff] }
 0x189   :  { %v5405_v19 = vsel %vm5231_vm4, %v4801_v17, 0.0  ;;  %v2581_v28 = vadd.f32 %v11192_v20, %v2580_v1  ;;  %8593 = vmatprep.mubr.msk.f32.mxu0 %vm553_vm1, %v222_v8  ;;  %v5980_v44 = vadd.f32 %v5979_v24, %v5978_v45  ;;  %v5981_v63 = vsel %vm5231_vm4, %v5069_v48, 0.0 }
 0x18a   :  { %v5406_v39 = vadd.f32 %v5405_v19, %v5404_v2  ;;  %v4804_v40 = vmax.f32 %v2586_v9, 0.0  ;;  %v11300_v6 = vpop.f32.mrb[82].mxu1  ;;  %v5071_v17 = vmax.f32 %v3921_v59, 0.0  ;;  %v5992_v25 = vsel %vm5231_vm4, %v5072_v53, 0.0  ;;  %v497_v2 = vld [vmem:[%s13270_s0 + $0xe98] sm:$0xff]  ;;  %v499_v59 = vld [vmem:[%s13270_s0 + $0xea8] sm:$0xff] }
 0x18b   :  { %v4803_v52 = vmax.f32 %v2581_v28, 0.0  ;;  %v8436_v54 = vpop.f32.mrb[86].mxu0  ;;  %v5982_v15 = vadd.f32 %v5981_v63, %v5980_v44  ;;  %v11305_v22 = vpop.f32.mrb[83].mxu1  ;;  %9002 = vmatmul.mubr.msk.f32.gmra.mrb[188].mxu1 %vm553_vm1, %v495_v36  ;;  %v227_v28 = vld [vmem:[%s13270_s0 + $0x628] sm:$0xff]  ;;  %v230_v53 = vld [vmem:[%s13270_s0 + $0x640] sm:$0xff] }
 0x18c   :  { %v5411_v42 = vsel %vm5231_vm4, %v4804_v40, 0.0  ;;  %v5408_v34 = vadd.f32 %v5407_v14, %v5406_v39  ;;  %v2596_v41 = vadd.f32 %v11192_v20, %v8436_v54  ;;  %v2590_v35 = vpop.f32.mrb[87].mxu0  ;;  %8594 = vmatmul.mubr.msk.f32.gmra.mrb[192].mxu0 %vm553_vm1, %v223_v29  ;;  %v3931_v14 = vadd.f32 %v11192_v20, %v3930_v16  ;;  %9004 = vmatprep.mubr.msk.f32.mxu1 %vm553_vm1, %v496_v37  ;;  %v228_v39 = vld [vmem:[%s13270_s0 + $0x630] sm:$0xff] }
 0x18d   :  { %v5409_v47 = vsel %vm5231_vm4, %v4803_v52, 0.0  ;;  %v2591_v50 = vadd.f32 %v11192_v20, %v2590_v35  ;;  %8596 = vmatprep.mubr.msk.f32.mxu0 %vm553_vm1, %v224_v43  ;;  %v11318_v4 = vadd.f32 %v5983_v55, %v5982_v15  ;;  %v5991_v29 = vsel %vm5231_vm4, %v5071_v17, 0.0  ;;  %v500_v35 = vld [vmem:[%s13270_s0 + $0xeb0] sm:$0xff] }
 0x18e   :  { %v5410_v7 = vadd.f32 %v5409_v47, %v5408_v34  ;;  %v4806_v8 = vmax.f32 %v2596_v41, 0.0  ;;  %v11330_v31 = vpop.f32.mrb[84].mxu1  ;;  %v5993_v40 = vadd.f32 %v5992_v25, %v5991_v29  ;;  %v5074_v43 = vmax.f32 %v3936_v26, 0.0  ;;  %v229_v47 = vld [vmem:[%s13270_s0 + $0x638] sm:$0xff] }
 0x18f   :  { %v4805_v24 = vmax.f32 %v2591_v50, 0.0  ;;  %v8439_v23 = vpop.f32.mrb[88].mxu0  ;;  %13285 = vst [vmem:[#allocation6_spill] sm:$0xff] %v11318_v4  ;;  %v11335_v45 = vpop.f32.mrb[85].mxu1  ;;  %9005 = vmatmul.mubr.msk.f32.gmra.mrb[190].mxu1 %vm553_vm1, %v497_v2  ;;  %v5073_v56 = vmax.f32 %v3931_v14, 0.0  ;;  %v3946_v41 = vadd.f32 %v11192_v20, %v11271_v38  ;;  %v501_v25 = vld [vmem:[%s13270_s0 + $0xeb8] sm:$0xff] }
 0x190   :  { %v5412_v9 = vadd.f32 %v5411_v42, %v5410_v7  ;;  %v2606_v1 = vadd.f32 %v11192_v20, %v8439_v23  ;;  %v2600_v11 = vpop.f32.mrb[89].mxu0  ;;  %8597 = vmatmul.mubr.msk.f32.gmra.mrb[194].mxu0 %vm553_vm1, %v225_v62  ;;  %v5415_v48 = vsel %vm5231_vm4, %v4806_v8, 0.0  ;;  %9007 = vmatprep.mubr.msk.f32.mxu1 %vm553_vm1, %v498_v5  ;;  %v5996_v7 = vsel %vm5231_vm4, %v5074_v43, 0.0 }
 0x191   :  { %v5413_v16 = vsel %vm5231_vm4, %v4805_v24, 0.0  ;;  %v2601_v19 = vadd.f32 %v11192_v20, %v2600_v11  ;;  %8599 = vmatprep.mubr.msk.f32.mxu0 %vm553_vm1, %v226_v12  ;;  %v5994_v50 = vsel %vm5231_vm4, %v5073_v56, 0.0  ;;  %v3941_v23 = vadd.f32 %v11192_v20, %v11276_v51  ;;  %v502_v51 = vld [vmem:[%s13270_s0 + $0xec0] sm:$0xff] }
 0x192   :  { %v5414_v32 = vadd.f32 %v5413_v16, %v5412_v9  ;;  %v4808_v52 = vmax.f32 %v2606_v1, 0.0  ;;  %v11357_v62 = vpop.f32.mrb[86].mxu1  ;;  %v5995_v8 = vadd.f32 %v5994_v50, %v5993_v40  ;;  %v5076_v9 = vmax.f32 %v3946_v41, 0.0  ;;  %v231_v16 = vld [vmem:[%s13270_s0 + $0x648] sm:$0xff]  ;;  %v232_v40 = vld [vmem:[%s13270_s0 + $0x650] sm:$0xff] }
 0x193   :  { %v4807_v54 = vmax.f32 %v2601_v19, 0.0  ;;  %v8442_v55 = vpop.f32.mrb[90].mxu0  ;;  %v11363_v12 = vpop.f32.mrb[87].mxu1  ;;  %9008 = vmatmul.mubr.msk.f32.gmra.mrb[192].mxu1 %vm553_vm1, %v499_v59  ;;  %v3956_v1 = vadd.f32 %v11192_v20, %v11300_v6  ;;  %v5075_v19 = vmax.f32 %v3941_v23, 0.0  ;;  %v3966_v56 = vadd.f32 %v11192_v20, %v11330_v31  ;;  %v503_v59 = vld [vmem:[%s13270_s0 + $0xec8] sm:$0xff] }
 0x194   :  { %v5416_v36 = vadd.f32 %v5415_v48, %v5414_v32  ;;  %v2616_v42 = vadd.f32 %v11192_v20, %v8442_v55  ;;  %v2610_v34 = vpop.f32.mrb[91].mxu0  ;;  %8600 = vmatmul.mubr.msk.f32.gmra.mrb[196].mxu0 %vm553_vm1, %v227_v28  ;;  %v5419_v15 = vsel %vm5231_vm4, %v4808_v52, 0.0  ;;  %9010 = vmatprep.mubr.msk.f32.mxu1 %vm553_vm1, %v500_v35  ;;  %v5997_v28 = vadd.f32 %v5996_v7, %v5995_v8  ;;  %v234_v7 = vld [vmem:[%s13270_s0 + $0x660] sm:$0xff] }
 0x195   :  { %v5417_v44 = vsel %vm5231_vm4, %v4807_v54, 0.0  ;;  %v2611_v37 = vadd.f32 %v11192_v20, %v2610_v34  ;;  %8602 = vmatprep.mubr.msk.f32.mxu0 %vm553_vm1, %v228_v39  ;;  %v5998_v54 = vsel %vm5231_vm4, %v5075_v19, 0.0  ;;  %v3951_v55 = vadd.f32 %v11192_v20, %v11305_v22  ;;  %v504_v22 = vld [vmem:[%s13270_s0 + $0xed0] sm:$0xff] }
 0x196   :  { %v5418_v63 = vadd.f32 %v5417_v44, %v5416_v36  ;;  %v4810_v38 = vmax.f32 %v2616_v42, 0.0  ;;  %v11386_v29 = vpop.f32.mrb[88].mxu1  ;;  %v6000_v41 = vsel %vm5231_vm4, %v5076_v9, 0.0  ;;  %v5078_v35 = vmax.f32 %v3956_v1, 0.0 }
 0x197   :  { %v4809_v17 = vmax.f32 %v2611_v37, 0.0  ;;  %v8445_v24 = vpop.f32.mrb[92].mxu0  ;;  %v11392_v43 = vpop.f32.mrb[89].mxu1  ;;  %9011 = vmatmul.mubr.msk.f32.gmra.mrb[194].mxu1 %vm553_vm1, %v501_v25  ;;  %v233_v37 = vld [vmem:[%s13270_s0 + $0x658] sm:$0xff]  ;;  %v5077_v8 = vmax.f32 %v3951_v55, 0.0  ;;  %v5080_v25 = vmax.f32 %v3966_v56, 0.0 }
 0x198   :  { %v5420_v26 = vadd.f32 %v5419_v15, %v5418_v63  ;;  %v2626_v14 = vadd.f32 %v11192_v20, %v8445_v24  ;;  %v2620_v2 = vpop.f32.mrb[93].mxu0  ;;  %8603 = vmatmul.mubr.msk.f32.gmra.mrb[198].mxu0 %vm553_vm1, %v229_v47  ;;  %v5423_v6 = vsel %vm5231_vm4, %v4810_v38, 0.0  ;;  %9013 = vmatprep.mubr.msk.f32.mxu1 %vm553_vm1, %v502_v51  ;;  %v5999_v47 = vadd.f32 %v5998_v54, %v5997_v28  ;;  %v235_v28 = vld [vmem:[%s13270_s0 + $0x668] sm:$0xff] }
 0x199   :  { %v5421_v11 = vsel %vm5231_vm4, %v4809_v17, 0.0  ;;  %v2621_v5 = vadd.f32 %v11192_v20, %v2620_v2  ;;  %8605 = vmatprep.mubr.msk.f32.mxu0 %vm553_vm1, %v230_v53  ;;  %v6004_v51 = vsel %vm5231_vm4, %v5078_v35, 0.0  ;;  %v3976_v54 = vadd.f32 %v11192_v20, %v11357_v62 }
 0x19a   :  { %v5422_v32 = vadd.f32 %v5421_v11, %v5420_v26  ;;  %v4812_v39 = vmax.f32 %v2626_v14, 0.0  ;;  %v11416_v50 = vpop.f32.mrb[90].mxu1  ;;  %v6001_v23 = vadd.f32 %v6000_v41, %v5999_v47  ;;  %v3961_v26 = vadd.f32 %v11192_v20, %v11335_v45  ;;  %v505_v14 = vld [vmem:[%s13270_s0 + $0xed8] sm:$0xff]  ;;  %v506_v45 = vld [vmem:[%s13270_s0 + $0xee0] sm:$0xff]  ;;  %v507_v41 = vld [vmem:[%s13270_s0 + $0xee8] sm:$0xff] }
 0x19b   :  { %v4811_v48 = vmax.f32 %v2621_v5, 0.0  ;;  %v8448_v52 = vpop.f32.mrb[94].mxu0  ;;  %v11422_v15 = vpop.f32.mrb[91].mxu1  ;;  %9014 = vmatmul.mubr.msk.f32.gmra.mrb[196].mxu1 %vm553_vm1, %v503_v59  ;;  %v6002_v11 = vsel %vm5231_vm4, %v5077_v8, 0.0 }
 0x19c   :  { %v5424_v36 = vadd.f32 %v5423_v6, %v5422_v32  ;;  %v2636_v42 = vadd.f32 %v11192_v20, %v8448_v52  ;;  %v2630_v34 = vpop.f32.mrb[95].mxu0  ;;  %8606 = vmatmul.mubr.msk.f32.gmra.mrb[200].mxu0 %vm553_vm1, %v231_v16  ;;  %v5427_v63 = vsel %vm5231_vm4, %v4812_v39, 0.0  ;;  %9016 = vmatprep.mubr.msk.f32.mxu1 %vm553_vm1, %v504_v22  ;;  %v6003_v6 = vadd.f32 %v6002_v11, %v6001_v23 }
 0x19d   :  { %v5425_v31 = vsel %vm5231_vm4, %v4811_v48, 0.0  ;;  %v2631_v44 = vadd.f32 %v11192_v20, %v2630_v34  ;;  %8608 = vmatprep.mubr.msk.f32.mxu0 %vm553_vm1, %v232_v40  ;;  %v236_v48 = vld [vmem:[%s13270_s0 + $0x670] sm:$0xff]  ;;  %v5079_v52 = vmax.f32 %v3961_v26, 0.0  ;;  %v3971_v34 = vadd.f32 %v11192_v20, %v11363_v12 }
 0x19e   :  { %v5426_v38 = vadd.f32 %v5425_v31, %v5424_v36  ;;  %v4814_v53 = vmax.f32 %v2636_v42, 0.0  ;;  %v11445_v32 = vpop.f32.mrb[92].mxu1  ;;  %v6008_v36 = vsel %vm5231_vm4, %v5080_v25, 0.0  ;;  %v6005_v42 = vadd.f32 %v6004_v51, %v6003_v6  ;;  %v508_v12 = vld [vmem:[%s13270_s0 + $0xef0] sm:$0xff]  ;;  %v239_v6 = vld [vmem:[%s13270_s0 + $0x688] sm:$0xff] }
 0x19f   :  { %v4813_v17 = vmax.f32 %v2631_v44, 0.0  ;;  %v8451_v24 = vpop.f32.mrb[96].mxu0  ;;  %v11452_v55 = vpop.f32.mrb[93].mxu1  ;;  %9017 = vmatmul.mubr.msk.f32.gmra.mrb[198].mxu1 %vm553_vm1, %v505_v14  ;;  %v6006_v44 = vsel %vm5231_vm4, %v5079_v52, 0.0  ;;  %v5081_v23 = vmax.f32 %v3971_v34, 0.0 }
 0x1a0   :  { %v5428_v2 = vadd.f32 %v5427_v63, %v5426_v38  ;;  %v2646_v9 = vadd.f32 %v11192_v20, %v8451_v24  ;;  %v2640_v1 = vpop.f32.mrb[97].mxu0  ;;  %8609 = vmatmul.mubr.msk.f32.gmra.mrb[202].mxu0 %vm553_vm1, %v233_v37  ;;  %v5431_v5 = vsel %vm5231_vm4, %v4814_v53, 0.0  ;;  %9019 = vmatprep.mubr.msk.f32.mxu1 %vm553_vm1, %v506_v45  ;;  %v237_v63 = vld [vmem:[%s13270_s0 + $0x678] sm:$0xff]  ;;  %v6007_v38 = vadd.f32 %v6006_v44, %v6005_v42  ;;  %v238_v24 = vld [vmem:[%s13270_s0 + $0x680] sm:$0xff] }
 0x1a1   :  { %v5429_v16 = vsel %vm5231_vm4, %v4813_v17, 0.0  ;;  %v2641_v19 = vadd.f32 %v11192_v20, %v2640_v1  ;;  %8611 = vmatprep.mubr.msk.f32.mxu0 %vm553_vm1, %v234_v7  ;;  %v5082_v53 = vmax.f32 %v3976_v54, 0.0  ;;  %v6010_v45 = vsel %vm5231_vm4, %v5081_v23, 0.0  ;;  %v240_v54 = vld [vmem:[%s13270_s0 + $0x690] sm:$0xff] }
 0x1a2   :  { %v5430_v39 = vadd.f32 %v5429_v16, %v5428_v2  ;;  %v4816_v40 = vmax.f32 %v2646_v9, 0.0  ;;  %v11477_v7 = vpop.f32.mrb[94].mxu1  ;;  %v6009_v2 = vadd.f32 %v6008_v36, %v6007_v38  ;;  %v509_v9 = vld [vmem:[%s13270_s0 + $0xef8] sm:$0xff]  ;;  %v510_v16 = vld [vmem:[%s13270_s0 + $0xf00] sm:$0xff] }
 0x1a3   :  { %v4815_v56 = vmax.f32 %v2641_v19, 0.0  ;;  %v8454_v59 = vpop.f32.mrb[98].mxu0  ;;  %v11482_v25 = vpop.f32.mrb[95].mxu1  ;;  %9020 = vmatmul.mubr.msk.f32.gmra.mrb[200].mxu1 %vm553_vm1, %v507_v41  ;;  %v6012_v11 = vsel %vm5231_vm4, %v5082_v53, 0.0  ;;  %v3996_v41 = vadd.f32 %v11192_v20, %v11416_v50  ;;  %v512_v50 = vld [vmem:[%s13270_s0 + $0xf10] sm:$0xff] }
 0x1a4   :  { %v11462_v35 = vadd.f32 %v5431_v5, %v5430_v39  ;;  %v5440_v62 = vsel %vm5231_vm4, %v4816_v40, 0.0  ;;  %v2656_v22 = vadd.f32 %v11192_v20, %v8454_v59  ;;  %v2650_v31 = vpop.f32.mrb[99].mxu0  ;;  %8612 = vmatmul.mubr.msk.f32.gmra.mrb[204].mxu0 %vm553_vm1, %v235_v28  ;;  %9022 = vmatprep.mubr.msk.f32.mxu1 %vm553_vm1, %v508_v12  ;;  %v3986_v5 = vadd.f32 %v11192_v20, %v11386_v29 }
 0x1a5   :  { %v5439_v37 = vsel %vm5231_vm4, %v4815_v56, 0.0  ;;  %v2651_v47 = vadd.f32 %v11192_v20, %v2650_v31  ;;  %8614 = vmatprep.mubr.msk.f32.mxu0 %vm553_vm1, %v236_v48  ;;  %v6011_v39 = vadd.f32 %v6010_v45, %v6009_v2  ;;  %v3981_v56 = vadd.f32 %v11192_v20, %v11392_v43 }
 0x1a6   :  { %v5441_v8 = vadd.f32 %v5440_v62, %v5439_v37  ;;  %v4818_v17 = vmax.f32 %v2656_v22, 0.0  ;;  %v11504_v40 = vpop.f32.mrb[96].mxu1  ;;  %v3991_v62 = vadd.f32 %v11192_v20, %v11422_v15  ;;  %v511_v22 = vld [vmem:[%s13270_s0 + $0xf08] sm:$0xff]  ;;  %v5084_v12 = vmax.f32 %v3986_v5, 0.0 }
 0x1a7   :  { %v4817_v26 = vmax.f32 %v2651_v47, 0.0  ;;  %v8457_v14 = vpop.f32.mrb[100].mxu0  ;;  %v11512_v59 = vpop.f32.mrb[97].mxu1  ;;  %9023 = vmatmul.mubr.msk.f32.gmra.mrb[202].mxu1 %vm553_vm1, %v509_v9  ;;  %v6013_v34 = vadd.f32 %v6012_v11, %v6011_v39  ;;  %v241_v47 = vld [vmem:[%s13270_s0 + $0x698] sm:$0xff]  ;;  %v5086_v38 = vmax.f32 %v3996_v41, 0.0  ;;  %v243_v39 = vld [vmem:[%s13270_s0 + $0x6a8] sm:$0xff] }
 0x1a8   :  { %v2666_v1 = vadd.f32 %v11192_v20, %v8457_v14  ;;  %v2660_v51 = vpop.f32.mrb[101].mxu0  ;;  %8615 = vmatmul.mubr.msk.f32.gmra.mrb[206].mxu0 %vm553_vm1, %v237_v63  ;;  %v5444_v48 = vsel %vm5231_vm4, %v4818_v17, 0.0  ;;  %9025 = vmatprep.mubr.msk.f32.mxu1 %vm553_vm1, %v510_v16  ;;  %v5083_v63 = vmax.f32 %v3981_v56, 0.0  ;;  %v5085_v23 = vmax.f32 %v3991_v62, 0.0  ;;  %v513_v11 = vld [vmem:[%s13270_s0 + $0xf18] sm:$0xff] }
 0x1a9   :  { %v5442_v19 = vsel %vm5231_vm4, %v4817_v26, 0.0  ;;  %v2661_v28 = vadd.f32 %v11192_v20, %v2660_v51  ;;  %8617 = vmatprep.mubr.msk.f32.mxu0 %vm553_vm1, %v238_v24  ;;  %v242_v24 = vld [vmem:[%s13270_s0 + $0x6a0] sm:$0xff]  ;;  %v4006_v51 = vadd.f32 %v11192_v20, %v11445_v32 }
 0x1aa   :  { %v5443_v29 = vadd.f32 %v5442_v19, %v5441_v8  ;;  %v4820_v52 = vmax.f32 %v2666_v1, 0.0  ;;  %v11534_v53 = vpop.f32.mrb[98].mxu1  ;;  %v6014_v1 = vsel %vm5231_vm4, %v5083_v63, 0.0  ;;  %v6016_v19 = vsel %vm5231_vm4, %v5084_v12, 0.0  ;;  %v515_v12 = vld [vmem:[%s13270_s0 + $0xf28] sm:$0xff] }
 0x1ab   :  { %v4819_v36 = vmax.f32 %v2661_v28, 0.0  ;;  %v8460_v42 = vpop.f32.mrb[102].mxu0  ;;  %v11540_v26 = vpop.f32.mrb[99].mxu1  ;;  %9026 = vmatmul.mubr.msk.f32.gmra.mrb[204].mxu1 %vm553_vm1, %v511_v22  ;;  %v514_v28 = vld [vmem:[%s13270_s0 + $0xf20] sm:$0xff]  ;;  %v5088_v41 = vmax.f32 %v4006_v51, 0.0  ;;  %v4016_v63 = vadd.f32 %v11192_v20, %v11477_v7  ;;  %v4011_v51 = vadd.f32 %v11192_v20, %v11482_v25 }
 0x1ac   :  { %v5445_v43 = vadd.f32 %v5444_v48, %v5443_v29  ;;  %v2676_v31 = vadd.f32 %v11192_v20, %v8460_v42  ;;  %v2670_v44 = vpop.f32.mrb[103].mxu0  ;;  %8618 = vmatmul.mubr.msk.f32.gmra.mrb[208].mxu0 %vm553_vm1, %v239_v6  ;;  %v5448_v8 = vsel %vm5231_vm4, %v4820_v52, 0.0  ;;  %9028 = vmatprep.mubr.msk.f32.mxu1 %vm553_vm1, %v512_v50  ;;  %v6015_v48 = vadd.f32 %v6014_v1, %v6013_v34 }
 0x1ad   :  { %v5446_v37 = vsel %vm5231_vm4, %v4819_v36, 0.0  ;;  %v2671_v15 = vadd.f32 %v11192_v20, %v2670_v44  ;;  %8620 = vmatprep.mubr.msk.f32.mxu0 %vm553_vm1, %v240_v54  ;;  %v6020_v29 = vsel %vm5231_vm4, %v5086_v38, 0.0  ;;  %v244_v36 = vld [vmem:[%s13270_s0 + $0x6b0] sm:$0xff]  ;;  %v6018_v42 = vsel %vm5231_vm4, %v5085_v23, 0.0 }
 0x1ae   :  { %v5447_v17 = vadd.f32 %v5446_v37, %v5445_v43  ;;  %v4822_v14 = vmax.f32 %v2676_v31, 0.0  ;;  %v11563_v52 = vpop.f32.mrb[100].mxu1  ;;  %v6017_v31 = vadd.f32 %v6016_v19, %v6015_v48  ;;  %v4001_v44 = vadd.f32 %v11192_v20, %v11452_v55  ;;  %v516_v55 = vld [vmem:[%s13270_s0 + $0xf30] sm:$0xff] }
 0x1af   :  { %v4821_v2 = vmax.f32 %v2671_v15, 0.0  ;;  %v8463_v9 = vpop.f32.mrb[104].mxu0  ;;  %v11569_v62 = vpop.f32.mrb[101].mxu1  ;;  %9029 = vmatmul.mubr.msk.f32.gmra.mrb[206].mxu1 %vm553_vm1, %v513_v11  ;;  %v6024_v1 = vsel %vm5231_vm4, %v5088_v41, 0.0  ;;  %v5089_v41 = vmax.f32 %v4011_v51, 0.0 }
 0x1b0   :  { %v5449_v45 = vadd.f32 %v5448_v8, %v5447_v17  ;;  %v2686_v5 = vadd.f32 %v11192_v20, %v8463_v9  ;;  %v2680_v16 = vpop.f32.mrb[105].mxu0  ;;  %8621 = vmatmul.mubr.msk.f32.gmra.mrb[210].mxu0 %vm553_vm1, %v241_v47  ;;  %v5452_v22 = vsel %vm5231_vm4, %v4822_v14, 0.0  ;;  %9031 = vmatprep.mubr.msk.f32.mxu1 %vm553_vm1, %v514_v28  ;;  %v245_v17 = vld [vmem:[%s13270_s0 + $0x6b8] sm:$0xff]  ;;  %v5087_v23 = vmax.f32 %v4001_v44, 0.0  ;;  %v246_v9 = vld [vmem:[%s13270_s0 + $0x6c0] sm:$0xff] }
 0x1b1   :  { %v5450_v32 = vsel %vm5231_vm4, %v4821_v2, 0.0  ;;  %v2681_v6 = vadd.f32 %v11192_v20, %v2680_v16  ;;  %8623 = vmatprep.mubr.msk.f32.mxu0 %vm553_vm1, %v242_v24  ;;  %v6019_v24 = vadd.f32 %v6018_v42, %v6017_v31  ;;  %v4026_v28 = vadd.f32 %v11192_v20, %v11504_v40  ;;  %v248_v31 = vld [vmem:[%s13270_s0 + $0x6d0] sm:$0xff] }
 0x1b2   :  { %v5451_v54 = vadd.f32 %v5450_v32, %v5449_v45  ;;  %v4824_v56 = vmax.f32 %v2686_v5, 0.0  ;;  %v11593_v14 = vpop.f32.mrb[102].mxu1  ;;  %v6022_v19 = vsel %vm5231_vm4, %v5087_v23, 0.0  ;;  %v517_v32 = vld [vmem:[%s13270_s0 + $0xf38] sm:$0xff] }
 0x1b3   :  { %v4823_v34 = vmax.f32 %v2681_v6, 0.0  ;;  %v8466_v43 = vpop.f32.mrb[106].mxu0  ;;  %v11601_v11 = vpop.f32.mrb[103].mxu1  ;;  %9032 = vmatmul.mubr.msk.f32.gmra.mrb[208].mxu1 %vm553_vm1, %v515_v12  ;;  %v6021_v16 = vadd.f32 %v6020_v29, %v6019_v24  ;;  %v5090_v29 = vmax.f32 %v4016_v63, 0.0  ;;  %v5092_v44 = vmax.f32 %v4026_v28, 0.0 }
 0x1b4   :  { %v5456_v50 = vsel %vm5231_vm4, %v4824_v56, 0.0  ;;  %v5453_v37 = vadd.f32 %v5452_v22, %v5451_v54  ;;  %v2696_v15 = vadd.f32 %v11192_v20, %v8466_v43  ;;  %v2690_v47 = vpop.f32.mrb[107].mxu0  ;;  %8624 = vmatmul.mubr.msk.f32.gmra.mrb[212].mxu0 %vm553_vm1, %v243_v39  ;;  %9034 = vmatprep.mubr.msk.f32.mxu1 %vm553_vm1, %v516_v55  ;;  %v518_v54 = vld [vmem:[%s13270_s0 + $0xf40] sm:$0xff]  ;;  %v4021_v12 = vadd.f32 %v11192_v20, %v11512_v59 }
 0x1b5   :  { %v5454_v38 = vsel %vm5231_vm4, %v4823_v34, 0.0  ;;  %v2691_v8 = vadd.f32 %v11192_v20, %v2690_v47  ;;  %8626 = vmatprep.mubr.msk.f32.mxu0 %vm553_vm1, %v244_v36  ;;  %v247_v36 = vld [vmem:[%s13270_s0 + $0x6c8] sm:$0xff]  ;;  %v6023_v42 = vadd.f32 %v6022_v19, %v6021_v16  ;;  %v6026_v63 = vsel %vm5231_vm4, %v5089_v41, 0.0  ;;  %v250_v19 = vld [vmem:[%s13270_s0 + $0x6e0] sm:$0xff] }
 0x1b6   :  { %v5455_v2 = vadd.f32 %v5454_v38, %v5453_v37  ;;  %v4826_v7 = vmax.f32 %v2696_v15, 0.0  ;;  %v11623_v22 = vpop.f32.mrb[104].mxu1  ;;  %v4036_v55 = vadd.f32 %v11192_v20, %v11534_v53  ;;  %v519_v38 = vld [vmem:[%s13270_s0 + $0xf48] sm:$0xff]  ;;  %v6028_v23 = vsel %vm5231_vm4, %v5090_v29, 0.0  ;;  %v520_v53 = vld [vmem:[%s13270_s0 + $0xf50] sm:$0xff] }
 0x1b7   :  { %v4825_v45 = vmax.f32 %v2691_v8, 0.0  ;;  %v8469_v5 = vpop.f32.mrb[108].mxu0  ;;  %9035 = vmatmul.mubr.msk.f32.gmra.mrb[210].mxu1 %vm553_vm1, %v517_v32  ;;  %v6025_v47 = vadd.f32 %v6024_v1, %v6023_v42  ;;  %v5091_v51 = vmax.f32 %v4021_v12, 0.0  ;;  %v4031_v32 = vadd.f32 %v11192_v20, %v11540_v26 }
 0x1b8   :  { %v5460_v25 = vsel %vm5231_vm4, %v4826_v7, 0.0  ;;  %v5457_v6 = vadd.f32 %v5456_v50, %v5455_v2  ;;  %v2706_v39 = vadd.f32 %v11192_v20, %v8469_v5  ;;  %v2700_v48 = vpop.f32.mrb[109].mxu0  ;;  %8627 = vmatmul.mubr.msk.f32.gmra.mrb[214].mxu0 %vm553_vm1, %v245_v17  ;;  %v11630_v50 = vpop.f32.mrb[105].mxu1  ;;  %9037 = vmatprep.mubr.msk.f32.mxu1 %vm553_vm1, %v518_v54  ;;  %v5094_v28 = vmax.f32 %v4036_v55, 0.0 }
 0x1b9   :  { %v5458_v40 = vsel %vm5231_vm4, %v4825_v45, 0.0  ;;  %v2701_v56 = vadd.f32 %v11192_v20, %v2700_v48  ;;  %8629 = vmatprep.mubr.msk.f32.mxu0 %vm553_vm1, %v246_v9  ;;  %v249_v9 = vld [vmem:[%s13270_s0 + $0x6d8] sm:$0xff]  ;;  %v6027_v1 = vadd.f32 %v6026_v63, %v6025_v47  ;;  %v6032_v48 = vsel %vm5231_vm4, %v5092_v44, 0.0  ;;  %v251_v44 = vld [vmem:[%s13270_s0 + $0x6e8] sm:$0xff]  ;;  %v252_v63 = vld [vmem:[%s13270_s0 + $0x6f0] sm:$0xff] }
 0x1ba   :  { %v5459_v34 = vadd.f32 %v5458_v40, %v5457_v6  ;;  %v4828_v43 = vmax.f32 %v2706_v39, 0.0  ;;  %v11653_v45 = vpop.f32.mrb[106].mxu1  ;;  %v6030_v54 = vsel %vm5231_vm4, %v5091_v51, 0.0  ;;  %v521_v40 = vld [vmem:[%s13270_s0 + $0xf58] sm:$0xff]  ;;  %v4046_v41 = vadd.f32 %v11192_v20, %v11563_v52 }
 0x1bb   :  { %v4827_v37 = vmax.f32 %v2701_v56, 0.0  ;;  %v8472_v15 = vpop.f32.mrb[110].mxu0  ;;  %9038 = vmatmul.mubr.msk.f32.gmra.mrb[212].mxu1 %vm553_vm1, %v519_v38  ;;  %v6029_v29 = vadd.f32 %v6028_v23, %v6027_v1  ;;  %v6036_v55 = vsel %vm5231_vm4, %v5094_v28, 0.0  ;;  %v4041_v38 = vadd.f32 %v11192_v20, %v11569_v62 }
 0x1bc   :  { %v5464_v59 = vsel %vm5231_vm4, %v4828_v43, 0.0  ;;  %v5461_v8 = vadd.f32 %v5460_v25, %v5459_v34  ;;  %v2716_v17 = vadd.f32 %v11192_v20, %v8472_v15  ;;  %v2710_v24 = vpop.f32.mrb[111].mxu0  ;;  %8630 = vmatmul.mubr.msk.f32.gmra.mrb[216].mxu0 %vm553_vm1, %v247_v36  ;;  %v11660_v25 = vpop.f32.mrb[107].mxu1  ;;  %9040 = vmatprep.mubr.msk.f32.mxu1 %vm553_vm1, %v520_v53  ;;  %v522_v34 = vld [vmem:[%s13270_s0 + $0xf60] sm:$0xff]  ;;  %v4056_v53 = vadd.f32 %v11192_v20, %v11593_v14 }
 0x1bd   :  { %v5462_v2 = vsel %vm5231_vm4, %v4827_v37, 0.0  ;;  %v2711_v7 = vadd.f32 %v11192_v20, %v2710_v24  ;;  %8632 = vmatprep.mubr.msk.f32.mxu0 %vm553_vm1, %v248_v31  ;;  %v6031_v12 = vadd.f32 %v6030_v54, %v6029_v29  ;;  %v5093_v37 = vmax.f32 %v4031_v32, 0.0  ;;  %v254_v29 = vld [vmem:[%s13270_s0 + $0x700] sm:$0xff] }
 0x1be   :  { %v5463_v5 = vadd.f32 %v5462_v2, %v5461_v8  ;;  %v4830_v16 = vmax.f32 %v2716_v17, 0.0  ;;  %v11683_v15 = vpop.f32.mrb[108].mxu1  ;;  %v523_v2 = vld [vmem:[%s13270_s0 + $0xf68] sm:$0xff]  ;;  %v5096_v51 = vmax.f32 %v4046_v41, 0.0  ;;  %v5095_v32 = vmax.f32 %v4041_v38, 0.0 }
 0x1bf   :  { %v4829_v6 = vmax.f32 %v2711_v7, 0.0  ;;  %v8475_v39 = vpop.f32.mrb[112].mxu0  ;;  %9041 = vmatmul.mubr.msk.f32.gmra.mrb[214].mxu1 %vm553_vm1, %v521_v40  ;;  %v6033_v24 = vadd.f32 %v6032_v48, %v6031_v12  ;;  %v6034_v23 = vsel %vm5231_vm4, %v5093_v37, 0.0  ;;  %v5098_v54 = vmax.f32 %v4056_v53, 0.0 }
 0x1c0   :  { %v5468_v56 = vsel %vm5231_vm4, %v4830_v16, 0.0  ;;  %v5465_v26 = vadd.f32 %v5464_v59, %v5463_v5  ;;  %v2726_v36 = vadd.f32 %v11192_v20, %v8475_v39  ;;  %v2720_v42 = vpop.f32.mrb[113].mxu0  ;;  %8633 = vmatmul.mubr.msk.f32.gmra.mrb[218].mxu0 %vm553_vm1, %v249_v9  ;;  %v11692_v59 = vpop.f32.mrb[109].mxu1  ;;  %9043 = vmatprep.mubr.msk.f32.mxu1 %vm553_vm1, %v522_v34  ;;  %v524_v5 = vld [vmem:[%s13270_s0 + $0xf70] sm:$0xff]  ;;  %v4051_v40 = vadd.f32 %v11192_v20, %v11601_v11 }
 0x1c1   :  { %v5466_v43 = vsel %vm5231_vm4, %v4829_v6, 0.0  ;;  %v2721_v31 = vadd.f32 %v11192_v20, %v2720_v42  ;;  %8635 = vmatprep.mubr.msk.f32.mxu0 %vm553_vm1, %v250_v19  ;;  %v253_v19 = vld [vmem:[%s13270_s0 + $0x6f8] sm:$0xff]  ;;  %v6035_v28 = vadd.f32 %v6034_v23, %v6033_v24  ;;  %v6038_v41 = vsel %vm5231_vm4, %v5095_v32, 0.0  ;;  %v256_v23 = vld [vmem:[%s13270_s0 + $0x710] sm:$0xff] }
 0x1c2   :  { %v5467_v47 = vadd.f32 %v5466_v43, %v5465_v26  ;;  %v4832_v52 = vmax.f32 %v2726_v36, 0.0  ;;  %v11713_v6 = vpop.f32.mrb[110].mxu1  ;;  %v4066_v34 = vadd.f32 %v11192_v20, %v11623_v22  ;;  %v525_v43 = vld [vmem:[%s13270_s0 + $0xf78] sm:$0xff]  ;;  %v6040_v37 = vsel %vm5231_vm4, %v5096_v51, 0.0  ;;  %v526_v22 = vld [vmem:[%s13270_s0 + $0xf80] sm:$0xff] }
 0x1c3   :  { %v4831_v8 = vmax.f32 %v2721_v31, 0.0  ;;  %v8478_v17 = vpop.f32.mrb[114].mxu0  ;;  %9044 = vmatmul.mubr.msk.f32.gmra.mrb[216].mxu1 %vm553_vm1, %v523_v2  ;;  %v6037_v42 = vadd.f32 %v6036_v55, %v6035_v28  ;;  %v5097_v38 = vmax.f32 %v4051_v40, 0.0  ;;  %v4061_v2 = vadd.f32 %v11192_v20, %v11630_v50  ;;  %v11763_v50 = vld [vmem:[%s13272_s2] ss:$0 sm:$0xff] }
 0x1c4   :  { %v5472_v62 = vsel %vm5231_vm4, %v4832_v52, 0.0  ;;  %v5469_v7 = vadd.f32 %v5468_v56, %v5467_v47  ;;  %v2736_v9 = vadd.f32 %v11192_v20, %v8478_v17  ;;  %v2730_v1 = vpop.f32.mrb[115].mxu0  ;;  %8636 = vmatmul.mubr.msk.f32.gmra.mrb[220].mxu0 %vm553_vm1, %v251_v44  ;;  %v11720_v56 = vpop.f32.mrb[111].mxu1  ;;  %9046 = vmatprep.mubr.msk.f32.mxu1 %vm553_vm1, %v524_v5  ;;  %v5100_v53 = vmax.f32 %v4066_v34, 0.0 }
 0x1c5   :  { %v5470_v14 = vsel %vm5231_vm4, %v4831_v8, 0.0  ;;  %v2731_v16 = vadd.f32 %v11192_v20, %v2730_v1  ;;  %8638 = vmatprep.mubr.msk.f32.mxu0 %vm553_vm1, %v252_v63  ;;  %v255_v63 = vld [vmem:[%s13270_s0 + $0x708] sm:$0xff]  ;;  %v6039_v55 = vadd.f32 %v6038_v41, %v6037_v42  ;;  %v6044_v1 = vsel %vm5231_vm4, %v5098_v54, 0.0  ;;  %v257_v54 = vld [vmem:[%s13270_s0 + $0x718] sm:$0xff]  ;;  %v258_v41 = vld [vmem:[%s13270_s0 + $0x720] sm:$0xff] }
 0x1c6   :  { %v5471_v39 = vadd.f32 %v5470_v14, %v5469_v7  ;;  %v4834_v48 = vmax.f32 %v2736_v9, 0.0  ;;  %v11743_v8 = vpop.f32.mrb[112].mxu1  ;;  %v6042_v5 = vsel %vm5231_vm4, %v5097_v38, 0.0  ;;  %v527_v14 = vld [vmem:[%s13270_s0 + $0xf88] sm:$0xff]  ;;  %v4076_v32 = vadd.f32 %v11763_v50, %v11653_v45 }
 0x1c7   :  { %v4833_v26 = vmax.f32 %v2731_v16, 0.0  ;;  %v8481_v36 = vpop.f32.mrb[116].mxu0  ;;  %9047 = vmatmul.mubr.msk.f32.gmra.mrb[218].mxu1 %vm553_vm1, %v525_v43  ;;  %v6041_v51 = vadd.f32 %v6040_v37, %v6039_v55  ;;  %v6048_v34 = vsel %vm5231_vm4, %v5100_v53, 0.0  ;;  %v4071_v43 = vadd.f32 %v11763_v50, %v11660_v25 }
 0x1c8   :  { %v5476_v11 = vsel %vm5231_vm4, %v4834_v48, 0.0  ;;  %v5473_v31 = vadd.f32 %v5472_v62, %v5471_v39  ;;  %v2746_v44 = vadd.f32 %v11192_v20, %v8481_v36  ;;  %v2740_v12 = vpop.f32.mrb[117].mxu0  ;;  %8639 = vmatmul.mubr.msk.f32.gmra.mrb[222].mxu0 %vm553_vm1, %v253_v19  ;;  %v11750_v62 = vpop.f32.mrb[113].mxu1  ;;  %9049 = vmatprep.mubr.msk.f32.mxu1 %vm553_vm1, %v526_v22  ;;  %v528_v39 = vld [vmem:[%s13270_s0 + $0xf90] sm:$0xff]  ;;  %v4086_v22 = vadd.f32 %v11763_v50, %v11683_v15 }
 0x1c9   :  { %v5474_v47 = vsel %vm5231_vm4, %v4833_v26, 0.0  ;;  %v2741_v52 = vadd.f32 %v11192_v20, %v2740_v12  ;;  %8641 = vmatprep.mubr.msk.f32.mxu0 %vm553_vm1, %v254_v29  ;;  %v6043_v40 = vadd.f32 %v6042_v5, %v6041_v51  ;;  %v5099_v26 = vmax.f32 %v4061_v2, 0.0  ;;  %v260_v51 = vld [vmem:[%s13270_s0 + $0x730] sm:$0xff] }
 0x1ca   :  { %v5475_v17 = vadd.f32 %v5474_v47, %v5473_v31  ;;  %v4836_v24 = vmax.f32 %v2746_v44, 0.0  ;;  %v11778_v36 = vpop.f32.mrb[114].mxu1  ;;  %v529_v47 = vld [vmem:[%s13270_s0 + $0xf98] sm:$0xff]  ;;  %v5102_v38 = vmax.f32 %v4076_v32, 0.0  ;;  %v5101_v2 = vmax.f32 %v4071_v43, 0.0 }
 0x1cb   :  { %v4835_v7 = vmax.f32 %v2741_v52, 0.0  ;;  %v8484_v9 = vpop.f32.mrb[118].mxu0  ;;  %9050 = vmatmul.mubr.msk.f32.gmra.mrb[220].mxu1 %vm553_vm1, %v527_v14  ;;  %v6045_v12 = vadd.f32 %v6044_v1, %v6043_v40  ;;  %v6046_v37 = vsel %vm5231_vm4, %v5099_v26, 0.0  ;;  %v5104_v5 = vmax.f32 %v4086_v22, 0.0  ;;  %v262_v22 = vld [vmem:[%s13270_s0 + $0x740] sm:$0xff] }
 0x1cc   :  { %v5480_v16 = vsel %vm5231_vm4, %v4836_v24, 0.0  ;;  %v5477_v20 = vadd.f32 %v5476_v11, %v5475_v17  ;;  %v2756_v19 = vadd.f32 %v11763_v50, %v8484_v9  ;;  %v2750_v28 = vpop.f32.mrb[119].mxu0  ;;  %8642 = vmatmul.mubr.msk.f32.gmra.mrb[224].mxu0 %vm553_vm1, %v255_v63  ;;  %v11786_v11 = vpop.f32.mrb[115].mxu1  ;;  %9052 = vmatprep.mubr.msk.f32.mxu1 %vm553_vm1, %v528_v39  ;;  %v530_v17 = vld [vmem:[%s13270_s0 + $0xfa0] sm:$0xff]  ;;  %v4081_v14 = vadd.f32 %v11763_v50, %v11692_v59 }
 0x1cd   :  { %v5478_v48 = vsel %vm5231_vm4, %v4835_v7, 0.0  ;;  %v2751_v29 = vadd.f32 %v11763_v50, %v2750_v28  ;;  %8644 = vmatprep.mubr.msk.f32.mxu0 %vm553_vm1, %v256_v23  ;;  %v259_v23 = vld [vmem:[%s13270_s0 + $0x728] sm:$0xff]  ;;  %v6047_v53 = vadd.f32 %v6046_v37, %v6045_v12  ;;  %v6050_v32 = vsel %vm5231_vm4, %v5101_v2, 0.0 }
 0x1ce   :  { %v5479_v42 = vadd.f32 %v5478_v48, %v5477_v20  ;;  %v4838_v45 = vmax.f32 %v2756_v19, 0.0  ;;  %v11808_v7 = vpop.f32.mrb[116].mxu1  ;;  %v4096_v39 = vadd.f32 %v11763_v50, %v11713_v6  ;;  %v531_v48 = vld [vmem:[%s13270_s0 + $0xfa8] sm:$0xff]  ;;  %v6052_v40 = vsel %vm5231_vm4, %v5102_v38, 0.0  ;;  %v532_v6 = vld [vmem:[%s13270_s0 + $0xfb0] sm:$0xff] }
 0x1cf   :  { %v4837_v31 = vmax.f32 %v2751_v29, 0.0  ;;  %v8487_v44 = vpop.f32.mrb[120].mxu0  ;;  %9053 = vmatmul.mubr.msk.f32.gmra.mrb[222].mxu1 %vm553_vm1, %v529_v47  ;;  %v6049_v28 = vadd.f32 %v6048_v34, %v6047_v53  ;;  %v6061_v26 = vsel %vm5231_vm4, %v5104_v5, 0.0  ;;  %v5103_v43 = vmax.f32 %v4081_v14, 0.0  ;;  %v263_v5 = vld [vmem:[%s13270_s0 + $0x748] sm:$0xff] }
 0x1d0   :  { %v5484_v25 = vsel %vm5231_vm4, %v4838_v45, 0.0  ;;  %v5481_v52 = vadd.f32 %v5480_v16, %v5479_v42  ;;  %v2766_v63 = vadd.f32 %v11763_v50, %v8487_v44  ;;  %v2760_v55 = vpop.f32.mrb[121].mxu0  ;;  %8645 = vmatmul.mubr.msk.f32.gmra.mrb[226].mxu0 %vm553_vm1, %v257_v54  ;;  %v11815_v16 = vpop.f32.mrb[117].mxu1  ;;  %9055 = vmatprep.mubr.msk.f32.mxu1 %vm553_vm1, %v530_v17  ;;  %v4091_v47 = vadd.f32 %v11763_v50, %v11720_v56 }
 0x1d1   :  { %v5482_v15 = vsel %vm5231_vm4, %v4837_v31, 0.0  ;;  %v2761_v24 = vadd.f32 %v11763_v50, %v2760_v55  ;;  %8647 = vmatprep.mubr.msk.f32.mxu0 %vm553_vm1, %v258_v41  ;;  %v261_v41 = vld [vmem:[%s13270_s0 + $0x738] sm:$0xff]  ;;  %v6051_v34 = vadd.f32 %v6050_v32, %v6049_v28  ;;  %v6060_v38 = vsel %vm5231_vm4, %v5103_v43, 0.0  ;;  %v264_v28 = vld [vmem:[%s13270_s0 + $0x750] sm:$0xff] }
 0x1d2   :  { %v5483_v9 = vadd.f32 %v5482_v15, %v5481_v52  ;;  %v4840_v1 = vmax.f32 %v2766_v63, 0.0  ;;  %v11838_v31 = vpop.f32.mrb[118].mxu1  ;;  %v5106_v17 = vmax.f32 %v4096_v39, 0.0  ;;  %v533_v15 = vld [vmem:[%s13270_s0 + $0xfb8] sm:$0xff]  ;;  %v6062_v53 = vadd.f32 %v6061_v26, %v6060_v38  ;;  %v535_v26 = vld [vmem:[%s13270_s0 + $0xfc8] sm:$0xff]  ;;  %v536_v43 = vld [vmem:[%s13270_s0 + $0xfd0] sm:$0xff] }
 0x1d3   :  { %v4839_v20 = vmax.f32 %v2761_v24, 0.0  ;;  %v8490_v19 = vpop.f32.mrb[122].mxu0  ;;  %9056 = vmatmul.mubr.msk.f32.gmra.mrb[224].mxu1 %vm553_vm1, %v531_v48  ;;  %v11849_v55 = vadd.f32 %v6052_v40, %v6051_v34  ;;  %v4106_v2 = vadd.f32 %v11763_v50, %v11743_v8  ;;  %v5105_v32 = vmax.f32 %v4091_v47, 0.0 }
 0x1d4   :  { %v5485_v29 = vadd.f32 %v5484_v25, %v5483_v9  ;;  %v2776_v59 = vadd.f32 %v11763_v50, %v8490_v19  ;;  %v2770_v54 = vpop.f32.mrb[123].mxu0  ;;  %8648 = vmatmul.mubr.msk.f32.gmra.mrb[228].mxu0 %vm553_vm1, %v259_v23  ;;  %v5488_v44 = vsel %vm5231_vm4, %v4840_v1, 0.0  ;;  %v11846_v25 = vpop.f32.mrb[119].mxu1  ;;  %9058 = vmatprep.mubr.msk.f32.mxu1 %vm553_vm1, %v532_v6  ;;  %v534_v9 = vld [vmem:[%s13270_s0 + $0xfc0] sm:$0xff]  ;;  %v4101_v40 = vadd.f32 %v11763_v50, %v11750_v62 }
 0x1d5   :  { %v5486_v42 = vsel %vm5231_vm4, %v4839_v20, 0.0  ;;  %v2771_v45 = vadd.f32 %v11763_v50, %v2770_v54  ;;  %8650 = vmatprep.mubr.msk.f32.mxu0 %vm553_vm1, %v260_v51  ;;  %13286 = vst [vmem:[#allocation7_spill] sm:$0xff] %v11849_v55  ;;  %v5295_v20 = vrot.slane %v10620_v33, 4  ;;  %v6065_v54 = vsel %vm5231_vm4, %v5106_v17, 0.0 }
 0x1d6   :  { %v5487_v12 = vadd.f32 %v5486_v42, %v5485_v29  ;;  %v4842_v37 = vmax.f32 %v2776_v59, 0.0  ;;  %v11869_v14 = vpop.f32.mrb[120].mxu1  ;;  %v5108_v34 = vmax.f32 %v4106_v2, 0.0  ;;  %v5107_v38 = vmax.f32 %v4101_v40, 0.0  ;;  %v537_v2 = vld [vmem:[%s13270_s0 + $0xfd8] sm:$0xff]  ;;  %v268_v40 = vld [vmem:[%s13270_s0 + $0x770] sm:$0xff] }
 0x1d7   :  { %v4841_v52 = vmax.f32 %v2771_v45, 0.0  ;;  %v8493_v63 = vpop.f32.mrb[124].mxu0  ;;  %v11876_v39 = vpop.f32.mrb[121].mxu1  ;;  %9059 = vmatmul.mubr.msk.f32.gmra.mrb[226].mxu1 %vm553_vm1, %v533_v15  ;;  %v11901_v47 = vadd.f32 %v5295_v20, %v10620_v33  ;;  %v4116_v17 = vadd.f32 %v11763_v50, %v11778_v36  ;;  %v538_v20 = vld [vmem:[%s13270_s0 + $0xfe0] sm:$0xff] }
 0x1d8   :  { %v5489_v24 = vadd.f32 %v5488_v44, %v5487_v12  ;;  %v2786_v56 = vadd.f32 %v11763_v50, %v8493_v63  ;;  %v2780_v23 = vpop.f32.mrb[125].mxu0  ;;  %8651 = vmatmul.mubr.msk.f32.gmra.mrb[230].mxu0 %vm553_vm1, %v261_v41  ;;  %v5492_v8 = vsel %vm5231_vm4, %v4842_v37, 0.0  ;;  %9061 = vmatprep.mubr.msk.f32.mxu1 %vm553_vm1, %v534_v9  ;;  %v6063_v41 = vsel %vm5231_vm4, %v5105_v32, 0.0  ;;  %v265_v12 = vld [vmem:[%s13270_s0 + $0x758] sm:$0xff]  ;;  %v266_v63 = vld [vmem:[%s13270_s0 + $0x760] sm:$0xff]  ;;  %v267_v32 = vld [vmem:[%s13270_s0 + $0x768] sm:$0xff] }
 0x1d9   :  { %v5490_v1 = vsel %vm5231_vm4, %v4841_v52, 0.0  ;;  %v2781_v51 = vadd.f32 %v11763_v50, %v2780_v23  ;;  %8653 = vmatprep.mubr.msk.f32.mxu0 %vm553_vm1, %v262_v22  ;;  %v6064_v37 = vadd.f32 %v6063_v41, %v6062_v53 }
 0x1da   :  { %v5491_v19 = vadd.f32 %v5490_v1, %v5489_v24  ;;  %v4844_v48 = vmax.f32 %v2786_v56, 0.0  ;;  %v11898_v22 = vpop.f32.mrb[122].mxu1 }
 0x1db   :  { %v4843_v29 = vmax.f32 %v2781_v51, 0.0  ;;  %v8496_v59 = vpop.f32.mrb[126].mxu0  ;;  %v11908_v15 = vpop.f32.mrb[123].mxu1  ;;  %9062 = vmatmul.mubr.msk.f32.gmra.mrb[228].mxu1 %vm553_vm1, %v535_v26  ;;  %v6066_v33 = vadd.f32 %v6065_v54, %v6064_v37  ;;  %v6069_v51 = vsel %vm5231_vm4, %v5108_v34, 0.0  ;;  %v5110_v26 = vmax.f32 %v4116_v17, 0.0 }
 0x1dc   :  { %v5493_v6 = vadd.f32 %v5492_v8, %v5491_v19  ;;  %v2796_v42 = vadd.f32 %v11763_v50, %v8496_v59  ;;  %v2790_v45 = vpop.f32.mrb[127].mxu0  ;;  %8654 = vmatmul.mubr.msk.f32.gmra.mrb[232].mxu0 %vm553_vm1, %v263_v5  ;;  %v5496_v24 = vsel %vm5231_vm4, %v4844_v48, 0.0  ;;  %9064 = vmatprep.mubr.msk.f32.mxu1 %vm553_vm1, %v536_v43  ;;  %v6067_v5 = vsel %vm5231_vm4, %v5107_v38, 0.0 }
 0x1dd   :  { %v5494_v62 = vsel %vm5231_vm4, %v4843_v29, 0.0  ;;  %v2791_v44 = vadd.f32 %v11763_v50, %v2790_v45  ;;  %8656 = vmatprep.mubr.msk.f32.mxu0 %vm553_vm1, %v264_v28  ;;  %v5364_v8 = vrot.slane %v11007_v60, 4  ;;  %v6068_v48 = vadd.f32 %v6067_v5, %v6066_v33  ;;  %v270_v33 = vld [vmem:[%s13270_s0 + $0x780] sm:$0xff] }
 0x1de   :  { %v5495_v52 = vadd.f32 %v5494_v62, %v5493_v6  ;;  %v4846_v56 = vmax.f32 %v2796_v42, 0.0  ;;  %v11930_v29 = vpop.f32.mrb[124].mxu1  ;;  %v4111_v6 = vadd.f32 %v11763_v50, %v11786_v11  ;;  %v4126_v62 = vadd.f32 %v11763_v50, %v11808_v7  ;;  %v540_v7 = vld [vmem:[%s13270_s0 + $0xff0] sm:$0xff] }
 0x1df   :  { %v4845_v23 = vmax.f32 %v2791_v44, 0.0  ;;  %v8499_v53 = vpop.f32.mrb[128].mxu0  ;;  %v11937_v42 = vpop.f32.mrb[125].mxu1  ;;  %9065 = vmatmul.mubr.msk.f32.gmra.mrb[230].mxu1 %vm553_vm1, %v537_v2  ;;  %v6070_v43 = vadd.f32 %v6069_v51, %v6068_v48  ;;  %v539_v44 = vld [vmem:[%s13270_s0 + $0xfe8] sm:$0xff]  ;;  %v6073_v2 = vsel %vm5231_vm4, %v5110_v26, 0.0 }
 0x1e0   :  { %v5497_v9 = vadd.f32 %v5496_v24, %v5495_v52  ;;  %v2806_v1 = vadd.f32 %v11763_v50, %v8499_v53  ;;  %v2800_v36 = vpop.f32.mrb[129].mxu0  ;;  %8657 = vmatmul.mubr.msk.f32.gmra.mrb[234].mxu0 %vm553_vm1, %v265_v12  ;;  %v5500_v45 = vsel %vm5231_vm4, %v4846_v56, 0.0  ;;  %9067 = vmatprep.mubr.msk.f32.mxu1 %vm553_vm1, %v538_v20  ;;  %v269_v24 = vld [vmem:[%s13270_s0 + $0x778] sm:$0xff] }
 0x1e1   :  { %v5498_v19 = vsel %vm5231_vm4, %v4845_v23, 0.0  ;;  %v2801_v28 = vadd.f32 %v11763_v50, %v2800_v36  ;;  %8659 = vmatprep.mubr.msk.f32.mxu0 %vm553_vm1, %v266_v63  ;;  %v5109_v63 = vmax.f32 %v4111_v6, 0.0  ;;  %v5297_v36 = vrot.slane %v11901_v47, 2 }
 0x1e2   :  { %v5499_v59 = vadd.f32 %v5498_v19, %v5497_v9  ;;  %v4848_v54 = vmax.f32 %v2806_v1, 0.0  ;;  %v11961_v56 = vpop.f32.mrb[126].mxu1  ;;  %v4121_v19 = vadd.f32 %v11763_v50, %v11815_v16 }
 0x1e3   :  { %v4847_v41 = vmax.f32 %v2801_v28, 0.0  ;;  %v8502_v34 = vpop.f32.mrb[130].mxu0  ;;  %v6071_v9 = vsel %vm5231_vm4, %v5109_v63, 0.0  ;;  %v11968_v1 = vpop.f32.mrb[127].mxu1  ;;  %9068 = vmatmul.mubr.msk.f32.gmra.mrb[232].mxu1 %vm553_vm1, %v539_v44  ;;  %v541_v28 = vld [vmem:[%s13270_s0 + $0xff8] sm:$0xff]  ;;  %v4131_v63 = vadd.f32 %v11763_v50, %v11846_v25 }
 0x1e4   :  { %v11947_v12 = vadd.f32 %v5500_v45, %v5499_v59  ;;  %v5509_v11 = vsel %vm5231_vm4, %v4848_v54, 0.0  ;;  %v2816_v37 = vadd.f32 %v11763_v50, %v8502_v34  ;;  %v2810_v52 = vpop.f32.mrb[131].mxu0  ;;  %8660 = vmatmul.mubr.msk.f32.gmra.mrb[236].mxu0 %vm553_vm1, %v267_v32  ;;  %v6072_v20 = vadd.f32 %v6071_v9, %v6070_v43  ;;  %9070 = vmatprep.mubr.msk.f32.mxu1 %vm553_vm1, %v540_v7  ;;  %v273_v25 = vld [vmem:[%s13270_s0 + $0x798] sm:$0xff] }
 0x1e5   :  { %v5508_v38 = vsel %vm5231_vm4, %v4847_v41, 0.0  ;;  %v2811_v17 = vadd.f32 %v11763_v50, %v2810_v52  ;;  %8662 = vmatprep.mubr.msk.f32.mxu0 %vm553_vm1, %v268_v40  ;;  %v11979_v32 = vadd.f32 %v5364_v8, %v11007_v60  ;;  %v5112_v54 = vmax.f32 %v4126_v62, 0.0  ;;  %v271_v60 = vld [vmem:[%s13270_s0 + $0x788] sm:$0xff]  ;;  %v272_v62 = vld [vmem:[%s13270_s0 + $0x790] sm:$0xff] }
 0x1e6   :  { %v5510_v23 = vadd.f32 %v5509_v11, %v5508_v38  ;;  %v4850_v53 = vmax.f32 %v2816_v37, 0.0  ;;  %v4136_v40 = vadd.f32 %v11763_v50, %v11838_v31  ;;  %v5111_v8 = vmax.f32 %v4121_v19, 0.0  ;;  %v11991_v45 = vpop.f32.mrb[128].mxu1 }
 0x1e7   :  { %v4849_v51 = vmax.f32 %v2811_v17, 0.0  ;;  %v8505_v5 = vpop.f32.mrb[132].mxu0  ;;  %v6074_v6 = vadd.f32 %v6073_v2, %v6072_v20  ;;  %v5433_v41 = vrot.slane %v11462_v35, 4  ;;  %v11998_v44 = vpop.f32.mrb[129].mxu1  ;;  %9071 = vmatmul.mubr.msk.f32.gmra.mrb[234].mxu1 %vm553_vm1, %v541_v28  ;;  %v4146_v7 = vadd.f32 %v11763_v50, %v11869_v14  ;;  %v274_v28 = vld [vmem:[%s13270_s0 + $0x7a0] sm:$0xff] }
 0x1e8   :  { %v2826_v48 = vadd.f32 %v11763_v50, %v8505_v5  ;;  %v2820_v59 = vpop.f32.mrb[133].mxu0  ;;  %8663 = vmatmul.mubr.msk.f32.gmra.mrb[238].mxu0 %vm553_vm1, %v269_v24  ;;  %v5513_v34 = vsel %vm5231_vm4, %v4850_v53, 0.0  ;;  %v6075_v52 = vsel %vm5231_vm4, %v5111_v8, 0.0  ;;  %v5114_v53 = vmax.f32 %v4136_v40, 0.0 }
 0x1e9   :  { %v5511_v16 = vsel %vm5231_vm4, %v4849_v51, 0.0  ;;  %v2821_v26 = vadd.f32 %v11763_v50, %v2820_v59  ;;  %8665 = vmatprep.mubr.msk.f32.mxu0 %vm553_vm1, %v270_v33  ;;  %v5366_v33 = vrot.slane %v11979_v32, 2  ;;  %v6076_v14 = vadd.f32 %v6075_v52, %v6074_v6 }
 0x1ea   :  { %v5512_v43 = vadd.f32 %v5511_v16, %v5510_v23  ;;  %v4852_v31 = vmax.f32 %v2826_v48, 0.0  ;;  %v6077_v23 = vsel %vm5231_vm4, %v5112_v54, 0.0  ;;  %v12016_v51 = vpop.f32.mrb[130].mxu1  ;;  %v5113_v48 = vmax.f32 %v4131_v63, 0.0 }
 0x1eb   :  { %v4851_v11 = vmax.f32 %v2821_v26, 0.0  ;;  %v8508_v37 = vpop.f32.mrb[134].mxu0  ;;  %v12022_v59 = vpop.f32.mrb[131].mxu1  ;;  %v6078_v16 = vadd.f32 %v6077_v23, %v6076_v14  ;;  %v5116_v26 = vmax.f32 %v4146_v7, 0.0  ;;  %v12027_v8 = vadd.f32 %v5433_v41, %v11462_v35  ;;  %v275_v35 = vld [vmem:[%s13270_s0 + $0x7a8] sm:$0xff]  ;;  %v276_v7 = vld [vmem:[%s13270_s0 + $0x7b0] sm:$0xff] }
 0x1ec   :  { %v5514_v38 = vadd.f32 %v5513_v34, %v5512_v43  ;;  %v2836_v17 = vadd.f32 %v11763_v50, %v8508_v37  ;;  %v2830_v24 = vpop.f32.mrb[135].mxu0  ;;  %8666 = vmatmul.mubr.msk.f32.gmra.mrb[240].mxu0 %vm553_vm1, %v271_v60  ;;  %v5517_v5 = vsel %vm5231_vm4, %v4852_v31, 0.0  ;;  %v4141_v60 = vadd.f32 %v11763_v50, %v11876_v39 }
 0x1ed   :  { %v5515_v2 = vsel %vm5231_vm4, %v4851_v11, 0.0  ;;  %v2831_v9 = vadd.f32 %v11763_v50, %v2830_v24  ;;  %8668 = vmatprep.mubr.msk.f32.mxu0 %vm553_vm1, %v272_v62  ;;  %v6081_v31 = vsel %vm5231_vm4, %v5114_v53, 0.0  ;;  %v6079_v39 = vsel %vm5231_vm4, %v5113_v48, 0.0 }
 0x1ee   :  { %v5516_v20 = vadd.f32 %v5515_v2, %v5514_v38  ;;  %v4854_v19 = vmax.f32 %v2836_v17, 0.0  ;;  %v12040_v41 = vpop.f32.mrb[132].mxu1  ;;  %v6080_v38 = vadd.f32 %v6079_v39, %v6078_v16  ;;  %v6085_v17 = vsel %vm5231_vm4, %v5116_v26, 0.0 }
 0x1ef   :  { %v4853_v54 = vmax.f32 %v2831_v9, 0.0  ;;  %v8511_v40 = vpop.f32.mrb[136].mxu0  ;;  %v12046_v24 = vpop.f32.mrb[133].mxu1  ;;  %v5115_v2 = vmax.f32 %v4141_v60, 0.0  ;;  %v4156_v9 = vadd.f32 %v11763_v50, %v11898_v22  ;;  %v277_v22 = vld [vmem:[%s13270_s0 + $0x7b8] sm:$0xff]  ;;  %v4161_v39 = vadd.f32 %v11763_v50, %v11937_v42 }
 0x1f0   :  { %v5518_v6 = vadd.f32 %v5517_v5, %v5516_v20  ;;  %v2846_v34 = vadd.f32 %v11763_v50, %v8511_v40  ;;  %v2840_v43 = vpop.f32.mrb[137].mxu0  ;;  %8669 = vmatmul.mubr.msk.f32.gmra.mrb[242].mxu0 %vm553_vm1, %v273_v25  ;;  %v5521_v62 = vsel %vm5231_vm4, %v4854_v19, 0.0  ;;  %v4151_v25 = vadd.f32 %v11763_v50, %v11908_v15 }
 0x1f1   :  { %v5519_v11 = vsel %vm5231_vm4, %v4853_v54, 0.0  ;;  %v2841_v37 = vadd.f32 %v11763_v50, %v2840_v43  ;;  %8671 = vmatprep.mubr.msk.f32.mxu0 %vm553_vm1, %v274_v28  ;;  %v6082_v28 = vadd.f32 %v6081_v31, %v6080_v38  ;;  %v6083_v15 = vsel %vm5231_vm4, %v5115_v2, 0.0 }
 0x1f2   :  { %v5520_v52 = vadd.f32 %v5519_v11, %v5518_v6  ;;  %v4856_v63 = vmax.f32 %v2846_v34, 0.0  ;;  %v5118_v40 = vmax.f32 %v4156_v9, 0.0  ;;  %v12062_v16 = vpop.f32.mrb[134].mxu1  ;;  %v278_v6 = vld [vmem:[%s13270_s0 + $0x7c0] sm:$0xff]  ;;  %v5117_v43 = vmax.f32 %v4151_v25, 0.0 }
 0x1f3   :  { %v4855_v23 = vmax.f32 %v2841_v37, 0.0  ;;  %v8514_v53 = vpop.f32.mrb[138].mxu0  ;;  %v6084_v34 = vadd.f32 %v6083_v15, %v6082_v28  ;;  %v12067_v31 = vpop.f32.mrb[135].mxu1  ;;  %v4176_v15 = vadd.f32 %v11763_v50, %v11961_v56  ;;  %v281_v56 = vld [vmem:[%s13270_s0 + $0x7d8] sm:$0xff] }
 0x1f4   :  { %v5525_v14 = vsel %vm5231_vm4, %v4856_v63, 0.0  ;;  %v5522_v5 = vadd.f32 %v5521_v62, %v5520_v52  ;;  %v2856_v20 = vadd.f32 %v11763_v50, %v8514_v53  ;;  %v2850_v19 = vpop.f32.mrb[139].mxu0  ;;  %8672 = vmatmul.mubr.msk.f32.gmra.mrb[244].mxu0 %vm553_vm1, %v275_v35  ;;  %v6089_v37 = vsel %vm5231_vm4, %v5118_v40, 0.0 }
 0x1f5   :  { %v5523_v48 = vsel %vm5231_vm4, %v4855_v23, 0.0  ;;  %v2851_v54 = vadd.f32 %v11763_v50, %v2850_v19  ;;  %8674 = vmatprep.mubr.msk.f32.mxu0 %vm553_vm1, %v276_v7  ;;  %v4166_v35 = vadd.f32 %v11763_v50, %v11930_v29  ;;  %v6086_v23 = vadd.f32 %v6085_v17, %v6084_v34  ;;  %v279_v29 = vld [vmem:[%s13270_s0 + $0x7c8] sm:$0xff]  ;;  %v280_v17 = vld [vmem:[%s13270_s0 + $0x7d0] sm:$0xff] }
 0x1f6   :  { %v5524_v26 = vadd.f32 %v5523_v48, %v5522_v5  ;;  %v4858_v60 = vmax.f32 %v2856_v20, 0.0  ;;  %v6087_v42 = vsel %vm5231_vm4, %v5117_v43, 0.0  ;;  %v12084_v25 = vpop.f32.mrb[136].mxu1  ;;  %v5119_v19 = vmax.f32 %v4161_v39, 0.0 }
 0x1f7   :  { %v4857_v62 = vmax.f32 %v2851_v54, 0.0  ;;  %v8517_v11 = vpop.f32.mrb[140].mxu0  ;;  %v5120_v9 = vmax.f32 %v4166_v35, 0.0  ;;  %v6088_v20 = vadd.f32 %v6087_v42, %v6086_v23  ;;  %v12089_v28 = vpop.f32.mrb[137].mxu1  ;;  %v4171_v40 = vadd.f32 %v11763_v50, %v11968_v1 }
 0x1f8   :  { %v5529_v52 = vsel %vm5231_vm4, %v4858_v60, 0.0  ;;  %v5526_v63 = vadd.f32 %v5525_v14, %v5524_v26  ;;  %v2866_v7 = vadd.f32 %v11763_v50, %v8517_v11  ;;  %v2860_v38 = vpop.f32.mrb[141].mxu0  ;;  %8675 = vmatmul.mubr.msk.f32.gmra.mrb[246].mxu0 %vm553_vm1, %v277_v22  ;;  %v6091_v1 = vsel %vm5231_vm4, %v5119_v19, 0.0 }
 0x1f9   :  { %v5527_v53 = vsel %vm5231_vm4, %v4857_v62, 0.0  ;;  %v2861_v2 = vadd.f32 %v11763_v50, %v2860_v38  ;;  %8677 = vmatprep.mubr.msk.f32.mxu0 %vm553_vm1, %v278_v6  ;;  %v6093_v22 = vsel %vm5231_vm4, %v5120_v9, 0.0  ;;  %v6090_v43 = vadd.f32 %v6089_v37, %v6088_v20  ;;  %v282_v37 = vld [vmem:[%s13270_s0 + $0x7e0] sm:$0xff] }
 0x1fa   :  { %v5528_v14 = vadd.f32 %v5527_v53, %v5526_v63  ;;  %v4860_v5 = vmax.f32 %v2866_v7, 0.0  ;;  %v5122_v35 = vmax.f32 %v4176_v15, 0.0  ;;  %v12106_v39 = vpop.f32.mrb[138].mxu1  ;;  %v5121_v38 = vmax.f32 %v4171_v40, 0.0 }
 0x1fb   :  { %v4859_v48 = vmax.f32 %v2861_v2, 0.0  ;;  %v8520_v54 = vpop.f32.mrb[142].mxu0  ;;  %v6092_v7 = vadd.f32 %v6091_v1, %v6090_v43  ;;  %v12111_v23 = vpop.f32.mrb[139].mxu1  ;;  %v4186_v42 = vadd.f32 %v11763_v50, %v11991_v45  ;;  %v4181_v9 = vadd.f32 %v11763_v50, %v11998_v44  ;;  %v283_v45 = vld [vmem:[%s13270_s0 + $0x7e8] sm:$0xff] }
 0x1fc   :  { %v5533_v26 = vsel %vm5231_vm4, %v4860_v5, 0.0  ;;  %v5530_v60 = vadd.f32 %v5529_v52, %v5528_v14  ;;  %v2876_v6 = vadd.f32 %v11763_v50, %v8520_v54  ;;  %v2870_v34 = vpop.f32.mrb[143].mxu0  ;;  %8678 = vmatmul.mubr.msk.f32.gmra.mrb[248].mxu0 %vm553_vm1, %v279_v29  ;;  %v6097_v29 = vsel %vm5231_vm4, %v5122_v35, 0.0 }
 0x1fd   :  { %v5531_v62 = vsel %vm5231_vm4, %v4859_v48, 0.0  ;;  %v2871_v11 = vadd.f32 %v11763_v50, %v2870_v34  ;;  %8680 = vmatprep.mubr.msk.f32.mxu0 %vm553_vm1, %v280_v17  ;;  %v6094_v19 = vadd.f32 %v6093_v22, %v6092_v7  ;;  %v6095_v44 = vsel %vm5231_vm4, %v5121_v38, 0.0  ;;  %v284_v22 = vld [vmem:[%s13270_s0 + $0x7f0] sm:$0xff] }
 0x1fe   :  { %v5532_v52 = vadd.f32 %v5531_v62, %v5530_v60  ;;  %v4862_v63 = vmax.f32 %v2876_v6, 0.0  ;;  %v5124_v15 = vmax.f32 %v4186_v42, 0.0  ;;  %v12128_v40 = vpop.f32.mrb[140].mxu1  ;;  %v5123_v34 = vmax.f32 %v4181_v9, 0.0 }
 0x1ff   :  { %v4861_v53 = vmax.f32 %v2871_v11, 0.0  ;;  %v8523_v2 = vpop.f32.mrb[144].mxu0  ;;  %v6096_v6 = vadd.f32 %v6095_v44, %v6094_v19  ;;  %v12133_v43 = vpop.f32.mrb[141].mxu1  ;;  %v4196_v1 = vadd.f32 %v11763_v50, %v12016_v51  ;;  %v4191_v35 = vadd.f32 %v11763_v50, %v12022_v59  ;;  %v285_v51 = vld [vmem:[%s13270_s0 + $0x7f8] sm:$0xff] }
 0x200   :  { %v5537_v14 = vsel %vm5231_vm4, %v4862_v63, 0.0  ;;  %v5534_v5 = vadd.f32 %v5533_v26, %v5532_v52  ;;  %v2886_v17 = vadd.f32 %v11763_v50, %v8523_v2  ;;  %v2880_v20 = vpop.f32.mrb[145].mxu0  ;;  %8681 = vmatmul.mubr.msk.f32.gmra.mrb[250].mxu0 %vm553_vm1, %v281_v56  ;;  %v6101_v56 = vsel %vm5231_vm4, %v5124_v15, 0.0 }
 0x201   :  { %v5535_v48 = vsel %vm5231_vm4, %v4861_v53, 0.0  ;;  %v2881_v54 = vadd.f32 %v11763_v50, %v2880_v20  ;;  %8683 = vmatprep.mubr.msk.f32.mxu0 %vm553_vm1, %v282_v37  ;;  %v6098_v38 = vadd.f32 %v6097_v29, %v6096_v6  ;;  %v6099_v59 = vsel %vm5231_vm4, %v5123_v34, 0.0  ;;  %v286_v29 = vld [vmem:[%s13270_s0 + $0x800] sm:$0xff] }
 0x202   :  { %v5536_v26 = vadd.f32 %v5535_v48, %v5534_v5  ;;  %v4864_v60 = vmax.f32 %v2886_v17, 0.0  ;;  %v5126_v42 = vmax.f32 %v4196_v1, 0.0  ;;  %v12150_v9 = vpop.f32.mrb[142].mxu1  ;;  %v5125_v20 = vmax.f32 %v4191_v35, 0.0 }
 0x203   :  { %v4863_v62 = vmax.f32 %v2881_v54, 0.0  ;;  %v8526_v11 = vpop.f32.mrb[146].mxu0  ;;  %v6100_v17 = vadd.f32 %v6099_v59, %v6098_v38  ;;  %v12155_v19 = vpop.f32.mrb[143].mxu1  ;;  %v4206_v44 = vadd.f32 %v11763_v50, %v12040_v41  ;;  %v4201_v15 = vadd.f32 %v11763_v50, %v12046_v24  ;;  %v287_v41 = vld [vmem:[%s13270_s0 + $0x808] sm:$0xff] }
 0x204   :  { %v5541_v52 = vsel %vm5231_vm4, %v4864_v60, 0.0  ;;  %v5538_v63 = vadd.f32 %v5537_v14, %v5536_v26  ;;  %v2896_v37 = vadd.f32 %v11763_v50, %v8526_v11  ;;  %v2890_v7 = vpop.f32.mrb[147].mxu0  ;;  %8684 = vmatmul.mubr.msk.f32.gmra.mrb[252].mxu0 %vm553_vm1, %v283_v45  ;;  %v6105_v45 = vsel %vm5231_vm4, %v5126_v42, 0.0 }
 0x205   :  { %v5539_v53 = vsel %vm5231_vm4, %v4863_v62, 0.0  ;;  %v2891_v2 = vadd.f32 %v11763_v50, %v2890_v7  ;;  %8686 = vmatprep.mubr.msk.f32.mxu0 %vm553_vm1, %v284_v22  ;;  %v6102_v34 = vadd.f32 %v6101_v56, %v6100_v17  ;;  %v6103_v24 = vsel %vm5231_vm4, %v5125_v20, 0.0  ;;  %v288_v56 = vld [vmem:[%s13270_s0 + $0x810] sm:$0xff] }
 0x206   :  { %v5540_v14 = vadd.f32 %v5539_v53, %v5538_v63  ;;  %v4866_v5 = vmax.f32 %v2896_v37, 0.0  ;;  %v5128_v1 = vmax.f32 %v4206_v44, 0.0  ;;  %v12172_v35 = vpop.f32.mrb[144].mxu1  ;;  %v5127_v7 = vmax.f32 %v4201_v15, 0.0 }
 0x207   :  { %v4865_v48 = vmax.f32 %v2891_v2, 0.0  ;;  %v8529_v54 = vpop.f32.mrb[148].mxu0  ;;  %v6104_v37 = vadd.f32 %v6103_v24, %v6102_v34  ;;  %v12177_v38 = vpop.f32.mrb[145].mxu1  ;;  %v4216_v59 = vadd.f32 %v11763_v50, %v12062_v16  ;;  %v4211_v42 = vadd.f32 %v11763_v50, %v12067_v31  ;;  %v289_v16 = vld [vmem:[%s13270_s0 + $0x818] sm:$0xff] }
 0x208   :  { %v5545_v26 = vsel %vm5231_vm4, %v4866_v5, 0.0  ;;  %v5542_v60 = vadd.f32 %v5541_v52, %v5540_v14  ;;  %v2906_v22 = vadd.f32 %v11763_v50, %v8529_v54  ;;  %v2900_v6 = vpop.f32.mrb[149].mxu0  ;;  %8687 = vmatmul.mubr.msk.f32.gmra.mrb[254].mxu0 %vm553_vm1, %v285_v51  ;;  %v6109_v51 = vsel %vm5231_vm4, %v5128_v1, 0.0 }
 0x209   :  { %v5543_v62 = vsel %vm5231_vm4, %v4865_v48, 0.0  ;;  %v2901_v11 = vadd.f32 %v11763_v50, %v2900_v6  ;;  %8689 = vmatprep.mubr.msk.f32.mxu0 %vm553_vm1, %v286_v29  ;;  %v6106_v20 = vadd.f32 %v6105_v45, %v6104_v37  ;;  %v6107_v31 = vsel %vm5231_vm4, %v5127_v7, 0.0  ;;  %v290_v45 = vld [vmem:[%s13270_s0 + $0x820] sm:$0xff] }
 0x20a   :  { %v5544_v52 = vadd.f32 %v5543_v62, %v5542_v60  ;;  %v4868_v63 = vmax.f32 %v2906_v22, 0.0  ;;  %v5130_v44 = vmax.f32 %v4216_v59, 0.0  ;;  %v12194_v15 = vpop.f32.mrb[146].mxu1  ;;  %v5129_v6 = vmax.f32 %v4211_v42, 0.0 }
 0x20b   :  { %v4867_v53 = vmax.f32 %v2901_v11, 0.0  ;;  %v8532_v2 = vpop.f32.mrb[150].mxu0  ;;  %v6108_v22 = vadd.f32 %v6107_v31, %v6106_v20  ;;  %v12199_v34 = vpop.f32.mrb[147].mxu1  ;;  %v4226_v24 = vadd.f32 %v11763_v50, %v12084_v25  ;;  %v4221_v1 = vadd.f32 %v11763_v50, %v12089_v28  ;;  %v291_v25 = vld [vmem:[%s13270_s0 + $0x828] sm:$0xff] }
 0x20c   :  { %v5549_v14 = vsel %vm5231_vm4, %v4868_v63, 0.0  ;;  %v5546_v5 = vadd.f32 %v5545_v26, %v5544_v52  ;;  %v2916_v29 = vadd.f32 %v11763_v50, %v8532_v2  ;;  %v2910_v17 = vpop.f32.mrb[151].mxu0  ;;  %8690 = vmatmul.mubr.msk.f32.gmra.mrb[0].mxu0 %vm553_vm1, %v287_v41  ;;  %v6113_v41 = vsel %vm5231_vm4, %v5130_v44, 0.0 }
 0x20d   :  { %v5547_v48 = vsel %vm5231_vm4, %v4867_v53, 0.0  ;;  %v2911_v54 = vadd.f32 %v11763_v50, %v2910_v17  ;;  %8692 = vmatprep.mubr.msk.f32.mxu0 %vm553_vm1, %v288_v56  ;;  %v6110_v7 = vadd.f32 %v6109_v51, %v6108_v22  ;;  %v6111_v28 = vsel %vm5231_vm4, %v5129_v6, 0.0  ;;  %v292_v51 = vld [vmem:[%s13270_s0 + $0x830] sm:$0xff] }
 0x20e   :  { %v5548_v26 = vadd.f32 %v5547_v48, %v5546_v5  ;;  %v4870_v60 = vmax.f32 %v2916_v29, 0.0  ;;  %v5132_v59 = vmax.f32 %v4226_v24, 0.0  ;;  %v12216_v42 = vpop.f32.mrb[148].mxu1  ;;  %v5131_v17 = vmax.f32 %v4221_v1, 0.0 }
 0x20f   :  { %v4869_v62 = vmax.f32 %v2911_v54, 0.0  ;;  %v8535_v11 = vpop.f32.mrb[152].mxu0  ;;  %v6112_v29 = vadd.f32 %v6111_v28, %v6110_v7  ;;  %v12221_v20 = vpop.f32.mrb[149].mxu1  ;;  %v4236_v31 = vadd.f32 %v11763_v50, %v12106_v39  ;;  %v4231_v44 = vadd.f32 %v11763_v50, %v12111_v23  ;;  %v293_v39 = vld [vmem:[%s13270_s0 + $0x838] sm:$0xff] }
 0x210   :  { %v5553_v52 = vsel %vm5231_vm4, %v4870_v60, 0.0  ;;  %v5550_v63 = vadd.f32 %v5549_v14, %v5548_v26  ;;  %v2926_v56 = vadd.f32 %v11763_v50, %v8535_v11  ;;  %v2920_v37 = vpop.f32.mrb[153].mxu0  ;;  %8693 = vmatmul.mubr.msk.f32.gmra.mrb[2].mxu0 %vm553_vm1, %v289_v16  ;;  %v6117_v16 = vsel %vm5231_vm4, %v5132_v59, 0.0 }
 0x211   :  { %v5551_v53 = vsel %vm5231_vm4, %v4869_v62, 0.0  ;;  %v2921_v2 = vadd.f32 %v11763_v50, %v2920_v37  ;;  %8695 = vmatprep.mubr.msk.f32.mxu0 %vm553_vm1, %v290_v45  ;;  %v6114_v6 = vadd.f32 %v6113_v41, %v6112_v29  ;;  %v6115_v23 = vsel %vm5231_vm4, %v5131_v17, 0.0  ;;  %v294_v41 = vld [vmem:[%s13270_s0 + $0x840] sm:$0xff] }
 0x212   :  { %v5552_v14 = vadd.f32 %v5551_v53, %v5550_v63  ;;  %v4872_v5 = vmax.f32 %v2926_v56, 0.0  ;;  %v5134_v24 = vmax.f32 %v4236_v31, 0.0  ;;  %v12238_v1 = vpop.f32.mrb[150].mxu1  ;;  %v5133_v37 = vmax.f32 %v4231_v44, 0.0 }
 0x213   :  { %v4871_v48 = vmax.f32 %v2921_v2, 0.0  ;;  %v8538_v54 = vpop.f32.mrb[154].mxu0  ;;  %v6116_v56 = vadd.f32 %v6115_v23, %v6114_v6  ;;  %v12243_v7 = vpop.f32.mrb[151].mxu1  ;;  %v4246_v28 = vadd.f32 %v11763_v50, %v12128_v40  ;;  %v4241_v59 = vadd.f32 %v11763_v50, %v12133_v43  ;;  %v295_v40 = vld [vmem:[%s13270_s0 + $0x848] sm:$0xff] }
 0x214   :  { %v5557_v26 = vsel %vm5231_vm4, %v4872_v5, 0.0  ;;  %v5554_v60 = vadd.f32 %v5553_v52, %v5552_v14  ;;  %v2936_v45 = vadd.f32 %v11763_v50, %v8538_v54  ;;  %v2930_v22 = vpop.f32.mrb[155].mxu0  ;;  %8696 = vmatmul.mubr.msk.f32.gmra.mrb[4].mxu0 %vm553_vm1, %v291_v25  ;;  %v6121_v25 = vsel %vm5231_vm4, %v5134_v24, 0.0 }
 0x215   :  { %v5555_v62 = vsel %vm5231_vm4, %v4871_v48, 0.0  ;;  %v2931_v11 = vadd.f32 %v11763_v50, %v2930_v22  ;;  %8698 = vmatprep.mubr.msk.f32.mxu0 %vm553_vm1, %v292_v51  ;;  %v6118_v17 = vadd.f32 %v6117_v16, %v6116_v56  ;;  %v6119_v43 = vsel %vm5231_vm4, %v5133_v37, 0.0  ;;  %v296_v16 = vld [vmem:[%s13270_s0 + $0x850] sm:$0xff] }
 0x216   :  { %v5556_v52 = vadd.f32 %v5555_v62, %v5554_v60  ;;  %v4874_v63 = vmax.f32 %v2936_v45, 0.0  ;;  %v5136_v31 = vmax.f32 %v4246_v28, 0.0  ;;  %v12260_v44 = vpop.f32.mrb[152].mxu1  ;;  %v5135_v22 = vmax.f32 %v4241_v59, 0.0 }
 0x217   :  { %v4873_v53 = vmax.f32 %v2931_v11, 0.0  ;;  %v8541_v2 = vpop.f32.mrb[156].mxu0  ;;  %v6120_v45 = vadd.f32 %v6119_v43, %v6118_v17  ;;  %v12265_v6 = vpop.f32.mrb[153].mxu1  ;;  %v4256_v23 = vadd.f32 %v11763_v50, %v12150_v9  ;;  %v4251_v24 = vadd.f32 %v11763_v50, %v12155_v19 }
 0x218   :  { %v5561_v14 = vsel %vm5231_vm4, %v4874_v63, 0.0  ;;  %v5558_v5 = vadd.f32 %v5557_v26, %v5556_v52  ;;  %v2946_v51 = vadd.f32 %v11763_v50, %v8541_v2  ;;  %v2940_v29 = vpop.f32.mrb[157].mxu0  ;;  %8699 = vmatmul.mubr.msk.f32.gmra.mrb[6].mxu0 %vm553_vm1, %v293_v39  ;;  %v6130_v39 = vsel %vm5231_vm4, %v5136_v31, 0.0 }
 0x219   :  { %v5559_v48 = vsel %vm5231_vm4, %v4873_v53, 0.0  ;;  %v2941_v54 = vadd.f32 %v11763_v50, %v2940_v29  ;;  %8701 = vmatprep.mubr.msk.f32.mxu0 %vm553_vm1, %v294_v41  ;;  %v12275_v52 = vadd.f32 %v5297_v36, %v11901_v47  ;;  %v12279_v37 = vadd.f32 %v6121_v25, %v6120_v45  ;;  %v297_v47 = vld [vmem:[%s13270_s0 + $0x858] sm:$0xff] }
 0x21a   :  { %v5560_v26 = vadd.f32 %v5559_v48, %v5558_v5  ;;  %v4876_v60 = vmax.f32 %v2946_v51, 0.0  ;;  %v12284_v9 = vadd.f32 %v5366_v33, %v11979_v32  ;;  %v6129_v36 = vsel %vm5231_vm4, %v5135_v22, 0.0  ;;  %v12293_v2 = vpop.f32.mrb[154].mxu1  ;;  %v298_v32 = vld [vmem:[%s13270_s0 + $0x860] sm:$0xff]  ;;  %v299_v22 = vld [vmem:[%s13270_s0 + $0x868] sm:$0xff] }
 0x21b   :  { %v4875_v62 = vmax.f32 %v2941_v54, 0.0  ;;  %v8544_v11 = vpop.f32.mrb[158].mxu0  ;;  %13287 = vst [vmem:[#allocation8_spill] sm:$0xff] %v12279_v37  ;;  %v5435_v25 = vrot.slane %v12027_v8, 2  ;;  %v6131_v33 = vadd.f32 %v6130_v39, %v6129_v36  ;;  %v5138_v59 = vmax.f32 %v4256_v23, 0.0 }
 0x21c   :  { %v5562_v63 = vadd.f32 %v5561_v14, %v5560_v26  ;;  %v2956_v41 = vadd.f32 %v11763_v50, %v8544_v11  ;;  %v2950_v56 = vpop.f32.mrb[159].mxu0  ;;  %8702 = vmatmul.mubr.msk.f32.gmra.mrb[8].mxu0 %vm553_vm1, %v295_v40  ;;  %v5565_v14 = vsel %vm5231_vm4, %v4876_v60, 0.0  ;;  %v5137_v17 = vmax.f32 %v4251_v24, 0.0  ;;  %v12306_v40 = vld [vmem:[%s13272_s2] ss:$0 sm:$0xff] }
 0x21d   :  { %v5563_v19 = vsel %vm5231_vm4, %v4875_v62, 0.0  ;;  %v2951_v53 = vadd.f32 %v11763_v50, %v2950_v56  ;;  %8704 = vmatprep.mubr.msk.f32.mxu0 %vm553_vm1, %v296_v16  ;;  %v12299_v50 = vpop.f32.mrb[155].mxu1  ;;  %v5299_v48 = vrot.slane %v12275_v52, 1  ;;  %v4266_v26 = vadd.f32 %v12306_v40, %v12172_v35  ;;  %v300_v35 = vld [vmem:[%s13270_s0 + $0x870] sm:$0xff] }
 0x21e   :  { %v5564_v28 = vadd.f32 %v5563_v19, %v5562_v63  ;;  %v4878_v5 = vmax.f32 %v2956_v41, 0.0  ;;  %v5368_v60 = vrot.slane %v12284_v9, 1  ;;  %v6132_v62 = vsel %vm5231_vm4, %v5137_v17, 0.0  ;;  %v12320_v11 = vpop.f32.mrb[156].mxu1 }
 0x21f   :  { %v4877_v51 = vmax.f32 %v2951_v53, 0.0  ;;  %v8547_v29 = vpop.f32.mrb[160].mxu0  ;;  %v6134_v24 = vsel %vm5231_vm4, %v5138_v59, 0.0  ;;  %v6133_v63 = vadd.f32 %v6132_v62, %v6131_v33  ;;  %v12326_v41 = vpop.f32.mrb[157].mxu1  ;;  %v5436_v56 = vadd.f32 %v5435_v25, %v12027_v8 }
 0x220   :  { %v5566_v54 = vadd.f32 %v5565_v14, %v5564_v28  ;;  %v2966_v43 = vadd.f32 %v12306_v40, %v8547_v29  ;;  %v2960_v31 = vpop.f32.mrb[161].mxu0  ;;  %8705 = vmatmul.mubr.msk.f32.gmra.mrb[10].mxu0 %vm553_vm1, %v297_v47  ;;  %v5569_v19 = vsel %vm5231_vm4, %v4878_v5, 0.0  ;;  %v4261_v36 = vadd.f32 %v12306_v40, %v12177_v38  ;;  %v301_v38 = vld [vmem:[%s13270_s0 + $0x878] sm:$0xff] }
 0x221   :  { %v5567_v16 = vsel %vm5231_vm4, %v4877_v51, 0.0  ;;  %v2961_v45 = vadd.f32 %v12306_v40, %v2960_v31  ;;  %8707 = vmatprep.mubr.msk.f32.mxu0 %vm553_vm1, %v298_v32  ;;  %v5140_v33 = vmax.f32 %v4266_v26, 0.0  ;;  %v6135_v5 = vadd.f32 %v6134_v24, %v6133_v63 }
 0x222   :  { %v5568_v39 = vadd.f32 %v5567_v16, %v5566_v54  ;;  %v4880_v23 = vmax.f32 %v2966_v43, 0.0  ;;  %v5139_v25 = vmax.f32 %v4261_v36, 0.0  ;;  %v12343_v29 = vpop.f32.mrb[158].mxu1  ;;  %v302_v43 = vld [vmem:[%s13270_s0 + $0x880] sm:$0xff]  ;;  %v4276_v31 = vadd.f32 %v12306_v40, %v12194_v15 }
 0x223   :  { %v4879_v53 = vmax.f32 %v2961_v45, 0.0  ;;  %v8550_v47 = vpop.f32.mrb[162].mxu0  ;;  %v12350_v26 = vpop.f32.mrb[159].mxu1  ;;  %v4271_v62 = vadd.f32 %v12306_v40, %v12199_v34  ;;  %v6138_v15 = vsel %vm5231_vm4, %v5140_v33, 0.0  ;;  %v12362_v63 = vadd.f32 %v5368_v60, %v12284_v9  ;;  %v303_v34 = vld [vmem:[%s13270_s0 + $0x888] sm:$0xff]  ;;  %v304_v9 = vld [vmem:[%s13270_s0 + $0x890] sm:$0xff] }
 0x224   :  { %v12332_v28 = vadd.f32 %v5569_v19, %v5568_v39  ;;  %v5578_v32 = vsel %vm5231_vm4, %v4880_v23, 0.0  ;;  %v2976_v14 = vadd.f32 %v12306_v40, %v8550_v47  ;;  %v2970_v51 = vpop.f32.mrb[163].mxu0  ;;  %8708 = vmatmul.mubr.msk.f32.gmra.mrb[12].mxu0 %vm553_vm1, %v299_v22  ;;  %v6136_v22 = vsel %vm5231_vm4, %v5139_v25, 0.0 }
 0x225   :  { %v5577_v59 = vsel %vm5231_vm4, %v4879_v53, 0.0  ;;  %v2971_v8 = vadd.f32 %v12306_v40, %v2970_v51  ;;  %8710 = vmatprep.mubr.msk.f32.mxu0 %vm553_vm1, %v300_v35  ;;  %v12356_v39 = vadd.f32 %v5299_v48, %v12275_v52  ;;  %v5437_v23 = vrot.slane %v5436_v56, 1 }
 0x226   :  { %v5579_v17 = vadd.f32 %v5578_v32, %v5577_v59  ;;  %v4882_v54 = vmax.f32 %v2976_v14, 0.0  ;;  %v6137_v52 = vadd.f32 %v6136_v22, %v6135_v5  ;;  %v12370_v48 = vpop.f32.mrb[160].mxu1  ;;  %v5142_v60 = vmax.f32 %v4276_v31, 0.0 }
 0x227   :  { %v4881_v16 = vmax.f32 %v2971_v8, 0.0  ;;  %v8553_v45 = vpop.f32.mrb[164].mxu0  ;;  %v12376_v14 = vpop.f32.mrb[161].mxu1  ;;  %v5141_v59 = vmax.f32 %v4271_v62, 0.0  ;;  %v12380_v25 = vadd.f32 %v5437_v23, %v5436_v56  ;;  %v5502_v5 = vrot.slane %v11947_v12, 4 }
 0x228   :  { %v2986_v35 = vadd.f32 %v12306_v40, %v8553_v45  ;;  %v2980_v24 = vpop.f32.mrb[165].mxu0  ;;  %8711 = vmatmul.mubr.msk.f32.gmra.mrb[14].mxu0 %vm553_vm1, %v301_v38  ;;  %v5582_v47 = vsel %vm5231_vm4, %v4882_v54, 0.0  ;;  %v6139_v8 = vadd.f32 %v6138_v15, %v6137_v52  ;;  %v4286_v38 = vadd.f32 %v12306_v40, %v12216_v42  ;;  %v305_v42 = vld [vmem:[%s13270_s0 + $0x898] sm:$0xff] }
 0x229   :  { %v5580_v19 = vsel %vm5231_vm4, %v4881_v16, 0.0  ;;  %v2981_v53 = vadd.f32 %v12306_v40, %v2980_v24  ;;  %8713 = vmatprep.mubr.msk.f32.mxu0 %vm553_vm1, %v302_v43  ;;  %v6140_v56 = vsel %vm5231_vm4, %v5141_v59, 0.0  ;;  %v4281_v52 = vadd.f32 %v12306_v40, %v12221_v20 }
 0x22a   :  { %v5581_v36 = vadd.f32 %v5580_v19, %v5579_v17  ;;  %v4884_v32 = vmax.f32 %v2986_v35, 0.0  ;;  %v5144_v45 = vmax.f32 %v4286_v38, 0.0  ;;  %v12392_v22 = vpop.f32.mrb[162].mxu1  ;;  %v6142_v35 = vsel %vm5231_vm4, %v5142_v60, 0.0 }
 0x22b   :  { %v4883_v51 = vmax.f32 %v2981_v53, 0.0  ;;  %v8556_v33 = vpop.f32.mrb[166].mxu0  ;;  %v6141_v24 = vadd.f32 %v6140_v56, %v6139_v8  ;;  %v12395_v15 = vpop.f32.mrb[163].mxu1  ;;  %v5143_v8 = vmax.f32 %v4281_v52, 0.0  ;;  %v4306_v56 = vadd.f32 %v12306_v40, %v12260_v44 }
 0x22c   :  { %v5583_v17 = vadd.f32 %v5582_v47, %v5581_v36  ;;  %v2996_v54 = vadd.f32 %v12306_v40, %v8556_v33  ;;  %v2990_v43 = vpop.f32.mrb[167].mxu0  ;;  %8714 = vmatmul.mubr.msk.f32.gmra.mrb[16].mxu0 %vm553_vm1, %v303_v34  ;;  %v5586_v19 = vsel %vm5231_vm4, %v4884_v32, 0.0  ;;  %v4296_v47 = vadd.f32 %v12306_v40, %v12238_v1 }
 0x22d   :  { %v5584_v31 = vsel %vm5231_vm4, %v4883_v51, 0.0  ;;  %v2991_v16 = vadd.f32 %v12306_v40, %v2990_v43  ;;  %8716 = vmatprep.mubr.msk.f32.mxu0 %vm553_vm1, %v304_v9  ;;  %v12403_v36 = vadd.f32 %v5502_v5, %v11947_v12  ;;  %v6146_v33 = vsel %vm5231_vm4, %v5144_v45, 0.0 }
 0x22e   :  { %v5585_v62 = vadd.f32 %v5584_v31, %v5583_v17  ;;  %v4886_v23 = vmax.f32 %v2996_v54, 0.0  ;;  %v6143_v20 = vadd.f32 %v6142_v35, %v6141_v24  ;;  %v12410_v38 = vpop.f32.mrb[164].mxu1  ;;  %v5146_v17 = vmax.f32 %v4296_v47, 0.0 }
 0x22f   :  { %v4885_v53 = vmax.f32 %v2991_v16, 0.0  ;;  %v8559_v34 = vpop.f32.mrb[168].mxu0  ;;  %v12413_v54 = vpop.f32.mrb[165].mxu1  ;;  %v6144_v16 = vsel %vm5231_vm4, %v5143_v8, 0.0  ;;  %v5148_v44 = vmax.f32 %v4306_v56, 0.0 }
 0x230   :  { %v5587_v9 = vadd.f32 %v5586_v19, %v5585_v62  ;;  %v3006_v51 = vadd.f32 %v12306_v40, %v8559_v34  ;;  %v3000_v60 = vpop.f32.mrb[169].mxu0  ;;  %8717 = vmatmul.mubr.msk.f32.gmra.mrb[18].mxu0 %vm553_vm1, %v305_v42  ;;  %v5590_v1 = vsel %vm5231_vm4, %v4886_v23, 0.0  ;;  %v4291_v42 = vadd.f32 %v12306_v40, %v12243_v7 }
 0x231   :  { %v5588_v32 = vsel %vm5231_vm4, %v4885_v53, 0.0  ;;  %v3001_v59 = vadd.f32 %v12306_v40, %v3000_v60  ;;  %v6145_v24 = vadd.f32 %v6144_v16, %v6143_v20  ;;  %v6150_v34 = vsel %vm5231_vm4, %v5146_v17, 0.0 }
 0x232   :  { %v5589_v12 = vadd.f32 %v5588_v32, %v5587_v9  ;;  %v4888_v5 = vmax.f32 %v3006_v51, 0.0  ;;  %v5145_v52 = vmax.f32 %v4291_v42, 0.0  ;;  %v12425_v47 = vpop.f32.mrb[166].mxu1  ;;  %v4301_v20 = vadd.f32 %v12306_v40, %v12265_v6 }
 0x233   :  { %v4887_v43 = vmax.f32 %v3001_v59, 0.0  ;;  %v8562_v31 = vpop.f32.mrb[170].mxu0  ;;  %v6147_v51 = vadd.f32 %v6146_v33, %v6145_v24  ;;  %v12427_v60 = vpop.f32.mrb[167].mxu1  ;;  %v6154_v42 = vsel %vm5231_vm4, %v5148_v44, 0.0 }
 0x234   :  { %v5594_v45 = vsel %vm5231_vm4, %v4888_v5, 0.0  ;;  %v5591_v62 = vadd.f32 %v5590_v1, %v5589_v12  ;;  %v3016_v23 = vadd.f32 %v12306_v40, %v8562_v31  ;;  %v3010_v35 = vpop.f32.mrb[171].mxu0  ;;  %v6148_v8 = vsel %vm5231_vm4, %v5145_v52, 0.0 }
 0x235   :  { %v5592_v19 = vsel %vm5231_vm4, %v4887_v43, 0.0  ;;  %v3011_v53 = vadd.f32 %v12306_v40, %v3010_v35  ;;  %v4316_v1 = vadd.f32 %v12306_v40, %v12293_v2  ;;  %v6149_v33 = vadd.f32 %v6148_v8, %v6147_v51 }
 0x236   :  { %v5593_v7 = vadd.f32 %v5592_v19, %v5591_v62  ;;  %v4890_v9 = vmax.f32 %v3016_v23, 0.0  ;;  %v5147_v56 = vmax.f32 %v4301_v20, 0.0  ;;  %v12439_v62 = vpop.f32.mrb[168].mxu1  ;;  %v4311_v52 = vadd.f32 %v12306_v40, %v12299_v50 }
 0x237   :  { %v4889_v32 = vmax.f32 %v3011_v53, 0.0  ;;  %v8565_v59 = vpop.f32.mrb[172].mxu0  ;;  %v6151_v35 = vadd.f32 %v6150_v34, %v6149_v33  ;;  %v5150_v2 = vmax.f32 %v4316_v1, 0.0  ;;  %v12441_v24 = vpop.f32.mrb[169].mxu1 }
 0x238   :  { %v5598_v12 = vsel %vm5231_vm4, %v4890_v9, 0.0  ;;  %v5595_v5 = vadd.f32 %v5594_v45, %v5593_v7  ;;  %v3026_v17 = vadd.f32 %v12306_v40, %v8565_v59  ;;  %v3020_v43 = vpop.f32.mrb[173].mxu0  ;;  %v6152_v53 = vsel %vm5231_vm4, %v5147_v56, 0.0 }
 0x239   :  { %v5596_v31 = vsel %vm5231_vm4, %v4889_v32, 0.0  ;;  %v3021_v16 = vadd.f32 %v12306_v40, %v3020_v43  ;;  %v4326_v7 = vadd.f32 %v12306_v40, %v12320_v11  ;;  %v6153_v34 = vadd.f32 %v6152_v53, %v6151_v35 }
 0x23a   :  { %v5597_v6 = vadd.f32 %v5596_v31, %v5595_v5  ;;  %v4892_v23 = vmax.f32 %v3026_v17, 0.0  ;;  %v6158_v20 = vsel %vm5231_vm4, %v5150_v2, 0.0  ;;  %v5149_v1 = vmax.f32 %v4311_v52, 0.0  ;;  %v12453_v5 = vpop.f32.mrb[170].mxu1 }
 0x23b   :  { %v4891_v45 = vmax.f32 %v3021_v16, 0.0  ;;  %v8568_v19 = vpop.f32.mrb[174].mxu0  ;;  %v6155_v43 = vadd.f32 %v6154_v42, %v6153_v34  ;;  %v5152_v11 = vmax.f32 %v4326_v7, 0.0  ;;  %v12455_v33 = vpop.f32.mrb[171].mxu1  ;;  %v4321_v56 = vadd.f32 %v12306_v40, %v12326_v41 }
 0x23c   :  { %v5602_v9 = vsel %vm5231_vm4, %v4892_v23, 0.0  ;;  %v5599_v51 = vadd.f32 %v5598_v12, %v5597_v6  ;;  %v3036_v44 = vadd.f32 %v12306_v40, %v8568_v19  ;;  %v3030_v32 = vpop.f32.mrb[175].mxu0  ;;  %v6156_v16 = vsel %vm5231_vm4, %v5149_v1, 0.0 }
 0x23d   :  { %v5600_v59 = vsel %vm5231_vm4, %v4891_v45, 0.0  ;;  %v3031_v8 = vadd.f32 %v12306_v40, %v3030_v32  ;;  %v4336_v6 = vadd.f32 %v12306_v40, %v12343_v29  ;;  %v6157_v42 = vadd.f32 %v6156_v16, %v6155_v43 }
 0x23e   :  { %v5601_v50 = vadd.f32 %v5600_v59, %v5599_v51  ;;  %v4894_v17 = vmax.f32 %v3036_v44, 0.0  ;;  %v6162_v52 = vsel %vm5231_vm4, %v5152_v11, 0.0  ;;  %v5151_v7 = vmax.f32 %v4321_v56, 0.0  ;;  %v12467_v51 = vpop.f32.mrb[172].mxu1 }
 0x23f   :  { %v4893_v12 = vmax.f32 %v3031_v8, 0.0  ;;  %v8571_v31 = vpop.f32.mrb[176].mxu0  ;;  %v6159_v32 = vadd.f32 %v6158_v20, %v6157_v42  ;;  %v5154_v29 = vmax.f32 %v4336_v6, 0.0  ;;  %v12469_v34 = vpop.f32.mrb[173].mxu1  ;;  %v4331_v1 = vadd.f32 %v12306_v40, %v12350_v26 }
 0x240   :  { %v5606_v23 = vsel %vm5231_vm4, %v4894_v17, 0.0  ;;  %v5603_v35 = vadd.f32 %v5602_v9, %v5601_v50  ;;  %v3046_v2 = vadd.f32 %v12306_v40, %v8571_v31  ;;  %v3040_v45 = vpop.f32.mrb[177].mxu0  ;;  %v6160_v8 = vsel %vm5231_vm4, %v5151_v7, 0.0 }
 0x241   :  { %v5604_v19 = vsel %vm5231_vm4, %v4893_v12, 0.0  ;;  %v3041_v53 = vadd.f32 %v12306_v40, %v3040_v45  ;;  %v4346_v50 = vadd.f32 %v12306_v40, %v12370_v48  ;;  %v6161_v20 = vadd.f32 %v6160_v8, %v6159_v32 }
 0x242   :  { %v5605_v41 = vadd.f32 %v5604_v19, %v5603_v35  ;;  %v4896_v44 = vmax.f32 %v3046_v2, 0.0  ;;  %v6166_v56 = vsel %vm5231_vm4, %v5154_v29, 0.0  ;;  %v5153_v6 = vmax.f32 %v4331_v1, 0.0  ;;  %v12481_v35 = vpop.f32.mrb[174].mxu1 }
 0x243   :  { %v4895_v9 = vmax.f32 %v3041_v53, 0.0  ;;  %v8574_v59 = vpop.f32.mrb[178].mxu0  ;;  %v6163_v45 = vadd.f32 %v6162_v52, %v6161_v20  ;;  %v5156_v48 = vmax.f32 %v4346_v50, 0.0  ;;  %v12483_v42 = vpop.f32.mrb[175].mxu1  ;;  %v4341_v7 = vadd.f32 %v12306_v40, %v12376_v14 }
 0x244   :  { %v5610_v17 = vsel %vm5231_vm4, %v4896_v44, 0.0  ;;  %v5607_v43 = vadd.f32 %v5606_v23, %v5605_v41  ;;  %v3056_v11 = vadd.f32 %v12306_v40, %v8574_v59  ;;  %v3050_v12 = vpop.f32.mrb[179].mxu0  ;;  %v6164_v53 = vsel %vm5231_vm4, %v5153_v6, 0.0 }
 0x245   :  { %v5608_v31 = vsel %vm5231_vm4, %v4895_v9, 0.0  ;;  %v3051_v16 = vadd.f32 %v12306_v40, %v3050_v12  ;;  %v4356_v41 = vadd.f32 %v12306_v40, %v12392_v22  ;;  %v6165_v52 = vadd.f32 %v6164_v53, %v6163_v45 }
 0x246   :  { %v5609_v26 = vadd.f32 %v5608_v31, %v5607_v43  ;;  %v4898_v2 = vmax.f32 %v3056_v11, 0.0  ;;  %v6170_v1 = vsel %vm5231_vm4, %v5156_v48, 0.0  ;;  %v5155_v50 = vmax.f32 %v4341_v7, 0.0  ;;  %v12495_v43 = vpop.f32.mrb[176].mxu1 }
 0x247   :  { %v4897_v23 = vmax.f32 %v3051_v16, 0.0  ;;  %v8577_v19 = vpop.f32.mrb[180].mxu0  ;;  %v6167_v12 = vadd.f32 %v6166_v56, %v6165_v52  ;;  %v5158_v22 = vmax.f32 %v4356_v41, 0.0  ;;  %v12497_v20 = vpop.f32.mrb[177].mxu1  ;;  %v4351_v6 = vadd.f32 %v12306_v40, %v12395_v15 }
 0x248   :  { %v5614_v44 = vsel %vm5231_vm4, %v4898_v2, 0.0  ;;  %v5611_v32 = vadd.f32 %v5610_v17, %v5609_v26  ;;  %v3066_v29 = vadd.f32 %v12306_v40, %v8577_v19  ;;  %v3060_v9 = vpop.f32.mrb[181].mxu0  ;;  %v6168_v16 = vsel %vm5231_vm4, %v5155_v50, 0.0 }
 0x249   :  { %v5612_v59 = vsel %vm5231_vm4, %v4897_v23, 0.0  ;;  %v3061_v8 = vadd.f32 %v12306_v40, %v3060_v9  ;;  %v4366_v26 = vadd.f32 %v12306_v40, %v12410_v38  ;;  %v6169_v56 = vadd.f32 %v6168_v16, %v6167_v12 }
 0x24a   :  { %v5613_v14 = vadd.f32 %v5612_v59, %v5611_v32  ;;  %v4900_v11 = vmax.f32 %v3066_v29, 0.0  ;;  %v6174_v7 = vsel %vm5231_vm4, %v5158_v22, 0.0  ;;  %v5157_v41 = vmax.f32 %v4351_v6, 0.0  ;;  %v12509_v32 = vpop.f32.mrb[178].mxu1 }
 0x24b   :  { %v4899_v17 = vmax.f32 %v3061_v8, 0.0  ;;  %v8580_v31 = vpop.f32.mrb[182].mxu0  ;;  %v6171_v9 = vadd.f32 %v6170_v1, %v6169_v56  ;;  %v5160_v38 = vmax.f32 %v4366_v26, 0.0  ;;  %v12511_v52 = vpop.f32.mrb[179].mxu1  ;;  %v4361_v50 = vadd.f32 %v12306_v40, %v12413_v54 }
 0x24c   :  { %v5618_v2 = vsel %vm5231_vm4, %v4900_v11, 0.0  ;;  %v5615_v45 = vadd.f32 %v5614_v44, %v5613_v14  ;;  %v3076_v48 = vadd.f32 %v12306_v40, %v8580_v31  ;;  %v3070_v23 = vpop.f32.mrb[183].mxu0  ;;  %v6172_v8 = vsel %vm5231_vm4, %v5157_v41, 0.0 }
 0x24d   :  { %v5616_v19 = vsel %vm5231_vm4, %v4899_v17, 0.0  ;;  %v3071_v53 = vadd.f32 %v12306_v40, %v3070_v23  ;;  %v4376_v14 = vadd.f32 %v12306_v40, %v12425_v47  ;;  %v6173_v1 = vadd.f32 %v6172_v8, %v6171_v9 }
 0x24e   :  { %v5617_v15 = vadd.f32 %v5616_v19, %v5615_v45  ;;  %v4902_v29 = vmax.f32 %v3076_v48, 0.0  ;;  %v6178_v6 = vsel %vm5231_vm4, %v5160_v38, 0.0  ;;  %v5159_v26 = vmax.f32 %v4361_v50, 0.0  ;;  %v12523_v45 = vpop.f32.mrb[180].mxu1 }
 0x24f   :  { %v4901_v44 = vmax.f32 %v3071_v53, 0.0  ;;  %v8583_v59 = vpop.f32.mrb[184].mxu0  ;;  %v6175_v23 = vadd.f32 %v6174_v7, %v6173_v1  ;;  %v5162_v47 = vmax.f32 %v4376_v14, 0.0  ;;  %v12525_v56 = vpop.f32.mrb[181].mxu1  ;;  %v4371_v41 = vadd.f32 %v12306_v40, %v12427_v60 }
 0x250   :  { %v5622_v11 = vsel %vm5231_vm4, %v4902_v29, 0.0  ;;  %v5619_v12 = vadd.f32 %v5618_v2, %v5617_v15  ;;  %v3086_v22 = vadd.f32 %v12306_v40, %v8583_v59  ;;  %v3080_v17 = vpop.f32.mrb[185].mxu0  ;;  %v6176_v53 = vsel %vm5231_vm4, %v5159_v26, 0.0 }
 0x251   :  { %v5620_v31 = vsel %vm5231_vm4, %v4901_v44, 0.0  ;;  %v3081_v16 = vadd.f32 %v12306_v40, %v3080_v17  ;;  %v4386_v15 = vadd.f32 %v12306_v40, %v12439_v62  ;;  %v6177_v7 = vadd.f32 %v6176_v53, %v6175_v23 }
 0x252   :  { %v5621_v54 = vadd.f32 %v5620_v31, %v5619_v12  ;;  %v4904_v48 = vmax.f32 %v3086_v22, 0.0  ;;  %v6182_v50 = vsel %vm5231_vm4, %v5162_v47, 0.0  ;;  %v5161_v14 = vmax.f32 %v4371_v41, 0.0  ;;  %v12537_v12 = vpop.f32.mrb[182].mxu1 }
 0x253   :  { %v4903_v2 = vmax.f32 %v3081_v16, 0.0  ;;  %v8586_v19 = vpop.f32.mrb[186].mxu0  ;;  %v6179_v17 = vadd.f32 %v6178_v6, %v6177_v7  ;;  %v5164_v62 = vmax.f32 %v4386_v15, 0.0  ;;  %v12539_v1 = vpop.f32.mrb[183].mxu1  ;;  %v4381_v26 = vadd.f32 %v12306_v40, %v12441_v24 }
 0x254   :  { %v5626_v29 = vsel %vm5231_vm4, %v4904_v48, 0.0  ;;  %v5623_v9 = vadd.f32 %v5622_v11, %v5621_v54  ;;  %v3096_v38 = vadd.f32 %v12306_v40, %v8586_v19  ;;  %v3090_v44 = vpop.f32.mrb[187].mxu0  ;;  %v6180_v16 = vsel %vm5231_vm4, %v5161_v14, 0.0 }
 0x255   :  { %v5624_v59 = vsel %vm5231_vm4, %v4903_v2, 0.0  ;;  %v3091_v8 = vadd.f32 %v12306_v40, %v3090_v44  ;;  %v4396_v54 = vadd.f32 %v12306_v40, %v12453_v5  ;;  %v6181_v6 = vadd.f32 %v6180_v16, %v6179_v17 }
 0x256   :  { %v5625_v60 = vadd.f32 %v5624_v59, %v5623_v9  ;;  %v4906_v22 = vmax.f32 %v3096_v38, 0.0  ;;  %v6186_v41 = vsel %vm5231_vm4, %v5164_v62, 0.0  ;;  %v5163_v15 = vmax.f32 %v4381_v26, 0.0  ;;  %v12551_v9 = vpop.f32.mrb[184].mxu1 }
 0x257   :  { %v4905_v11 = vmax.f32 %v3091_v8, 0.0  ;;  %v8589_v31 = vpop.f32.mrb[188].mxu0  ;;  %v6183_v44 = vadd.f32 %v6182_v50, %v6181_v6  ;;  %v5166_v5 = vmax.f32 %v4396_v54, 0.0  ;;  %v12553_v7 = vpop.f32.mrb[185].mxu1  ;;  %v4391_v14 = vadd.f32 %v12306_v40, %v12455_v33 }
 0x258   :  { %v5630_v48 = vsel %vm5231_vm4, %v4906_v22, 0.0  ;;  %v5627_v23 = vadd.f32 %v5626_v29, %v5625_v60  ;;  %v3106_v47 = vadd.f32 %v12306_v40, %v8589_v31  ;;  %v3100_v2 = vpop.f32.mrb[189].mxu0  ;;  %v6184_v8 = vsel %vm5231_vm4, %v5163_v15, 0.0 }
 0x259   :  { %v5628_v19 = vsel %vm5231_vm4, %v4905_v11, 0.0  ;;  %v3101_v53 = vadd.f32 %v12306_v40, %v3100_v2  ;;  %v4406_v60 = vadd.f32 %v12306_v40, %v12467_v51  ;;  %v5504_v22 = vrot.slane %v12403_v36, 2 }
 0x25a   :  { %v5629_v24 = vadd.f32 %v5628_v19, %v5627_v23  ;;  %v4908_v38 = vmax.f32 %v3106_v47, 0.0  ;;  %v6185_v50 = vadd.f32 %v6184_v8, %v6183_v44  ;;  %v5165_v54 = vmax.f32 %v4391_v14, 0.0  ;;  %v12565_v23 = vpop.f32.mrb[186].mxu1 }
 0x25b   :  { %v4907_v29 = vmax.f32 %v3101_v53, 0.0  ;;  %v8592_v59 = vpop.f32.mrb[190].mxu0  ;;  %v6190_v47 = vsel %vm5231_vm4, %v5166_v5, 0.0  ;;  %v5168_v2 = vmax.f32 %v4406_v60, 0.0  ;;  %v12568_v6 = vpop.f32.mrb[187].mxu1  ;;  %v4416_v60 = vadd.f32 %v12306_v40, %v12481_v35 }
 0x25c   :  { %v5631_v17 = vadd.f32 %v5630_v48, %v5629_v24  ;;  %v3116_v62 = vadd.f32 %v12306_v40, %v8592_v59  ;;  %v3110_v11 = vpop.f32.mrb[191].mxu0  ;;  %v5634_v31 = vsel %vm5231_vm4, %v4908_v38, 0.0  ;;  %v6187_v51 = vadd.f32 %v6186_v41, %v6185_v50 }
 0x25d   :  { %v5632_v16 = vsel %vm5231_vm4, %v4907_v29, 0.0  ;;  %v3111_v26 = vadd.f32 %v12306_v40, %v3110_v11  ;;  %v6188_v15 = vsel %vm5231_vm4, %v5165_v54, 0.0  ;;  %v4401_v24 = vadd.f32 %v12306_v40, %v12469_v34 }
 0x25e   :  { %v5633_v33 = vadd.f32 %v5632_v16, %v5631_v17  ;;  %v4910_v48 = vmax.f32 %v3116_v62, 0.0  ;;  %v5571_v38 = vrot.slane %v12332_v28, 4  ;;  %v6189_v8 = vadd.f32 %v6188_v15, %v6187_v51  ;;  %v12579_v17 = vpop.f32.mrb[188].mxu1 }
 0x25f   :  { %v4909_v19 = vmax.f32 %v3111_v26, 0.0  ;;  %v8595_v53 = vpop.f32.mrb[192].mxu0  ;;  %v5167_v14 = vmax.f32 %v4401_v24, 0.0  ;;  %v6199_v50 = vsel %vm5231_vm4, %v5168_v2, 0.0  ;;  %v4411_v51 = vadd.f32 %v12306_v40, %v12483_v42 }
 0x260   :  { %v5635_v44 = vadd.f32 %v5634_v31, %v5633_v33  ;;  %v3126_v29 = vadd.f32 %v12306_v40, %v8595_v53  ;;  %v3120_v59 = vpop.f32.mrb[193].mxu0  ;;  %v12581_v34 = vadd.f32 %v6190_v47, %v6189_v8  ;;  %v12584_v31 = vpop.f32.mrb[189].mxu1  ;;  %v5638_v16 = vsel %vm5231_vm4, %v4910_v48, 0.0 }
 0x261   :  { %v5636_v41 = vsel %vm5231_vm4, %v4909_v19, 0.0  ;;  %v3121_v5 = vadd.f32 %v12306_v40, %v3120_v59  ;;  %v6198_v33 = vsel %vm5231_vm4, %v5167_v14, 0.0  ;;  %v5572_v35 = vadd.f32 %v5571_v38, %v12332_v28 }
 0x262   :  { %v5637_v62 = vadd.f32 %v5636_v41, %v5635_v44  ;;  %v4912_v11 = vmax.f32 %v3126_v29, 0.0  ;;  %13288 = vst [vmem:[#allocation9_spill] sm:$0xff] %v12581_v34  ;;  %v5505_v15 = vadd.f32 %v5504_v22, %v12403_v36  ;;  %v6200_v44 = vadd.f32 %v6199_v50, %v6198_v33  ;;  %v12598_v29 = vpop.f32.mrb[190].mxu1 }
 0x263   :  { %v4911_v26 = vmax.f32 %v3121_v5, 0.0  ;;  %v8598_v54 = vpop.f32.mrb[194].mxu0  ;;  %v5170_v8 = vmax.f32 %v4416_v60, 0.0  ;;  %v4426_v28 = vadd.f32 %v12306_v40, %v12495_v43  ;;  %v12602_v38 = vpop.f32.mrb[191].mxu1  ;;  %v12605_v41 = vmul.f32 0.00390625, %v12356_v39 }
 0x264   :  { %v12591_v19 = vadd.f32 %v5638_v16, %v5637_v62  ;;  %v5647_v47 = vsel %vm5231_vm4, %v4912_v11, 0.0  ;;  %v3136_v53 = vadd.f32 %v12306_v40, %v8598_v54  ;;  %v3130_v2 = vpop.f32.mrb[195].mxu0  ;;  %v5169_v22 = vmax.f32 %v4411_v51, 0.0 }
 0x265   :  { %v5646_v48 = vsel %vm5231_vm4, %v4911_v26, 0.0  ;;  %v3131_v24 = vadd.f32 %v12306_v40, %v3130_v2  ;;  %v4421_v14 = vadd.f32 %v12306_v40, %v12497_v20  ;;  %v12610_v62 = vmul.f32 0.00390625, %v12362_v63 }
 0x266   :  { %v5648_v59 = vadd.f32 %v5647_v47, %v5646_v48  ;;  %v4914_v42 = vmax.f32 %v3136_v53, 0.0  ;;  %v12613_v11 = vmul.f32 0.00390625, %v12380_v25  ;;  %v5573_v60 = vrot.slane %v5572_v35, 2  ;;  %v12619_v33 = vpop.f32.mrb[192].mxu1 }
 0x267   :  { %v4913_v5 = vmax.f32 %v3131_v24, 0.0  ;;  %v8601_v36 = vpop.f32.mrb[196].mxu0  ;;  %v5506_v16 = vrot.slane %v5505_v15, 1  ;;  %v6201_v54 = vsel %vm5231_vm4, %v5169_v22, 0.0  ;;  %v6203_v51 = vsel %vm5231_vm4, %v5170_v8, 0.0  ;;  %v12623_v47 = vpop.f32.mrb[193].mxu1 }
 0x268   :  { %v3146_v43 = vadd.f32 %v12306_v40, %v8601_v36  ;;  %v3140_v50 = vpop.f32.mrb[197].mxu0  ;;  %v5651_v20 = vsel %vm5231_vm4, %v4914_v42, 0.0  ;;  %v5172_v25 = vmax.f32 %v4426_v28, 0.0  ;;  %v6202_v24 = vadd.f32 %v6201_v54, %v6200_v44 }
 0x269   :  { %v5649_v39 = vsel %vm5231_vm4, %v4913_v5, 0.0  ;;  %v3141_v26 = vadd.f32 %v12306_v40, %v3140_v50  ;;  %v5171_v36 = vmax.f32 %v4421_v14, 0.0  ;;  %v12625_v5 = vadd.f32 %v5573_v60, %v5572_v35 }
 0x26a   :  { %v5650_v63 = vadd.f32 %v5649_v39, %v5648_v59  ;;  %v4916_v53 = vmax.f32 %v3146_v43, 0.0  ;;  %v4436_v42 = vadd.f32 %v12306_v40, %v12509_v32  ;;  %v5640_v59 = vrot.slane %v12591_v19, 4  ;;  %v12633_v39 = vpop.f32.mrb[194].mxu1 }
 0x26b   :  { %v4915_v2 = vmax.f32 %v3141_v26, 0.0  ;;  %v8604_v48 = vpop.f32.mrb[198].mxu0  ;;  %v6204_v43 = vadd.f32 %v6203_v51, %v6202_v24  ;;  %v12635_v44 = vadd.f32 %v5506_v16, %v5505_v15  ;;  %v6205_v60 = vsel %vm5231_vm4, %v5171_v36, 0.0  ;;  %v12638_v26 = vpop.f32.mrb[195].mxu1 }
 0x26c   :  { %v5652_v50 = vadd.f32 %v5651_v20, %v5650_v63  ;;  %v3156_v22 = vadd.f32 %v12306_v40, %v8604_v48  ;;  %v3150_v34 = vpop.f32.mrb[199].mxu0  ;;  %v5655_v54 = vsel %vm5231_vm4, %v4916_v53, 0.0  ;;  %v6207_v63 = vsel %vm5231_vm4, %v5172_v25, 0.0 }
 0x26d   :  { %v5653_v8 = vsel %vm5231_vm4, %v4915_v2, 0.0  ;;  %v3151_v28 = vadd.f32 %v12306_v40, %v3150_v34  ;;  %v6206_v2 = vadd.f32 %v6205_v60, %v6204_v43  ;;  %v5174_v16 = vmax.f32 %v4436_v42, 0.0 }
 0x26e   :  { %v5654_v35 = vadd.f32 %v5653_v8, %v5652_v50  ;;  %v4918_v14 = vmax.f32 %v3156_v22, 0.0  ;;  %v12645_v24 = vadd.f32 %v5640_v59, %v12591_v19  ;;  %v12650_v22 = vpop.f32.mrb[196].mxu1  ;;  %v4446_v19 = vadd.f32 %v12306_v40, %v12523_v45 }
 0x26f   :  { %v4917_v32 = vmax.f32 %v3151_v28, 0.0  ;;  %v8607_v20 = vpop.f32.mrb[200].mxu0  ;;  %v4431_v28 = vadd.f32 %v12306_v40, %v12511_v52  ;;  %v6208_v43 = vadd.f32 %v6207_v63, %v6206_v2  ;;  %v4441_v59 = vadd.f32 %v12306_v40, %v12525_v56 }
 0x270   :  { %v5656_v51 = vadd.f32 %v5655_v54, %v5654_v35  ;;  %v3166_v48 = vadd.f32 %v12306_v40, %v8607_v20  ;;  %v3160_v15 = vpop.f32.mrb[201].mxu0  ;;  %v5659_v36 = vsel %vm5231_vm4, %v4918_v14, 0.0  ;;  %v12654_v35 = vpop.f32.mrb[197].mxu1  ;;  %v4456_v14 = vadd.f32 %v12306_v40, %v12537_v12 }
 0x271   :  { %v5657_v50 = vsel %vm5231_vm4, %v4917_v32, 0.0  ;;  %v3161_v53 = vadd.f32 %v12306_v40, %v3160_v15  ;;  %v6211_v52 = vsel %vm5231_vm4, %v5174_v16, 0.0  ;;  %v5173_v63 = vmax.f32 %v4431_v28, 0.0 }
 0x272   :  { %v5658_v25 = vadd.f32 %v5657_v50, %v5656_v51  ;;  %v4920_v8 = vmax.f32 %v3166_v48, 0.0  ;;  %v5176_v48 = vmax.f32 %v4446_v19, 0.0  ;;  %v5175_v15 = vmax.f32 %v4441_v59, 0.0  ;;  %v12666_v45 = vpop.f32.mrb[198].mxu1 }
 0x273   :  { %v4919_v42 = vmax.f32 %v3161_v53, 0.0  ;;  %v8610_v60 = vpop.f32.mrb[202].mxu0  ;;  %v6209_v12 = vsel %vm5231_vm4, %v5173_v63, 0.0 }
 0x274   :  { %v5660_v54 = vadd.f32 %v5659_v36, %v5658_v25  ;;  %v3176_v32 = vadd.f32 %v12306_v40, %v8610_v60  ;;  %v3170_v20 = vpop.f32.mrb[203].mxu0  ;;  %v5663_v56 = vsel %vm5231_vm4, %v4920_v8, 0.0  ;;  %v12670_v36 = vpop.f32.mrb[199].mxu1  ;;  %v6210_v16 = vadd.f32 %v6209_v12, %v6208_v43 }
 0x275   :  { %v5661_v2 = vsel %vm5231_vm4, %v4919_v42, 0.0  ;;  %v3171_v51 = vadd.f32 %v12306_v40, %v3170_v20  ;;  %v6215_v28 = vsel %vm5231_vm4, %v5176_v48, 0.0  ;;  %v5178_v42 = vmax.f32 %v4456_v14, 0.0 }
 0x276   :  { %v5662_v50 = vadd.f32 %v5661_v2, %v5660_v54  ;;  %v4922_v53 = vmax.f32 %v3176_v32, 0.0  ;;  %v6213_v8 = vsel %vm5231_vm4, %v5175_v15, 0.0  ;;  %v6212_v63 = vadd.f32 %v6211_v52, %v6210_v16  ;;  %v12680_v43 = vpop.f32.mrb[200].mxu1 }
 0x277   :  { %v4921_v25 = vmax.f32 %v3171_v51, 0.0  ;;  %v8613_v60 = vpop.f32.mrb[204].mxu0  ;;  %v4451_v2 = vadd.f32 %v12306_v40, %v12539_v1  ;;  %v4466_v48 = vadd.f32 %v12306_v40, %v12551_v9 }
 0x278   :  { %v5667_v20 = vsel %vm5231_vm4, %v4922_v53, 0.0  ;;  %v5664_v19 = vadd.f32 %v5663_v56, %v5662_v50  ;;  %v3186_v59 = vadd.f32 %v12306_v40, %v8613_v60  ;;  %v3180_v34 = vpop.f32.mrb[205].mxu0  ;;  %v4461_v56 = vadd.f32 %v12306_v40, %v12553_v7  ;;  %v12686_v50 = vpop.f32.mrb[201].mxu1 }
 0x279   :  { %v5665_v54 = vsel %vm5231_vm4, %v4921_v25, 0.0  ;;  %v3181_v32 = vadd.f32 %v12306_v40, %v3180_v34  ;;  %v6214_v12 = vadd.f32 %v6213_v8, %v6212_v63  ;;  %v6219_v34 = vsel %vm5231_vm4, %v5178_v42, 0.0 }
 0x27a   :  { %v5666_v51 = vadd.f32 %v5665_v54, %v5664_v19  ;;  %v4924_v14 = vmax.f32 %v3186_v59, 0.0  ;;  %v5177_v52 = vmax.f32 %v4451_v2, 0.0  ;;  %v5180_v16 = vmax.f32 %v4466_v48, 0.0 }
 0x27b   :  { %v4923_v15 = vmax.f32 %v3181_v32, 0.0  ;;  %v8616_v53 = vpop.f32.mrb[206].mxu0  ;;  %v4476_v19 = vadd.f32 %v12306_v40, %v12565_v23  ;;  %v6216_v59 = vadd.f32 %v6215_v28, %v6214_v12  ;;  %v12695_v32 = vpop.f32.mrb[202].mxu1  ;;  %v5179_v63 = vmax.f32 %v4461_v56, 0.0 }
 0x27c   :  { %v5668_v25 = vadd.f32 %v5667_v20, %v5666_v51  ;;  %v3196_v1 = vadd.f32 %v12306_v40, %v8616_v53  ;;  %v3190_v60 = vpop.f32.mrb[207].mxu0  ;;  %v6217_v54 = vsel %vm5231_vm4, %v5177_v52, 0.0  ;;  %v5671_v42 = vsel %vm5231_vm4, %v4924_v14, 0.0  ;;  %v12698_v2 = vpop.f32.mrb[203].mxu1 }
 0x27d   :  { %v5669_v9 = vsel %vm5231_vm4, %v4923_v15, 0.0  ;;  %v3191_v7 = vadd.f32 %v12306_v40, %v3190_v60  ;;  %v6218_v53 = vadd.f32 %v6217_v54, %v6216_v59  ;;  %v6223_v23 = vsel %vm5231_vm4, %v5180_v16, 0.0 }
 0x27e   :  { %v5670_v8 = vadd.f32 %v5669_v9, %v5668_v25  ;;  %v4926_v20 = vmax.f32 %v3196_v1, 0.0  ;;  %v4471_v15 = vadd.f32 %v12306_v40, %v12568_v6  ;;  %v6221_v60 = vsel %vm5231_vm4, %v5179_v63, 0.0 }
 0x27f   :  { %v4925_v51 = vmax.f32 %v3191_v7, 0.0  ;;  %v8619_v48 = vpop.f32.mrb[208].mxu0  ;;  %v5182_v14 = vmax.f32 %v4476_v19, 0.0  ;;  %v6220_v9 = vadd.f32 %v6219_v34, %v6218_v53  ;;  %v12708_v7 = vpop.f32.mrb[204].mxu1  ;;  %v4486_v6 = vadd.f32 %v12306_v40, %v12579_v17 }
 0x280   :  { %v5672_v28 = vadd.f32 %v5671_v42, %v5670_v8  ;;  %v3206_v12 = vadd.f32 %v12306_v40, %v8619_v48  ;;  %v3200_v52 = vpop.f32.mrb[209].mxu0  ;;  %v5675_v25 = vsel %vm5231_vm4, %v4926_v20, 0.0  ;;  %v5181_v54 = vmax.f32 %v4471_v15, 0.0  ;;  %v12712_v42 = vpop.f32.mrb[205].mxu1  ;;  %v12721_v48 = vld [vmem:[%s13272_s2] ss:$0 sm:$0xff] }
 0x281   :  { %v5673_v56 = vsel %vm5231_vm4, %v4925_v51, 0.0  ;;  %v3201_v1 = vadd.f32 %v12306_v40, %v3200_v52  ;;  %v6222_v19 = vadd.f32 %v6221_v60, %v6220_v9  ;;  %v4481_v20 = vadd.f32 %v12306_v40, %v12584_v31 }
 0x282   :  { %v5674_v16 = vadd.f32 %v5673_v56, %v5672_v28  ;;  %v4928_v59 = vmax.f32 %v3206_v12, 0.0  ;;  %v4496_v51 = vadd.f32 %v12306_v40, %v12598_v29  ;;  %v6227_v15 = vsel %vm5231_vm4, %v5182_v14, 0.0  ;;  %v12728_v40 = vpop.f32.mrb[206].mxu1 }
 0x283   :  { %v4927_v8 = vmax.f32 %v3201_v1, 0.0  ;;  %v8622_v63 = vpop.f32.mrb[210].mxu0  ;;  %v6225_v28 = vsel %vm5231_vm4, %v5181_v54, 0.0  ;;  %v6224_v52 = vadd.f32 %v6223_v23, %v6222_v19  ;;  %v5184_v60 = vmax.f32 %v4486_v6, 0.0  ;;  %v12731_v9 = vpop.f32.mrb[207].mxu1 }
 0x284   :  { %v5676_v34 = vadd.f32 %v5675_v25, %v5674_v16  ;;  %v3216_v53 = vadd.f32 %v12721_v48, %v8622_v63  ;;  %v3210_v17 = vpop.f32.mrb[211].mxu0  ;;  %v5679_v29 = vsel %vm5231_vm4, %v4928_v59, 0.0  ;;  %v5183_v1 = vmax.f32 %v4481_v20, 0.0 }
 0x285   :  { %v5677_v12 = vsel %vm5231_vm4, %v4927_v8, 0.0  ;;  %v3211_v31 = vadd.f32 %v12721_v48, %v3210_v17  ;;  %v6226_v14 = vadd.f32 %v6225_v28, %v6224_v52  ;;  %v5186_v37 = vmax.f32 %v4496_v51, 0.0 }
 0x286   :  { %v5678_v25 = vadd.f32 %v5677_v12, %v5676_v34  ;;  %v4930_v56 = vmax.f32 %v3216_v53, 0.0  ;;  %v4491_v54 = vadd.f32 %v12721_v48, %v12602_v38  ;;  %v6231_v19 = vsel %vm5231_vm4, %v5184_v60, 0.0  ;;  %v12741_v28 = vpop.f32.mrb[208].mxu1 }
 0x287   :  { %v4929_v16 = vmax.f32 %v3211_v31, 0.0  ;;  %v8625_v63 = vpop.f32.mrb[212].mxu0  ;;  %v6229_v59 = vsel %vm5231_vm4, %v5183_v1, 0.0  ;;  %v6228_v17 = vadd.f32 %v6227_v15, %v6226_v14  ;;  %v4506_v31 = vadd.f32 %v12721_v48, %v12619_v33  ;;  %v12745_v52 = vpop.f32.mrb[209].mxu1 }
 0x288   :  { %v5680_v8 = vadd.f32 %v5679_v29, %v5678_v25  ;;  %v3226_v23 = vadd.f32 %v12721_v48, %v8625_v63  ;;  %v3220_v6 = vpop.f32.mrb[213].mxu0  ;;  %v5683_v34 = vsel %vm5231_vm4, %v4930_v56, 0.0  ;;  %v5185_v38 = vmax.f32 %v4491_v54, 0.0 }
 0x289   :  { %v5681_v20 = vsel %vm5231_vm4, %v4929_v16, 0.0  ;;  %v3221_v53 = vadd.f32 %v12721_v48, %v3220_v6  ;;  %v6230_v25 = vadd.f32 %v6229_v59, %v6228_v17  ;;  %v4501_v56 = vadd.f32 %v12721_v48, %v12623_v47 }
 0x28a   :  { %v5682_v51 = vadd.f32 %v5681_v20, %v5680_v8  ;;  %v4932_v12 = vmax.f32 %v3226_v23, 0.0  ;;  %v4516_v1 = vadd.f32 %v12721_v48, %v12633_v39  ;;  %v6235_v14 = vsel %vm5231_vm4, %v5186_v37, 0.0  ;;  %v12756_v59 = vpop.f32.mrb[210].mxu1 }
 0x28b   :  { %v4931_v60 = vmax.f32 %v3221_v53, 0.0  ;;  %v8628_v29 = vpop.f32.mrb[214].mxu0  ;;  %v6233_v54 = vsel %vm5231_vm4, %v5185_v38, 0.0  ;;  %v6232_v23 = vadd.f32 %v6231_v19, %v6230_v25  ;;  %v5188_v6 = vmax.f32 %v4506_v31, 0.0  ;;  %v12759_v53 = vpop.f32.mrb[211].mxu1 }
 0x28c   :  { %v5684_v15 = vadd.f32 %v5683_v34, %v5682_v51  ;;  %v3236_v16 = vadd.f32 %v12721_v48, %v8628_v29  ;;  %v3230_v63 = vpop.f32.mrb[215].mxu0  ;;  %v5687_v47 = vsel %vm5231_vm4, %v4932_v12, 0.0  ;;  %v5187_v34 = vmax.f32 %v4501_v56, 0.0 }
 0x28d   :  { %v5685_v33 = vsel %vm5231_vm4, %v4931_v60, 0.0  ;;  %v3231_v8 = vadd.f32 %v12721_v48, %v3230_v63  ;;  %v6234_v37 = vadd.f32 %v6233_v54, %v6232_v23  ;;  %v5190_v29 = vmax.f32 %v4516_v1, 0.0 }
 0x28e   :  { %v5686_v20 = vadd.f32 %v5685_v33, %v5684_v15  ;;  %v4934_v39 = vmax.f32 %v3236_v16, 0.0  ;;  %v4511_v38 = vadd.f32 %v12721_v48, %v12638_v26  ;;  %v6239_v25 = vsel %vm5231_vm4, %v5188_v6, 0.0  ;;  %v12769_v54 = vpop.f32.mrb[212].mxu1 }
 0x28f   :  { %v4933_v17 = vmax.f32 %v3231_v8, 0.0  ;;  %v8631_v51 = vpop.f32.mrb[216].mxu0  ;;  %v6237_v12 = vsel %vm5231_vm4, %v5187_v34, 0.0  ;;  %v6236_v63 = vadd.f32 %v6235_v14, %v6234_v37  ;;  %v4526_v8 = vadd.f32 %v12721_v48, %v12650_v22  ;;  %v12773_v23 = vpop.f32.mrb[213].mxu1 }
 0x290   :  { %v5688_v60 = vadd.f32 %v5687_v47, %v5686_v20  ;;  %v3246_v19 = vadd.f32 %v12721_v48, %v8631_v51  ;;  %v3240_v31 = vpop.f32.mrb[217].mxu0  ;;  %v5691_v15 = vsel %vm5231_vm4, %v4934_v39, 0.0  ;;  %v5189_v26 = vmax.f32 %v4511_v38, 0.0 }
 0x291   :  { %v5689_v56 = vsel %vm5231_vm4, %v4933_v17, 0.0  ;;  %v3241_v16 = vadd.f32 %v12721_v48, %v3240_v31  ;;  %v6238_v20 = vadd.f32 %v6237_v12, %v6236_v63  ;;  %v4521_v39 = vadd.f32 %v12721_v48, %v12654_v35 }
 0x292   :  { %v5690_v1 = vadd.f32 %v5689_v56, %v5688_v60  ;;  %v4936_v33 = vmax.f32 %v3246_v19, 0.0  ;;  %v4536_v34 = vadd.f32 %v12721_v48, %v12666_v45  ;;  %v6243_v37 = vsel %vm5231_vm4, %v5190_v29, 0.0  ;;  %v12784_v12 = vpop.f32.mrb[214].mxu1 }
 0x293   :  { %v4935_v6 = vmax.f32 %v3241_v16, 0.0  ;;  %v8634_v47 = vpop.f32.mrb[218].mxu0  ;;  %v6241_v38 = vsel %vm5231_vm4, %v5189_v26, 0.0  ;;  %v6240_v19 = vadd.f32 %v6239_v25, %v6238_v20  ;;  %v5192_v31 = vmax.f32 %v4526_v8, 0.0  ;;  %v12787_v16 = vpop.f32.mrb[215].mxu1 }
 0x294   :  { %v5692_v14 = vadd.f32 %v5691_v15, %v5690_v1  ;;  %v3256_v17 = vadd.f32 %v12721_v48, %v8634_v47  ;;  %v3250_v51 = vpop.f32.mrb[219].mxu0  ;;  %v5695_v35 = vsel %vm5231_vm4, %v4936_v33, 0.0  ;;  %v5191_v15 = vmax.f32 %v4521_v39, 0.0 }
 0x295   :  { %v5693_v22 = vsel %vm5231_vm4, %v4935_v6, 0.0  ;;  %v3251_v60 = vadd.f32 %v12721_v48, %v3250_v51  ;;  %v6242_v29 = vadd.f32 %v6241_v38, %v6240_v19  ;;  %v5194_v47 = vmax.f32 %v4536_v34, 0.0 }
 0x296   :  { %v5694_v56 = vadd.f32 %v5693_v22, %v5692_v14  ;;  %v4938_v45 = vmax.f32 %v3256_v17, 0.0  ;;  %v4531_v26 = vadd.f32 %v12721_v48, %v12670_v36  ;;  %v6247_v20 = vsel %vm5231_vm4, %v5192_v31, 0.0  ;;  %v12797_v38 = vpop.f32.mrb[216].mxu1 }
 0x297   :  { %v4937_v63 = vmax.f32 %v3251_v60, 0.0  ;;  %v8637_v1 = vpop.f32.mrb[220].mxu0  ;;  %v6245_v33 = vsel %vm5231_vm4, %v5191_v15, 0.0  ;;  %v6244_v51 = vadd.f32 %v6243_v37, %v6242_v29  ;;  %v4546_v60 = vadd.f32 %v12721_v48, %v12680_v43  ;;  %v12801_v19 = vpop.f32.mrb[217].mxu1 }
 0x298   :  { %v5696_v6 = vadd.f32 %v5695_v35, %v5694_v56  ;;  %v3266_v25 = vadd.f32 %v12721_v48, %v8637_v1  ;;  %v3260_v8 = vpop.f32.mrb[221].mxu0  ;;  %v5699_v14 = vsel %vm5231_vm4, %v4938_v45, 0.0  ;;  %v5193_v36 = vmax.f32 %v4531_v26, 0.0 }
 0x299   :  { %v5697_v39 = vsel %vm5231_vm4, %v4937_v63, 0.0  ;;  %v3261_v17 = vadd.f32 %v12721_v48, %v3260_v8  ;;  %v6246_v56 = vadd.f32 %v6245_v33, %v6244_v51  ;;  %v4541_v45 = vadd.f32 %v12721_v48, %v12686_v50 }
 0x29a   :  { %v5698_v34 = vadd.f32 %v5697_v39, %v5696_v6  ;;  %v4940_v22 = vmax.f32 %v3266_v25, 0.0  ;;  %v4556_v15 = vadd.f32 %v12721_v48, %v12695_v32  ;;  %v6251_v29 = vsel %vm5231_vm4, %v5194_v47, 0.0  ;;  %v12812_v33 = vpop.f32.mrb[218].mxu1 }
 0x29b   :  { %v4939_v31 = vmax.f32 %v3261_v17, 0.0  ;;  %v8640_v35 = vpop.f32.mrb[222].mxu0  ;;  %v6249_v26 = vsel %vm5231_vm4, %v5193_v36, 0.0  ;;  %v6248_v25 = vadd.f32 %v6247_v20, %v6246_v56  ;;  %v5196_v8 = vmax.f32 %v4546_v60, 0.0  ;;  %v12815_v17 = vpop.f32.mrb[219].mxu1 }
 0x29c   :  { %v5700_v37 = vadd.f32 %v5699_v14, %v5698_v34  ;;  %v3276_v63 = vadd.f32 %v12721_v48, %v8640_v35  ;;  %v3270_v1 = vpop.f32.mrb[223].mxu0  ;;  %v5703_v50 = vsel %vm5231_vm4, %v4940_v22, 0.0  ;;  %v5195_v14 = vmax.f32 %v4541_v45, 0.0 }
 0x29d   :  { %v5701_v43 = vsel %vm5231_vm4, %v4939_v31, 0.0  ;;  %v3271_v6 = vadd.f32 %v12721_v48, %v3270_v1  ;;  %v6250_v47 = vadd.f32 %v6249_v26, %v6248_v25  ;;  %v5198_v35 = vmax.f32 %v4556_v15, 0.0 }
 0x29e   :  { %v5702_v39 = vadd.f32 %v5701_v43, %v5700_v37  ;;  %v4942_v32 = vmax.f32 %v3276_v63, 0.0  ;;  %v4551_v36 = vadd.f32 %v12721_v48, %v12698_v2  ;;  %v6255_v56 = vsel %vm5231_vm4, %v5196_v8, 0.0  ;;  %v12825_v26 = vpop.f32.mrb[220].mxu1 }
 0x29f   :  { %v4941_v51 = vmax.f32 %v3271_v6, 0.0  ;;  %v8643_v34 = vpop.f32.mrb[224].mxu0  ;;  %v6253_v22 = vsel %vm5231_vm4, %v5195_v14, 0.0  ;;  %v6252_v1 = vadd.f32 %v6251_v29, %v6250_v47  ;;  %v4566_v6 = vadd.f32 %v12721_v48, %v12708_v7  ;;  %v12829_v25 = vpop.f32.mrb[221].mxu1 }
 0x2a0   :  { %v5704_v31 = vadd.f32 %v5703_v50, %v5702_v39  ;;  %v3286_v20 = vadd.f32 %v12721_v48, %v8643_v34  ;;  %v3280_v60 = vpop.f32.mrb[225].mxu0  ;;  %v5707_v37 = vsel %vm5231_vm4, %v4942_v32, 0.0  ;;  %v5197_v2 = vmax.f32 %v4551_v36, 0.0 }
 0x2a1   :  { %v5705_v45 = vsel %vm5231_vm4, %v4941_v51, 0.0  ;;  %v3281_v63 = vadd.f32 %v12721_v48, %v3280_v60  ;;  %v6254_v39 = vadd.f32 %v6253_v22, %v6252_v1  ;;  %v6259_v32 = vsel %vm5231_vm4, %v5198_v35, 0.0 }
 0x2a2   :  { %v5706_v15 = vadd.f32 %v5705_v45, %v5704_v31  ;;  %v4944_v43 = vmax.f32 %v3286_v20, 0.0  ;;  %v4561_v14 = vadd.f32 %v12721_v48, %v12712_v42  ;;  %v6257_v36 = vsel %vm5231_vm4, %v5197_v2, 0.0  ;;  %v12839_v22 = vpop.f32.mrb[222].mxu1 }
 0x2a3   :  { %v4943_v8 = vmax.f32 %v3281_v63, 0.0  ;;  %v8646_v50 = vpop.f32.mrb[226].mxu0  ;;  %v6256_v20 = vadd.f32 %v6255_v56, %v6254_v39  ;;  %v5200_v60 = vmax.f32 %v4566_v6, 0.0  ;;  %v4576_v42 = vadd.f32 %v12721_v48, %v12728_v40 }
 0x2a4   :  { %v5708_v51 = vadd.f32 %v5707_v37, %v5706_v15  ;;  %v5716_v29 = vsel %vm5231_vm4, %v4944_v43, 0.0  ;;  %v3296_v34 = vadd.f32 %v12721_v48, %v8646_v50  ;;  %v3290_v47 = vpop.f32.mrb[227].mxu0  ;;  %v5199_v63 = vmax.f32 %v4561_v14, 0.0  ;;  %v12843_v37 = vpop.f32.mrb[223].mxu1 }
 0x2a5   :  { %v5715_v7 = vsel %vm5231_vm4, %v4943_v8, 0.0  ;;  %v3291_v31 = vadd.f32 %v12721_v48, %v3290_v47  ;;  %v6258_v2 = vadd.f32 %v6257_v36, %v6256_v20  ;;  %v6268_v8 = vsel %vm5231_vm4, %v5200_v60, 0.0 }
 0x2a6   :  { %v5709_v35 = vrot.slane %v5708_v51, 4  ;;  %v5717_v45 = vadd.f32 %v5716_v29, %v5715_v7  ;;  %v4946_v1 = vmax.f32 %v3296_v34, 0.0  ;;  %v5642_v50 = vrot.slane %v12645_v24, 2  ;;  %v12853_v7 = vpop.f32.mrb[224].mxu1 }
 0x2a7   :  { %v4945_v15 = vmax.f32 %v3291_v31, 0.0  ;;  %v8649_v43 = vpop.f32.mrb[228].mxu0  ;;  %v6267_v29 = vsel %vm5231_vm4, %v5199_v63, 0.0  ;;  %v12851_v47 = vadd.f32 %v6259_v32, %v6258_v2  ;;  %v12856_v36 = vmul.f32 0.00390625, %v12635_v44 }
 0x2a8   :  { %v5710_v56 = vadd.f32 %v5709_v35, %v5708_v51  ;;  %v3306_v6 = vadd.f32 %v12721_v48, %v8649_v43  ;;  %v3300_v39 = vpop.f32.mrb[229].mxu0  ;;  %v6269_v34 = vadd.f32 %v6268_v8, %v6267_v29  ;;  %v13290_v51 = vrot.slane %v12625_v5, 1  ;;  %v12861_v35 = vpop.f32.mrb[225].mxu1 }
 0x2a9   :  { %v5718_v14 = vsel %vm5231_vm4, %v4945_v15, 0.0  ;;  %v3301_v40 = vadd.f32 %v12721_v48, %v3300_v39  ;;  %13289 = vst [vmem:[#allocation10_spill] sm:$0xff] %v12851_v47  ;;  %v5202_v60 = vmax.f32 %v4576_v42, 0.0  ;;  %v5720_v63 = vsel %vm5231_vm4, %v4946_v1, 0.0 }
 0x2aa   :  { %v5576_v31 = vadd.f32 %v13290_v51, %v12625_v5  ;;  %v5719_v20 = vadd.f32 %v5718_v14, %v5717_v45  ;;  %v4948_v15 = vmax.f32 %v3306_v6, 0.0  ;;  %v4571_v2 = vadd.f32 %v12721_v48, %v12731_v9  ;;  %v12872_v14 = vpop.f32.mrb[226].mxu1 }
 0x2ab   :  { %v4947_v43 = vmax.f32 %v3301_v40, 0.0  ;;  %v8652_v32 = vpop.f32.mrb[230].mxu0  ;;  %v5643_v8 = vadd.f32 %v5642_v50, %v12645_v24  ;;  %v4586_v5 = vadd.f32 %v12721_v48, %v12741_v28  ;;  %v5711_v45 = vrot.slane %v5710_v56, 2  ;;  %v12877_v50 = vpop.f32.mrb[227].mxu1 }
 0x2ac   :  { %v5721_v44 = vadd.f32 %v5720_v63, %v5719_v20  ;;  %v3316_v39 = vadd.f32 %v12721_v48, %v8652_v32  ;;  %v3310_v29 = vpop.f32.mrb[231].mxu0  ;;  %v5201_v6 = vmax.f32 %v4571_v2, 0.0  ;;  %v12874_v40 = vmul.f32 0.00390625, %v5576_v31 }
 0x2ad   :  { %v5722_v42 = vsel %vm5231_vm4, %v4947_v43, 0.0  ;;  %v3311_v1 = vadd.f32 %v12721_v48, %v3310_v29  ;;  %v6272_v24 = vsel %vm5231_vm4, %v5202_v60, 0.0  ;;  %v5724_v20 = vsel %vm5231_vm4, %v4948_v15, 0.0 }
 0x2ae   :  { %v5723_v9 = vadd.f32 %v5722_v42, %v5721_v44  ;;  %v4950_v51 = vmax.f32 %v3316_v39, 0.0  ;;  %v6270_v32 = vsel %vm5231_vm4, %v5201_v6, 0.0  ;;  %v4581_v43 = vadd.f32 %v12721_v48, %v12745_v52 }
 0x2af   :  { %v4949_v63 = vmax.f32 %v3311_v1, 0.0  ;;  %v8655_v28 = vpop.f32.mrb[232].mxu0  ;;  %v6271_v47 = vadd.f32 %v6270_v32, %v6269_v34  ;;  %v5204_v44 = vmax.f32 %v4586_v5, 0.0  ;;  %v5644_v39 = vrot.slane %v5643_v8, 1  ;;  %v12888_v1 = vpop.f32.mrb[228].mxu1 }
 0x2b0   :  { %v5725_v2 = vadd.f32 %v5724_v20, %v5723_v9  ;;  %v3326_v29 = vadd.f32 %v12721_v48, %v8655_v28  ;;  %v3320_v31 = vpop.f32.mrb[233].mxu0  ;;  %v12884_v42 = vadd.f32 %v5711_v45, %v5710_v56  ;;  %v5728_v6 = vsel %vm5231_vm4, %v4950_v51, 0.0  ;;  %v12891_v9 = vpop.f32.mrb[229].mxu1 }
 0x2b1   :  { %v5726_v60 = vsel %vm5231_vm4, %v4949_v63, 0.0  ;;  %v3321_v15 = vadd.f32 %v12721_v48, %v3320_v31  ;;  %v5203_v4 = vmax.f32 %v4581_v43, 0.0  ;;  %v6273_v52 = vadd.f32 %v6272_v24, %v6271_v47 }
 0x2b2   :  { %v5727_v55 = vadd.f32 %v5726_v60, %v5725_v2  ;;  %v4952_v20 = vmax.f32 %v3326_v29, 0.0  ;;  %v4596_v56 = vadd.f32 %v12721_v48, %v12756_v59  ;;  %v4591_v5 = vadd.f32 %v12721_v48, %v12759_v53  ;;  %v12904_v31 = vpop.f32.mrb[230].mxu1 }
 0x2b3   :  { %v4951_v28 = vmax.f32 %v3321_v15, 0.0  ;;  %v8658_v34 = vpop.f32.mrb[234].mxu0  ;;  %v6276_v51 = vsel %vm5231_vm4, %v5204_v44, 0.0  ;;  %v6274_v43 = vsel %vm5231_vm4, %v5203_v4, 0.0  ;;  %v12900_v47 = vadd.f32 %v5644_v39, %v5643_v8  ;;  %v12906_v15 = vpop.f32.mrb[231].mxu1 }
 0x2b4   :  { %v5729_v45 = vadd.f32 %v5728_v6, %v5727_v55  ;;  %v3336_v63 = vadd.f32 %v12721_v48, %v8658_v34  ;;  %v3330_v32 = vpop.f32.mrb[235].mxu0  ;;  %v6275_v29 = vadd.f32 %v6274_v43, %v6273_v52  ;;  %v5206_v53 = vmax.f32 %v4596_v56, 0.0 }
 0x2b5   :  { %v5730_v24 = vsel %vm5231_vm4, %v4951_v28, 0.0  ;;  %v3331_v2 = vadd.f32 %v12721_v48, %v3330_v32  ;;  %v5205_v55 = vmax.f32 %v4591_v5, 0.0  ;;  %v5732_v6 = vsel %vm5231_vm4, %v4952_v20, 0.0 }
 0x2b6   :  { %v5731_v59 = vadd.f32 %v5730_v24, %v5729_v45  ;;  %v4954_v60 = vmax.f32 %v3336_v63, 0.0  ;;  %v6277_v4 = vadd.f32 %v6276_v51, %v6275_v29  ;;  %v4606_v8 = vadd.f32 %v12721_v48, %v12769_v54  ;;  %v12917_v43 = vpop.f32.mrb[232].mxu1 }
 0x2b7   :  { %v4953_v44 = vmax.f32 %v3331_v2, 0.0  ;;  %v8661_v34 = vpop.f32.mrb[236].mxu0  ;;  %v5713_v39 = vrot.slane %v12884_v42, 1  ;;  %v6278_v20 = vsel %vm5231_vm4, %v5205_v55, 0.0  ;;  %v6280_v54 = vsel %vm5231_vm4, %v5206_v53, 0.0  ;;  %v12922_v29 = vpop.f32.mrb[233].mxu1 }
 0x2b8   :  { %v5736_v52 = vsel %vm5231_vm4, %v4954_v60, 0.0  ;;  %v5733_v28 = vadd.f32 %v5732_v6, %v5731_v59  ;;  %v3346_v45 = vadd.f32 %v12721_v48, %v8661_v34  ;;  %v3340_v63 = vpop.f32.mrb[237].mxu0  ;;  %v5208_v32 = vmax.f32 %v4606_v8, 0.0 }
 0x2b9   :  { %v5734_v56 = vsel %vm5231_vm4, %v4953_v44, 0.0  ;;  %v3341_v5 = vadd.f32 %v12721_v48, %v3340_v63  ;;  %v6279_v24 = vadd.f32 %v6278_v20, %v6277_v4  ;;  %v4601_v2 = vadd.f32 %v12721_v48, %v12773_v23 }
 0x2ba   :  { %v5735_v51 = vadd.f32 %v5734_v56, %v5733_v28  ;;  %v4956_v59 = vmax.f32 %v3346_v45, 0.0  ;;  %v4616_v44 = vadd.f32 %v12721_v48, %v12784_v12  ;;  %v4611_v55 = vadd.f32 %v12721_v48, %v12787_v16 }
 0x2bb   :  { %v4955_v60 = vmax.f32 %v3341_v5, 0.0  ;;  %v8664_v6 = vpop.f32.mrb[238].mxu0  ;;  %v6284_v53 = vsel %vm5231_vm4, %v5208_v32, 0.0  ;;  %v5207_v4 = vmax.f32 %v4601_v2, 0.0  ;;  %v6281_v45 = vadd.f32 %v6280_v54, %v6279_v24  ;;  %v12932_v5 = vpop.f32.mrb[234].mxu1 }
 0x2bc   :  { %v5737_v34 = vadd.f32 %v5736_v52, %v5735_v51  ;;  %v3356_v8 = vadd.f32 %v12721_v48, %v8664_v6  ;;  %v3350_v28 = vpop.f32.mrb[239].mxu0  ;;  %v5210_v56 = vmax.f32 %v4616_v44, 0.0  ;;  %v5209_v16 = vmax.f32 %v4611_v55, 0.0  ;;  %v12935_v52 = vpop.f32.mrb[235].mxu1 }
 0x2bd   :  { %v5738_v23 = vsel %vm5231_vm4, %v4955_v60, 0.0  ;;  %v3351_v63 = vadd.f32 %v12721_v48, %v3350_v28  ;;  %v6282_v18 = vsel %vm5231_vm4, %v5207_v4, 0.0  ;;  %v5740_v51 = vsel %vm5231_vm4, %v4956_v59, 0.0 }
 0x2be   :  { %v5739_v20 = vadd.f32 %v5738_v23, %v5737_v34  ;;  %v4958_v12 = vmax.f32 %v3356_v8, 0.0  ;;  %v6283_v2 = vadd.f32 %v6282_v18, %v6281_v45  ;;  %v4626_v60 = vadd.f32 %v12721_v48, %v12797_v38 }
 0x2bf   :  { %v4957_v6 = vmax.f32 %v3351_v63, 0.0  ;;  %v8667_v32 = vpop.f32.mrb[240].mxu0  ;;  %v6288_v44 = vsel %vm5231_vm4, %v5210_v56, 0.0  ;;  %v6286_v34 = vsel %vm5231_vm4, %v5209_v16, 0.0  ;;  %v4621_v38 = vadd.f32 %v12721_v48, %v12801_v19 }
 0x2c0   :  { %v5741_v28 = vadd.f32 %v5740_v51, %v5739_v20  ;;  %v3366_v54 = vadd.f32 %v12721_v48, %v8667_v32  ;;  %v3360_v24 = vpop.f32.mrb[241].mxu0  ;;  %v6285_v4 = vadd.f32 %v6284_v53, %v6283_v2  ;;  %v5212_v59 = vmax.f32 %v4626_v60, 0.0 }
 0x2c1   :  { %v5742_v55 = vsel %vm5231_vm4, %v4957_v6, 0.0  ;;  %v3361_v8 = vadd.f32 %v12721_v48, %v3360_v24  ;;  %v5744_v23 = vsel %vm5231_vm4, %v4958_v12, 0.0  ;;  %v5714_v16 = vadd.f32 %v5713_v39, %v12884_v42 }
 0x2c2   :  { %v5743_v18 = vadd.f32 %v5742_v55, %v5741_v28  ;;  %v4960_v63 = vmax.f32 %v3366_v54, 0.0  ;;  %v6287_v51 = vadd.f32 %v6286_v34, %v6285_v4  ;;  %v6292_v56 = vsel %vm5231_vm4, %v5212_v59, 0.0 }
 0x2c3   :  { %v4959_v45 = vmax.f32 %v3361_v8, 0.0  ;;  %v8670_v20 = vpop.f32.mrb[242].mxu0  ;;  %v5211_v53 = vmax.f32 %v4621_v38, 0.0  ;;  %v6341_v2 = vmul.f32 0.00390625, %v12900_v47  ;;  %v6378_v4 = vsel %vm6377_vm5, %v12610_v62, %v12605_v41 }
 0x2c4   :  { %v5745_v32 = vadd.f32 %v5744_v23, %v5743_v18  ;;  %v3376_v6 = vadd.f32 %v12721_v48, %v8670_v20  ;;  %v3370_v24 = vpop.f32.mrb[243].mxu0  ;;  %v5748_v12 = vsel %vm5231_vm4, %v4960_v63, 0.0  ;;  %v6289_v28 = vadd.f32 %v6288_v44, %v6287_v51 }
 0x2c5   :  { %v5746_v60 = vsel %vm5231_vm4, %v4959_v45, 0.0  ;;  %v3371_v19 = vadd.f32 %v12721_v48, %v3370_v24  ;;  %v6290_v55 = vsel %vm5231_vm4, %v5211_v53, 0.0  ;;  %v6342_v18 = vmul.f32 0.00390625, %v5714_v16 }
 0x2c6   :  { %v5747_v54 = vadd.f32 %v5746_v60, %v5745_v32  ;;  %v4962_v34 = vmax.f32 %v3376_v6, 0.0  ;;  %v6291_v8 = vadd.f32 %v6290_v55, %v6289_v28  ;;  %v6380_v44 = vsel %vm6379_vm6, %v12613_v11, %v6378_v4 }
 0x2c7   :  { %v4961_v42 = vmax.f32 %v3371_v19, 0.0  ;;  %v8673_v39 = vpop.f32.mrb[244].mxu0  ;;  %v6382_v41 = vsel %vm6381_vm7, %v12856_v36, %v6380_v44  ;;  %v4636_v28 = vadd.f32 %v12721_v48, %v12812_v33 }
 0x2c8   :  { %v5749_v47 = vadd.f32 %v5748_v12, %v5747_v54  ;;  %v3386_v59 = vadd.f32 %v12721_v48, %v8673_v39  ;;  %v3380_v23 = vpop.f32.mrb[245].mxu0  ;;  %v5752_v62 = vsel %vm5231_vm4, %v4962_v34, 0.0  ;;  %v6384_v16 = vsel %vm6383_vm8, %v12874_v40, %v6382_v41 }
 0x2c9   :  { %v5750_v63 = vsel %vm5231_vm4, %v4961_v42, 0.0  ;;  %v3381_v38 = vadd.f32 %v12721_v48, %v3380_v23  ;;  %v6386_v12 = vsel %vm6385_vm9, %v6341_v2, %v6384_v16  ;;  %v4631_v34 = vadd.f32 %v12721_v48, %v12815_v17 }
 0x2ca   :  { %v5751_v45 = vadd.f32 %v5750_v63, %v5749_v47  ;;  %v4964_v20 = vmax.f32 %v3386_v59, 0.0  ;;  %v12975_v19 = vsel %vm6387_vm10, %v6342_v18, %v6386_v12  ;;  %v6293_v55 = vadd.f32 %v6292_v56, %v6291_v8 }
 0x2cb   :  { %v4963_v51 = vmax.f32 %v3381_v38, 0.0  ;;  %v8676_v32 = vpop.f32.mrb[246].mxu0  ;;  %v5214_v4 = vmax.f32 %v4636_v28, 0.0  ;;  %v4646_v2 = vadd.f32 %v12721_v48, %v12825_v26  ;;  %v4641_v47 = vadd.f32 %v12721_v48, %v12829_v25 }
 0x2cc   :  { %v5756_v11 = vsel %vm5231_vm4, %v4964_v20, 0.0  ;;  %v5753_v6 = vadd.f32 %v5752_v62, %v5751_v45  ;;  %v3396_v24 = vadd.f32 %v12721_v48, %v8676_v32  ;;  %v3390_v53 = vpop.f32.mrb[247].mxu0  ;;  %v5213_v44 = vmax.f32 %v4631_v34, 0.0 }
 0x2cd   :  { %v5754_v60 = vsel %vm5231_vm4, %v4963_v51, 0.0  ;;  %v3391_v36 = vadd.f32 %v12721_v48, %v3390_v53  ;;  %v6296_v56 = vsel %vm5231_vm4, %v5214_v4, 0.0  ;;  %v5216_v8 = vmax.f32 %v4646_v2, 0.0 }
 0x2ce   :  { %v5755_v40 = vadd.f32 %v5754_v60, %v5753_v6  ;;  %v4966_v54 = vmax.f32 %v3396_v24, 0.0  ;;  %v6294_v26 = vsel %vm5231_vm4, %v5213_v44, 0.0  ;;  %v5215_v20 = vmax.f32 %v4641_v47, 0.0 }
 0x2cf   :  { %v4965_v42 = vmax.f32 %v3391_v36, 0.0  ;;  %v8679_v39 = vpop.f32.mrb[248].mxu0  ;;  %v6295_v62 = vadd.f32 %v6294_v26, %v6293_v55  ;;  %v6300_v51 = vsel %vm5231_vm4, %v5216_v8, 0.0  ;;  %v4656_v32 = vadd.f32 %v12721_v48, %v12839_v22 }
 0x2d0   :  { %v5760_v59 = vsel %vm5231_vm4, %v4966_v54, 0.0  ;;  %v5757_v23 = vadd.f32 %v5756_v11, %v5755_v40  ;;  %v3406_v33 = vadd.f32 %v12721_v48, %v8679_v39  ;;  %v3400_v18 = vpop.f32.mrb[249].mxu0  ;;  %v6298_v53 = vsel %vm5231_vm4, %v5215_v20, 0.0 }
 0x2d1   :  { %v5758_v63 = vsel %vm5231_vm4, %v4965_v42, 0.0  ;;  %v3401_v17 = vadd.f32 %v12721_v48, %v3400_v18  ;;  %v6297_v36 = vadd.f32 %v6296_v56, %v6295_v62  ;;  %v5218_v28 = vmax.f32 %v4656_v32, 0.0 }
 0x2d2   :  { %v5759_v38 = vadd.f32 %v5758_v63, %v5757_v23  ;;  %v4968_v45 = vmax.f32 %v3406_v33, 0.0  ;;  %v4651_v34 = vadd.f32 %v12721_v48, %v12843_v37  ;;  %v4666_v22 = vadd.f32 %v12721_v48, %v12853_v7 }
 0x2d3   :  { %v4967_v25 = vmax.f32 %v3401_v17, 0.0  ;;  %v8682_v41 = vpop.f32.mrb[250].mxu0  ;;  %v6299_v39 = vadd.f32 %v6298_v53, %v6297_v36  ;;  %v6304_v4 = vsel %vm5231_vm4, %v5218_v28, 0.0  ;;  %v4661_v2 = vadd.f32 %v12721_v48, %v12861_v35 }
 0x2d4   :  { %v5764_v16 = vsel %vm5231_vm4, %v4968_v45, 0.0  ;;  %v5761_v11 = vadd.f32 %v5760_v59, %v5759_v38  ;;  %v3416_v6 = vadd.f32 %v12721_v48, %v8682_v41  ;;  %v3410_v24 = vpop.f32.mrb[251].mxu0  ;;  %v5217_v18 = vmax.f32 %v4651_v34, 0.0 }
 0x2d5   :  { %v5762_v12 = vsel %vm5231_vm4, %v4967_v25, 0.0  ;;  %v3411_v60 = vadd.f32 %v12721_v48, %v3410_v24  ;;  %v6301_v7 = vadd.f32 %v6300_v51, %v6299_v39  ;;  %v5220_v63 = vmax.f32 %v4666_v22, 0.0 }
 0x2d6   :  { %v5763_v40 = vadd.f32 %v5762_v12, %v5761_v11  ;;  %v4970_v54 = vmax.f32 %v3416_v6, 0.0  ;;  %v6302_v8 = vsel %vm5231_vm4, %v5217_v18, 0.0  ;;  %v5219_v38 = vmax.f32 %v4661_v2, 0.0 }
 0x2d7   :  { %v4969_v55 = vmax.f32 %v3411_v60, 0.0  ;;  %v8685_v42 = vpop.f32.mrb[252].mxu0  ;;  %v6303_v26 = vadd.f32 %v6302_v8, %v6301_v7  ;;  %v6308_v20 = vsel %vm5231_vm4, %v5220_v63, 0.0  ;;  %v4676_v25 = vadd.f32 %v12721_v48, %v12872_v14 }
 0x2d8   :  { %v5768_v47 = vsel %vm5231_vm4, %v4970_v54, 0.0  ;;  %v5765_v59 = vadd.f32 %v5764_v16, %v5763_v40  ;;  %v3426_v23 = vadd.f32 %v12721_v48, %v8685_v42  ;;  %v3420_v33 = vpop.f32.mrb[253].mxu0  ;;  %v6306_v16 = vsel %vm5231_vm4, %v5219_v38, 0.0 }
 0x2d9   :  { %v5766_v37 = vsel %vm5231_vm4, %v4969_v55, 0.0  ;;  %v3421_v44 = vadd.f32 %v12721_v48, %v3420_v33  ;;  %v6305_v24 = vadd.f32 %v6304_v4, %v6303_v26  ;;  %v5222_v53 = vmax.f32 %v4676_v25, 0.0 }
 0x2da   :  { %v5767_v17 = vadd.f32 %v5766_v37, %v5765_v59  ;;  %v4972_v56 = vmax.f32 %v3426_v23, 0.0  ;;  %v4671_v36 = vadd.f32 %v12721_v48, %v12877_v50  ;;  %v4686_v14 = vadd.f32 %v12721_v48, %v12888_v1 }
 0x2db   :  { %v4971_v45 = vmax.f32 %v3421_v44, 0.0  ;;  %v8688_v35 = vpop.f32.mrb[254].mxu0  ;;  %v6307_v54 = vadd.f32 %v6306_v16, %v6305_v24  ;;  %v6312_v34 = vsel %vm5231_vm4, %v5222_v53, 0.0  ;;  %v4681_v22 = vadd.f32 %v12721_v48, %v12891_v9 }
 0x2dc   :  { %v5772_v41 = vsel %vm5231_vm4, %v4972_v56, 0.0  ;;  %v5769_v62 = vadd.f32 %v5768_v47, %v5767_v17  ;;  %v3436_v32 = vadd.f32 %v12721_v48, %v8688_v35  ;;  %v3430_v51 = vpop.f32.mrb[255].mxu0  ;;  %v5221_v2 = vmax.f32 %v4671_v36, 0.0 }
 0x2dd   :  { %v5770_v11 = vsel %vm5231_vm4, %v4971_v45, 0.0  ;;  %v3431_v6 = vadd.f32 %v12721_v48, %v3430_v51  ;;  %v6309_v1 = vadd.f32 %v6308_v20, %v6307_v54  ;;  %v5224_v59 = vmax.f32 %v4686_v14, 0.0 }
 0x2de   :  { %v5771_v12 = vadd.f32 %v5770_v11, %v5769_v62  ;;  %v4974_v60 = vmax.f32 %v3436_v32, 0.0  ;;  %v6310_v18 = vsel %vm5231_vm4, %v5221_v2, 0.0  ;;  %v5223_v37 = vmax.f32 %v4681_v22, 0.0 }
 0x2df   :  { %v4973_v28 = vmax.f32 %v3431_v6, 0.0  ;;  %v8691_v40 = vpop.f32.mrb[0].mxu0  ;;  %v6311_v7 = vadd.f32 %v6310_v18, %v6309_v1  ;;  %v6316_v63 = vsel %vm5231_vm4, %v5224_v59, 0.0  ;;  %v4696_v17 = vadd.f32 %v12721_v48, %v12904_v31 }
 0x2e0   :  { %v5776_v55 = vsel %vm5231_vm4, %v4974_v60, 0.0  ;;  %v5773_v42 = vadd.f32 %v5772_v41, %v5771_v12  ;;  %v3446_v39 = vadd.f32 %v12721_v48, %v8691_v40  ;;  %v3440_v4 = vpop.f32.mrb[1].mxu0  ;;  %v6314_v35 = vsel %vm5231_vm4, %v5223_v37, 0.0 }
 0x2e1   :  { %v5774_v50 = vsel %vm5231_vm4, %v4973_v28, 0.0  ;;  %v3441_v47 = vadd.f32 %v12721_v48, %v3440_v4  ;;  %v6313_v25 = vadd.f32 %v6312_v34, %v6311_v7  ;;  %v5226_v41 = vmax.f32 %v4696_v17, 0.0 }
 0x2e2   :  { %v5775_v23 = vadd.f32 %v5774_v50, %v5773_v42  ;;  %v4976_v33 = vmax.f32 %v3446_v39, 0.0  ;;  %v4691_v31 = vadd.f32 %v12721_v48, %v12906_v15  ;;  %v4706_v24 = vadd.f32 %v12721_v48, %v12917_v43 }
 0x2e3   :  { %v4975_v44 = vmax.f32 %v3441_v47, 0.0  ;;  %v8694_v9 = vpop.f32.mrb[2].mxu0  ;;  %v6315_v6 = vadd.f32 %v6314_v35, %v6313_v25  ;;  %v6320_v36 = vsel %vm5231_vm4, %v5226_v41, 0.0  ;;  %v4701_v50 = vadd.f32 %v12721_v48, %v12922_v29 }
 0x2e4   :  { %v5777_v56 = vadd.f32 %v5776_v55, %v5775_v23  ;;  %v5785_v8 = vsel %vm5231_vm4, %v4976_v33, 0.0  ;;  %v3456_v38 = vadd.f32 %v12721_v48, %v8694_v9  ;;  %v3450_v45 = vpop.f32.mrb[3].mxu0  ;;  %v5225_v14 = vmax.f32 %v4691_v31, 0.0 }
 0x2e5   :  { %v5784_v26 = vsel %vm5231_vm4, %v4975_v44, 0.0  ;;  %v3451_v20 = vadd.f32 %v12721_v48, %v3450_v45  ;;  %v6317_v15 = vadd.f32 %v6316_v63, %v6315_v6  ;;  %v5228_v2 = vmax.f32 %v4706_v24, 0.0  ;;  %v13061_v45 = vld [vmem:[%s13272_s2] ss:$0 sm:$0xff] }
 0x2e6   :  { %v5778_v62 = vrot.slane %v5777_v56, 4  ;;  %v5786_v32 = vadd.f32 %v5785_v8, %v5784_v26  ;;  %v4978_v51 = vmax.f32 %v3456_v38, 0.0  ;;  %v6318_v43 = vsel %vm5231_vm4, %v5225_v14, 0.0 }
 0x2e7   :  { %v4977_v16 = vmax.f32 %v3451_v20, 0.0  ;;  %v8697_v11 = vpop.f32.mrb[4].mxu0  ;;  %v6319_v4 = vadd.f32 %v6318_v43, %v6317_v15  ;;  %v5227_v44 = vmax.f32 %v4701_v50, 0.0  ;;  %v4711_v35 = vadd.f32 %v13061_v45, %v12935_v52 }
 0x2e8   :  { %v5779_v53 = vadd.f32 %v5778_v62, %v5777_v56  ;;  %v3466_v12 = vadd.f32 %v12721_v48, %v8697_v11  ;;  %v3460_v60 = vpop.f32.mrb[5].mxu0  ;;  %v5789_v28 = vsel %vm5231_vm4, %v4978_v51, 0.0  ;;  %v4716_v56 = vadd.f32 %v12721_v48, %v12932_v5 }
 0x2e9   :  { %v5787_v40 = vsel %vm5231_vm4, %v4977_v16, 0.0  ;;  %v3461_v54 = vadd.f32 %v12721_v48, %v3460_v60  ;;  %v6321_v9 = vadd.f32 %v6320_v36, %v6319_v4  ;;  %v6322_v38 = vsel %vm5231_vm4, %v5227_v44, 0.0 }
 0x2ea   :  { %v5780_v34 = vrot.slane %v5779_v53, 2  ;;  %v5788_v22 = vadd.f32 %v5787_v40, %v5786_v32  ;;  %v4980_v55 = vmax.f32 %v3466_v12, 0.0  ;;  %v6324_v62 = vsel %vm5231_vm4, %v5228_v2, 0.0 }
 0x2eb   :  { %v4979_v42 = vmax.f32 %v3461_v54, 0.0  ;;  %v8700_v39 = vpop.f32.mrb[6].mxu0  ;;  %v6323_v51 = vadd.f32 %v6322_v38, %v6321_v9  ;;  %v5230_v31 = vmax.f32 %v4716_v56, 0.0  ;;  %v5229_v6 = vmax.f32 %v4711_v35, 0.0 }
 0x2ec   :  { %v5781_v47 = vadd.f32 %v5780_v34, %v5779_v53  ;;  %v5793_v1 = vsel %vm5231_vm4, %v4980_v55, 0.0  ;;  %v5790_v59 = vadd.f32 %v5789_v28, %v5788_v22  ;;  %v3476_v23 = vadd.f32 %v12721_v48, %v8700_v39  ;;  %v3470_v33 = vpop.f32.mrb[7].mxu0 }
 0x2ed   :  { %v5791_v18 = vsel %vm5231_vm4, %v4979_v42, 0.0  ;;  %v3471_v37 = vadd.f32 %v12721_v48, %v3470_v33  ;;  %v9303_v48 = vmov 0.0|0.0   ;;  %v6325_v60 = vadd.f32 %v6324_v62, %v6323_v51 }
 0x2ee   :  { %v5792_v7 = vadd.f32 %v5791_v18, %v5790_v59  ;;  %v4982_v63 = vmax.f32 %v3476_v23, 0.0  ;;  %v5782_v17 = vrot.slane %v5781_v47, 1  ;;  %9193 = vmatprep.subr.bf16.mxu1 %v9303_v48  ;;  %v6328_v34 = vsel %vm5231_vm4, %v5230_v31, 0.0 }
 0x2ef   :  { %v4981_v29 = vmax.f32 %v3471_v37, 0.0  ;;  %v8703_v8 = vpop.f32.mrb[8].mxu0  ;;  %v6326_v22 = vsel %vm5231_vm4, %v5229_v6, 0.0 }
 0x2f0   :  { %v5794_v26 = vadd.f32 %v5793_v1, %v5792_v7  ;;  %v3486_v20 = vadd.f32 %v13061_v45, %v8703_v8  ;;  %v3480_v25 = vpop.f32.mrb[9].mxu0  ;;  %v5783_v41 = vadd.f32 %v5782_v17, %v5781_v47  ;;  %v5797_v52 = vsel %vm5231_vm4, %v4982_v63, 0.0 }
 0x2f1   :  { %v5795_v5 = vsel %vm5231_vm4, %v4981_v29, 0.0  ;;  %v3481_v32 = vadd.f32 %v13061_v45, %v3480_v25  ;;  %v6327_v43 = vadd.f32 %v6326_v22, %v6325_v60 }
 0x2f2   :  { %v5796_v16 = vadd.f32 %v5795_v5, %v5794_v26  ;;  %v6343_v11 = vmul.f32 0.00390625, %v5783_v41  ;;  %v4984_v24 = vmax.f32 %v3486_v20, 0.0 }
 0x2f3   :  { %v4983_v53 = vmax.f32 %v3481_v32, 0.0  ;;  %v8706_v12 = vpop.f32.mrb[10].mxu0  ;;  %v13081_v1 = vadd.f32 %v6328_v34, %v6327_v43 }
 0x2f4   :  { %v5798_v36 = vadd.f32 %v5797_v52, %v5796_v16  ;;  %v3496_v14 = vadd.f32 %v13061_v45, %v8706_v12  ;;  %v3490_v28 = vpop.f32.mrb[11].mxu0  ;;  %v6390_v40 = vsel %vm6389_vm11, %v6343_v11, %v12975_v19  ;;  %v5801_v42 = vsel %vm5231_vm4, %v4984_v24, 0.0 }
 0x2f5   :  { %v5799_v54 = vsel %vm5231_vm4, %v4983_v53, 0.0  ;;  %v3491_v15 = vadd.f32 %v13061_v45, %v3490_v28  ;;  %9077 = vmatprep.mubr.msk.f32.mxu1 %vm5231_vm4, %v6390_v40  ;;  %v3541_v12 = vadd.f32 %v13061_v45, %v10273_v61  ;;  %v3546_v28 = vadd.f32 %v13061_v45, %v10267_v58 }
 0x2f6   :  { %v5800_v55 = vadd.f32 %v5799_v54, %v5798_v36  ;;  %v4986_v39 = vmax.f32 %v3496_v14, 0.0 }
 0x2f7   :  { %v4985_v4 = vmax.f32 %v3491_v15, 0.0  ;;  %v8709_v2 = vpop.f32.mrb[12].mxu0  ;;  %v4995_v22 = vmax.f32 %v3541_v12, 0.0  ;;  %v13295_v12 = vld [vmem:[#allocation9_spill] sm:$0xff] }
 0x2f8   :  { %v5802_v50 = vadd.f32 %v5801_v42, %v5800_v55  ;;  %v3506_v19 = vadd.f32 %v13061_v45, %v8709_v2  ;;  %v3500_v47 = vpop.f32.mrb[13].mxu0  ;;  %v5805_v18 = vsel %vm5231_vm4, %v4986_v39, 0.0  ;;  %v3551_v55 = vadd.f32 %v13061_v45, %v10297_v13 }
 0x2f9   :  { %v5803_v59 = vsel %vm5231_vm4, %v4985_v4, 0.0  ;;  %v3501_v23 = vadd.f32 %v13061_v45, %v3500_v47  ;;  %v4996_v42 = vmax.f32 %v3546_v28, 0.0  ;;  %v3556_v39 = vadd.f32 %v13061_v45, %v10291_v10 }
 0x2fa   :  { %v5804_v33 = vadd.f32 %v5803_v59, %v5802_v50  ;;  %v4988_v37 = vmax.f32 %v3506_v19, 0.0  ;;  %v5823_v58 = vsel %vm5231_vm4, %v4995_v22, 0.0  ;;  %v4997_v50 = vmax.f32 %v3551_v55, 0.0 }
 0x2fb   :  { %v4987_v44 = vmax.f32 %v3501_v23, 0.0  ;;  %v8712_v9 = vpop.f32.mrb[14].mxu0  ;;  %v3561_v19 = vadd.f32 %v13061_v45, %v10321_v30  ;;  %v5825_v59 = vsel %vm5231_vm4, %v4996_v42, 0.0  ;;  %v4998_v13 = vmax.f32 %v3556_v39, 0.0 }
 0x2fc   :  { %v5806_v7 = vadd.f32 %v5805_v18, %v5804_v33  ;;  %v3516_v63 = vadd.f32 %v13061_v45, %v8712_v9  ;;  %v3510_v17 = vpop.f32.mrb[15].mxu0  ;;  %v5809_v38 = vsel %vm5231_vm4, %v4988_v37, 0.0  ;;  %v3566_v23 = vadd.f32 %v13061_v45, %v10315_v27 }
 0x2fd   :  { %v5807_v56 = vsel %vm5231_vm4, %v4987_v44, 0.0  ;;  %v3511_v29 = vadd.f32 %v13061_v45, %v3510_v17  ;;  %v5827_v18 = vsel %vm5231_vm4, %v4997_v50, 0.0  ;;  %v4999_v10 = vmax.f32 %v3561_v19, 0.0 }
 0x2fe   :  { %v5808_v8 = vadd.f32 %v5807_v56, %v5806_v7  ;;  %v4990_v35 = vmax.f32 %v3516_v63, 0.0  ;;  %v3571_v37 = vadd.f32 %v13061_v45, %v10351_v49  ;;  %v5829_v9 = vsel %vm5231_vm4, %v4998_v13, 0.0 }
 0x2ff   :  { %v4989_v26 = vmax.f32 %v3511_v29, 0.0  ;;  %v8715_v20 = vpop.f32.mrb[16].mxu0  ;;  %v5000_v7 = vmax.f32 %v3566_v23, 0.0  ;;  %v3576_v30 = vadd.f32 %v13061_v45, %v10345_v46  ;;  %v5831_v17 = vsel %vm5231_vm4, %v4999_v10, 0.0 }
 0x300   :  { %v5810_v25 = vadd.f32 %v5809_v38, %v5808_v8  ;;  %v3526_v41 = vadd.f32 %v13061_v45, %v8715_v20  ;;  %v3520_v62 = vpop.f32.mrb[17].mxu0  ;;  %v5813_v31 = vsel %vm5231_vm4, %v4990_v35, 0.0  ;;  %v5001_v56 = vmax.f32 %v3571_v37, 0.0 }
 0x301   :  { %v5811_v5 = vsel %vm5231_vm4, %v4989_v26, 0.0  ;;  %v3521_v32 = vadd.f32 %v13061_v45, %v3520_v62  ;;  %v3581_v27 = vadd.f32 %v13061_v45, %v10375_v3  ;;  %v5833_v8 = vsel %vm5231_vm4, %v5000_v7, 0.0 }
 0x302   :  { %v5812_v51 = vadd.f32 %v5811_v5, %v5810_v25  ;;  %v4992_v16 = vmax.f32 %v3526_v41, 0.0  ;;  %v5002_v38 = vmax.f32 %v3576_v30, 0.0  ;;  %v3586_v49 = vadd.f32 %v13061_v45, %v10369_v0  ;;  %v13291_v5 = vld [vmem:[#allocation5_spill] sm:$0xff] }
 0x303   :  { %v4991_v11 = vmax.f32 %v3521_v32, 0.0  ;;  %v8718_v6 = vpop.f32.mrb[18].mxu0  ;;  %v5835_v26 = vsel %vm5231_vm4, %v5001_v56, 0.0  ;;  %v5003_v20 = vmax.f32 %v3581_v27, 0.0  ;;  %v3591_v46 = vadd.f32 %v13061_v45, %v10399_v21 }
 0x304   :  { %v5814_v52 = vadd.f32 %v5813_v31, %v5812_v51  ;;  %v3536_v24 = vadd.f32 %v13061_v45, %v8718_v6  ;;  %v3530_v53 = vpop.f32.mrb[19].mxu0  ;;  %v5817_v40 = vsel %vm5231_vm4, %v4992_v16, 0.0  ;;  %v5916_v25 = vrot.slane %v10855_v57, 4  ;;  %v13292_v51 = vld [vmem:[#allocation6_spill] sm:$0xff]  ;;  %v13293_v16 = vld [vmem:[#allocation7_spill] sm:$0xff] }
 0x305   :  { %v5815_v60 = vsel %vm5231_vm4, %v4991_v11, 0.0  ;;  %v3531_v36 = vadd.f32 %v13061_v45, %v3530_v53  ;;  %v5837_v62 = vsel %vm5231_vm4, %v5002_v38, 0.0  ;;  %v5004_v3 = vmax.f32 %v3586_v49, 0.0 }
 0x306   :  { %v5816_v14 = vadd.f32 %v5815_v60, %v5814_v52  ;;  %v4994_v54 = vmax.f32 %v3536_v24, 0.0  ;;  %v3596_v32 = vadd.f32 %v13061_v45, %v13291_v5  ;;  %v5985_v31 = vrot.slane %v13292_v51, 4  ;;  %v13294_v24 = vld [vmem:[#allocation8_spill] sm:$0xff] }
 0x307   :  { %v4993_v15 = vmax.f32 %v3531_v36, 0.0  ;;  %v6054_v0 = vrot.slane %v13293_v16, 4  ;;  %v5839_v6 = vsel %vm5231_vm4, %v5003_v20, 0.0  ;;  %v5005_v52 = vmax.f32 %v3591_v46, 0.0 }
 0x308   :  { %v5818_v34 = vadd.f32 %v5817_v40, %v5816_v14  ;;  %v5821_v4 = vsel %vm5231_vm4, %v4994_v54, 0.0  ;;  %v6123_v53 = vrot.slane %v13294_v24, 4  ;;  %v5917_v21 = vadd.f32 %v5916_v25, %v10855_v57  ;;  %v13296_v40 = vld [vmem:[#allocation10_spill] sm:$0xff] }
 0x309   :  { %v5819_v43 = vsel %vm5231_vm4, %v4993_v15, 0.0  ;;  %v6192_v60 = vrot.slane %v13295_v12, 4  ;;  %v5841_v14 = vsel %vm5231_vm4, %v5004_v3, 0.0  ;;  %v5006_v28 = vmax.f32 %v3596_v32, 0.0 }
 0x30a   :  { %v5820_v61 = vadd.f32 %v5819_v43, %v5818_v34  ;;  %v5986_v45 = vadd.f32 %v5985_v31, %v13292_v51  ;;  %v6261_v54 = vrot.slane %v13296_v40, 4  ;;  %v6055_v15 = vadd.f32 %v6054_v0, %v13293_v16 }
 0x30b   :  { %v6330_v22 = vrot.slane %v13081_v1, 4  ;;  %v5843_v55 = vsel %vm5231_vm4, %v5005_v52, 0.0  ;;  %v6124_v43 = vadd.f32 %v6123_v53, %v13294_v24  ;;  %v5918_v57 = vrot.slane %v5917_v21, 2  ;;  %v6477_v24 = vld [vmem:[%s13274_s4] sm:$0xff]  ;;  %v6478_v53 = vld [vmem:[%s13274_s4 + $0x8] sm:$0xff] }
 0x30c   :  { %v5822_v2 = vadd.f32 %v5821_v4, %v5820_v61  ;;  %v6193_v61 = vadd.f32 %v6192_v60, %v13295_v12  ;;  %v5845_v39 = vsel %vm5231_vm4, %v5006_v28, 0.0  ;;  %v5987_v4 = vrot.slane %v5986_v45, 2 }
 0x30d   :  { %v6331_v19 = vadd.f32 %v6330_v22, %v13081_v1 }
 0x30e   :  { %v5824_v47 = vadd.f32 %v5823_v58, %v5822_v2  ;;  %v6262_v2 = vadd.f32 %v6261_v54, %v13296_v40  ;;  %v6056_v58 = vrot.slane %v6055_v15, 2  ;;  %v6194_v13 = vrot.slane %v6193_v61, 2  ;;  %v6479_v54 = vld [vmem:[%s13274_s4 + $0x10] sm:$0xff] }
 0x30f   :  { %v6332_v37 = vrot.slane %v6331_v19, 2 }
 0x310   :  { %v5826_v33 = vadd.f32 %v5825_v59, %v5824_v47  ;;  %v6125_v47 = vrot.slane %v6124_v43, 2  ;;  %v5919_v59 = vadd.f32 %v5918_v57, %v5917_v21  ;;  %v6057_v10 = vadd.f32 %v6056_v58, %v6055_v15  ;;  %v6480_v15 = vld [vmem:[%s13274_s4 + $0x18] sm:$0xff] }
 0x311   :  { %v6195_v30 = vadd.f32 %v6194_v13, %v6193_v61  ;;  %v13173_v22 = vpack.c.bf16 %v6480_v15, %v6479_v54 }
 0x312   :  { %v5828_v44 = vadd.f32 %v5827_v18, %v5826_v33  ;;  %v5988_v33 = vadd.f32 %v5987_v4, %v5986_v45  ;;  %v6263_v18 = vrot.slane %v6262_v2, 2  ;;  %v5920_v7 = vrot.slane %v5919_v59, 1 }
 0x313   :  { %v6058_v27 = vrot.slane %v6057_v10, 1  ;;  %v6196_v49 = vrot.slane %v6195_v30, 1  ;;  %v13161_v45 = vpack.c.bf16 %v6478_v53, %v6477_v24 }
 0x314   :  { %v5830_v63 = vadd.f32 %v5829_v9, %v5828_v44  ;;  %v6126_v9 = vadd.f32 %v6125_v47, %v6124_v43  ;;  %v6264_v56 = vadd.f32 %v6263_v18, %v6262_v2  ;;  %v5921_v1 = vadd.f32 %v5920_v7, %v5919_v59  ;;  %v7720_v43 = vld [vmem:[%s13275_s5] ss:$0 sm:$0xff] }
 0x315   :  { %v6059_v46 = vadd.f32 %v6058_v27, %v6057_v10  ;;  %v6197_v5 = vadd.f32 %v6196_v49, %v6195_v30 }
 0x316   :  { %v5832_v29 = vadd.f32 %v5831_v17, %v5830_v63  ;;  %v5989_v17 = vrot.slane %v5988_v33, 1  ;;  %v6127_v38 = vrot.slane %v6126_v9, 1  ;;  %v6265_v20 = vrot.slane %v6264_v56, 1 }
 0x317   :  { %v6345_v3 = vmul.f32 0.00390625, %v5921_v1  ;;  %v6347_v16 = vmul.f32 0.00390625, %v6059_v46  ;;  %v6349_v21 = vmul.f32 0.00390625, %v6197_v5 }
 0x318   :  { %v5834_v35 = vadd.f32 %v5833_v8, %v5832_v29  ;;  %v6333_v29 = vadd.f32 %v6332_v37, %v6331_v19  ;;  %v6266_v31 = vadd.f32 %v6265_v20, %v6264_v56 }
 0x31a   :  { %v5836_v41 = vadd.f32 %v5835_v26, %v5834_v35  ;;  %v5990_v26 = vadd.f32 %v5989_v17, %v5988_v33  ;;  %v6334_v25 = vrot.slane %v6333_v29, 1  ;;  %v6350_v60 = vmul.f32 0.00390625, %v6266_v31 }
 0x31c   :  { %v5838_v11 = vadd.f32 %v5837_v62, %v5836_v41  ;;  %v6128_v62 = vadd.f32 %v6127_v38, %v6126_v9  ;;  %v6346_v51 = vmul.f32 0.00390625, %v5990_v26  ;;  %v6335_v0 = vadd.f32 %v6334_v25, %v6333_v29 }
 0x31e   :  { %v5840_v36 = vadd.f32 %v5839_v6, %v5838_v11  ;;  %v6348_v6 = vmul.f32 0.00390625, %v6128_v62 }
 0x320   :  { %v5842_v34 = vadd.f32 %v5841_v14, %v5840_v36  ;;  %v6351_v14 = vmul.f32 0.00390625, %v6335_v0  ;;  %v7106_v0 = vld [vmem:[%s13276_s6 + $0x8] sm:$0xff] }
 0x322   :  { %v5844_v42 = vadd.f32 %v5843_v55, %v5842_v34  ;;  %v9305_v55 = vmov 0.0  }
 0x324   :  { %v5846_v50 = vadd.f32 %v5845_v39, %v5844_v42 }
 0x326   :  { %v5847_v23 = vrot.slane %v5846_v50, 4 }
 0x328   :  { %v5848_v44 = vadd.f32 %v5847_v23, %v5846_v50 }
 0x32a   :  { %v5849_v63 = vrot.slane %v5848_v44, 2 }
 0x32c   :  { %v5850_v8 = vadd.f32 %v5849_v63, %v5848_v44 }
 0x32e   :  { %v5851_v35 = vrot.slane %v5850_v8, 1 }
 0x330   :  { %v5852_v41 = vadd.f32 %v5851_v35, %v5850_v8 }
 0x332   :  { %v6344_v32 = vmul.f32 0.00390625, %v5852_v41 }
 0x334   :  { %v6391_v11 = vsel %vm6377_vm5, %v6345_v3, %v6344_v32 }
 0x335   :  { %v6392_v52 = vsel %vm6379_vm6, %v6346_v51, %v6391_v11  ;;  %v7107_v11 = vld [vmem:[%s13276_s6 + $0x10] sm:$0xff] }
 0x336   :  { %v6393_v12 = vsel %vm6381_vm7, %v6347_v16, %v6392_v52  ;;  %v7105_v16 = vld [vmem:[%s13276_s6] sm:$0xff]  ;;  %v7108_v52 = vld [vmem:[%s13276_s6 + $0x18] sm:$0xff]  ;;  %s9306_s6 = smov [#allocation2]  }
 0x337   :  { %v6394_v36 = vsel %vm6383_vm8, %v6348_v6, %v6393_v12  ;;  %v9242_v6 = vpack.c.bf16 %v7106_v0, %v7105_v16  ;;  %v9245_v24 = vpack.c.bf16 %v7108_v52, %v7107_v11  ;;  %s7198_s11 = sshll.u32 %s9306_s6, 4  ;;  %s7199_s11 = int_to_ptr.vmem [resolvable:$true] %s7198_s11 }
 0x338   :  { %v6395_v28 = vsel %vm6385_vm9, %v6349_v21, %v6394_v36  ;;  %s9278_s12 = scalar_lea.vmem %s7199_s11, 32  ;;  %p9283_p1 = scmp.lt.s32.totalorder %s7199_s11, %s7199_s11 }
 0x339   :  { %v6396_v40 = vsel %vm6387_vm10, %v6350_v60, %v6395_v28  ;;  %v7730_v28 = vld [vmem:[%s13277_s7] ss:$0 sm:$0xff]  ;;  %p9279_p0 = scmp.ne.s32.totalorder %s7199_s11, %s9278_s12  ;;  %p9284_p2 = scmp.lt.s32.totalorder %s9278_s12, %s9278_s12 }
 0x33a   :  { %v6397_v34 = vsel %vm6389_vm11, %v6351_v14, %v6396_v40 }
 0x33b   :  { %9078 = vmatmul.mubr.msk.f32.vlgmr.msra.gmra.mrb[236].mxu1 %vm5231_vm4, %v6397_v34  ;;  %p9285_p3 = por %p9284_p2, %p9283_p1 }
 0x33c   :  { %9195 = vmatpush3.bf16.msra.mxu1 %v13161_v45  ;;  %9088 = vmatprep.mubr.msk.f32.mxu1 %vm9304_vm12, %v9305_v55 }
 0x33d   :  { %9196 = vmatprep.subr.bf16.mxu1 %v9303_v48  ;;  %p9286_p4 = pnand %p9285_p3, %p9279_p0 }
 0x340   :  { %9198 = vmatpush3.bf16.msra.mxu1 %v13173_v22 }
 0x341   :  { %9199 = vmatprep.subr.bf16.mxu1 %v9303_v48 }
 0x343   :  { %9089 = vmatmul.mubr.f32.vlgmr.msra.gmra.mrb[238].mxu1 %v9305_v55 }
 0x344   :  { %9201 = vmatpush3.bf16.msra.mxu1 %v13161_v45  ;;  %9099 = vmatprep.mubr.msk.f32.mxu1 %vm9304_vm12, %v9305_v55 }
 0x345   :  { %9202 = vmatprep.subr.bf16.mxu1 %v9303_v48 }
 0x348   :  { %9204 = vmatpush3.bf16.msra.mxu1 %v13173_v22 }
 0x349   :  { %9205 = vmatprep.subr.bf16.mxu1 %v9303_v48 }
 0x40e   :  { %v9079_v57 = vpop.f32.mrb[236].mxu1 }
 0x40f   :  { %v13190_v61 = vadd.f32 %v9079_v57, %v7720_v43  ;;  %v6468_v42 = vpop.f32.mrb[237].mxu1 }
 0x410   :  { %v6469_v39 = vadd.f32 %v7720_v43, %v6468_v42 }
 0x416   :  { %v6551_v4 = vpop.f32.mrb[238].mxu1 }
 0x417   :  { %v6555_v2 = vadd.f32 %v6551_v4, %v6469_v39  ;;  %v9090_v58 = vpop.f32.mrb[239].mxu1 }
 0x419   :  { %9256 = vtanh.f32 %v6555_v2 }
 0x423   :  { %v9257_v50 = vpop.eup %9256 }
 0x424   :  { %9100 = vmatmul.mubr.msk.f32.vlgmr.msra.gmra.mrb[240].mxu1 %vm6481_vm13, %v9257_v50 }
 0x425   :  { %9207 = vmatpush3.bf16.msra.mxu1 %v13161_v45  ;;  %9110 = vmatprep.mubr.msk.f32.mxu1 %vm9304_vm12, %v9305_v55 }
 0x426   :  { %9208 = vmatprep.subr.bf16.mxu1 %v9303_v48 }
 0x429   :  { %9210 = vmatpush3.bf16.msra.mxu1 %v13173_v22 }
 0x42a   :  { %9211 = vmatprep.subr.bf16.mxu1 %v9303_v48 }
 0x4f7   :  { %v6626_v19 = vpop.f32.mrb[240].mxu1 }
 0x4f8   :  { %v6631_v47 = vrot.slane %v6626_v19, 6  ;;  %v9101_v59 = vpop.f32.mrb[241].mxu1 }
 0x4fa   :  { %v6633_v13 = vadd.f32 %v6631_v47, %v6469_v39 }
 0x4fc   :  { %9258 = vtanh.f32 %v6633_v13 }
 0x506   :  { %v9259_v23 = vpop.eup %9258 }
 0x507   :  { %v6636_v33 = vrot.slane %v9259_v23, 2 }
 0x509   :  { %9111 = vmatmul.mubr.msk.f32.vlgmr.msra.gmra.mrb[242].mxu1 %vm6481_vm13, %v6636_v33 }
 0x50a   :  { %9213 = vmatpush3.bf16.msra.mxu1 %v13161_v45  ;;  %9121 = vmatprep.mubr.msk.f32.mxu1 %vm9304_vm12, %v9305_v55 }
 0x50b   :  { %9214 = vmatprep.subr.bf16.mxu1 %v9303_v48 }
 0x50e   :  { %9216 = vmatpush3.bf16.msra.mxu1 %v13173_v22 }
 0x50f   :  { %9217 = vmatprep.subr.bf16.mxu1 %v9303_v48 }
 0x5dc   :  { %v6705_v18 = vpop.f32.mrb[242].mxu1 }
 0x5dd   :  { %v6710_v10 = vrot.slane %v6705_v18, 4  ;;  %v9112_v37 = vpop.f32.mrb[243].mxu1 }
 0x5df   :  { %v6712_v44 = vadd.f32 %v6710_v10, %v6469_v39 }
 0x5e1   :  { %9260 = vtanh.f32 %v6712_v44 }
 0x5eb   :  { %v9261_v9 = vpop.eup %9260 }
 0x5ec   :  { %v6715_v7 = vrot.slane %v9261_v9, 4 }
 0x5ee   :  { %9122 = vmatmul.mubr.msk.f32.vlgmr.msra.gmra.mrb[244].mxu1 %vm6481_vm13, %v6715_v7 }
 0x5ef   :  { %9219 = vmatpush3.bf16.msra.mxu1 %v13161_v45  ;;  %9132 = vmatprep.mubr.msk.f32.mxu1 %vm9304_vm12, %v9305_v55 }
 0x5f0   :  { %9220 = vmatprep.subr.bf16.mxu1 %v9303_v48 }
 0x5f3   :  { %9222 = vmatpush3.bf16.msra.mxu1 %v13173_v22 }
 0x5f4   :  { %9223 = vmatprep.subr.bf16.mxu1 %v9303_v48 }
 0x6c1   :  { %v6784_v30 = vpop.f32.mrb[244].mxu1 }
 0x6c2   :  { %v6789_v63 = vrot.slane %v6784_v30, 2  ;;  %v9123_v17 = vpop.f32.mrb[245].mxu1 }
 0x6c4   :  { %v6791_v56 = vadd.f32 %v6789_v63, %v6469_v39 }
 0x6c6   :  { %9262 = vtanh.f32 %v6791_v56 }
 0x6d0   :  { %v9263_v27 = vpop.eup %9262 }
 0x6d1   :  { %v6794_v29 = vrot.slane %v9263_v27, 6 }
 0x6d3   :  { %9133 = vmatmul.mubr.msk.f32.vlgmr.msra.gmra.mrb[246].mxu1 %vm6481_vm13, %v6794_v29 }
 0x6d4   :  { %9225 = vmatpush3.bf16.msra.mxu1 %v13161_v45  ;;  %9143 = vmatprep.mubr.msk.f32.mxu1 %vm9304_vm12, %v9305_v55 }
 0x6d5   :  { %9226 = vmatprep.subr.bf16.mxu1 %v9303_v48 }
 0x6d8   :  { %9228 = vmatpush3.bf16.msra.mxu1 %v13173_v22 }
 0x6d9   :  { %9229 = vmatprep.subr.bf16.mxu1 %v9303_v48 }
 0x7a6   :  { %v6863_v8 = vpop.f32.mrb[246].mxu1 }
 0x7a7   :  { %v6867_v38 = vadd.f32 %v6863_v8, %v13190_v61  ;;  %v9134_v1 = vpop.f32.mrb[247].mxu1 }
 0x7a9   :  { %9264 = vtanh.f32 %v6867_v38 }
 0x7b3   :  { %v9265_v49 = vpop.eup %9264 }
 0x7b4   :  { %9144 = vmatmul.mubr.msk.f32.vlgmr.msra.gmra.mrb[248].mxu1 %vm6481_vm13, %v9265_v49 }
 0x7b5   :  { %9231 = vmatpush3.bf16.msra.mxu1 %v13161_v45  ;;  %9154 = vmatprep.mubr.msk.f32.mxu1 %vm9304_vm12, %v9305_v55 }
 0x7b6   :  { %9232 = vmatprep.subr.bf16.mxu1 %v9303_v48 }
 0x7b9   :  { %9234 = vmatpush3.bf16.msra.mxu1 %v13173_v22 }
 0x7ba   :  { %9235 = vmatprep.subr.bf16.mxu1 %v9303_v48 }
 0x887   :  { %v6938_v35 = vpop.f32.mrb[248].mxu1 }
 0x888   :  { %v6943_v26 = vrot.slane %v6938_v35, 6  ;;  %v9145_v20 = vpop.f32.mrb[249].mxu1 }
 0x88a   :  { %v6945_v46 = vadd.f32 %v6943_v26, %v13190_v61 }
 0x88c   :  { %9266 = vtanh.f32 %v6945_v46 }
 0x896   :  { %v9267_v25 = vpop.eup %9266 }
 0x897   :  { %v6948_v41 = vrot.slane %v9267_v25, 2 }
 0x899   :  { %9155 = vmatmul.mubr.msk.f32.vlgmr.msra.gmra.mrb[250].mxu1 %vm6481_vm13, %v6948_v41 }
 0x89a   :  { %9237 = vmatpush3.bf16.msra.mxu1 %v13161_v45  ;;  %9165 = vmatprep.mubr.msk.f32.mxu1 %vm9304_vm12, %v9305_v55 }
 0x89b   :  { %9238 = vmatprep.subr.bf16.mxu1 %v9303_v48 }
 0x89e   :  { %9240 = vmatpush3.bf16.msra.mxu1 %v13173_v22 }
 0x89f   :  { %9241 = vmatprep.subr.bf16.mxu1 %v9303_v48 }
 0x96c   :  { %v7017_v62 = vpop.f32.mrb[250].mxu1 }
 0x96d   :  { %v7022_v3 = vrot.slane %v7017_v62, 4  ;;  %v9156_v5 = vpop.f32.mrb[251].mxu1 }
 0x96f   :  { %v7024_v32 = vadd.f32 %v7022_v3, %v13190_v61 }
 0x971   :  { %9268 = vtanh.f32 %v7024_v32 }
 0x97b   :  { %v9269_v51 = vpop.eup %9268 }
 0x97c   :  { %v7027_v31 = vrot.slane %v9269_v51, 4 }
 0x97e   :  { %9166 = vmatmul.mubr.msk.f32.vlgmr.msra.gmra.mrb[252].mxu1 %vm6481_vm13, %v7027_v31 }
 0x97f   :  { %9176 = vmatprep.mubr.msk.f32.mxu1 %vm9304_vm12, %v9305_v55  ;;  %9243 = vmatpush3.bf16.msra.mxu1 %v9242_v6 }
 0x980   :  { %9244 = vmatprep.subr.bf16.mxu1 %v9303_v48 }
 0x983   :  { %9246 = vmatpush3.bf16.msra.mxu1 %v9245_v24 }
 0xa51   :  { %v7096_v53 = vpop.f32.mrb[252].mxu1 }
 0xa52   :  { %v7101_v21 = vrot.slane %v7096_v53, 2  ;;  %v9167_v12 = vpop.f32.mrb[253].mxu1 }
 0xa54   :  { %v7103_v60 = vadd.f32 %v7101_v21, %v13190_v61 }
 0xa56   :  { %9270 = vtanh.f32 %v7103_v60 }
 0xa60   :  { %v9271_v36 = vpop.eup %9270 }
 0xa61   :  { %v7117_v14 = vrot.slane %v9271_v36, 6 }
 0xa63   :  { %9177 = vmatmul.mubr.msk.f32.vlgmr.msra.gmra.mrb[254].mxu1 %vm6481_vm13, %v7117_v14 }
 0xb36   :  { %v7186_v45 = vpop.f32.mrb[254].mxu1 }
 0xb37   :  { %v7187_v48 = vadd.f32 %v7730_v28, %v7186_v45  ;;  %v9178_v40 = vpop.f32.mrb[255].mxu1 }
 0xb39   :  { %7191 = vst.msk [vmem:[#allocation2] sm:$0x3] %vm7190_vm14, %v7187_v48 }
 0xb3a   :  { %9289 = shalt.err (!%p9286_p4)
}
 0xb3b   :  { %s9290_s0 = scalar_lea.hbm %s13278_s8, 32 }
 0xb3c   :  { %p9291_p5 = scmp.ne.s32.totalorder %s13278_s8, %s9290_s0  ;;  %p9294_p6 = scmp.lt.u32.totalorder %s9290_s0, %s13278_s8 }
 0xb3e   :  { %p9296_p7 = pnand %p9294_p6, %p9291_p5 }
 0xb40   :  { %9299 = shalt.err (!%p9296_p7)
}
 0xb41   :  { %7201 = dma.vmem_to_hbm [thread:$0]  %s7199_s11, 32, %s13278_s8, [#allocation3]  }
 0xb42   :  { %9300 = dma.done.wait [#allocation3], 32  }
 0xb43   :  { %9301 = vsyncadd [#allocation3], 4294967264 }
 0xb44   :  { %7205 = vsyncpa [#allocation3], 1 }

</bundles_post_ra>
